<compile_context>
chip_gen: v6e
topology: v6e:2x2x1
jax: 0.10.0
libtpu: 0.0.40
codegen_flags: <defaults>
</compile_context>

<pallas_src>
import math
import functools

import numpy as np
import jax
import jax.numpy as jnp
from jax.experimental import pallas as pl
from jax.experimental.pallas import tpu as pltpu


# --------------------------------------------------------------------------
# In-kernel helpers (channel-major (C, H*W) values)
# --------------------------------------------------------------------------
def _shifted_taps(x, hh, ww):
    """The 9 zero-padded 3x3 tap shifts of x viewed as (C, hh, ww).

    x is (C, hh*ww), row-major spatial flattening. A 2-D shift by (dh, dw) is a
    circular lane roll by dh*ww + dw in the flattened layout; the wrapped /
    out-of-image positions are exactly the ones zeroed by the boundary masks,
    so roll + mask reproduces padding=1 zero padding without any padded copy.
    """
    cin, p = x.shape
    idx = jax.lax.broadcasted_iota(jnp.int32, (cin, p), 1)
    if (ww & (ww - 1)) == 0:                            # power-of-two fast path
        w_idx = jnp.bitwise_and(idx, ww - 1)
    else:
        w_idx = jnp.remainder(idx, ww)
    taps = []
    for dh in (-1, 0, 1):
        for dw in (-1, 0, 1):
            s = dh * ww + dw                            # static flattened shift
            t = x if s == 0 else pltpu.roll(x, shift=(-s) % p, axis=1)
            conds = []
            if dh == -1:
                conds.append(idx >= ww)                 # needs h >= 1
            elif dh == 1:
                conds.append(idx < (hh - 1) * ww)       # needs h <= hh-2
            if dw == -1:
                conds.append(w_idx >= 1)                # needs w >= 1
            elif dw == 1:
                conds.append(w_idx <= ww - 2)           # needs w <= ww-2
            if conds:
                t = jnp.where(functools.reduce(jnp.logical_and, conds), t, 0.0)
            taps.append(t.astype(jnp.bfloat16))
    return taps


def _conv3x3_bn_relu(x, w_ref, sc_ref, bi_ref, hh, ww):
    """3x3 conv (pad=1, no bias) + folded-BN affine + ReLU.

    x: (Cin, hh*ww) f32; w_ref: (Cout, 9*Cin) bf16 (tap-major columns);
    sc_ref / bi_ref: (Cout, 1) f32.  Returns (Cout, hh*ww) f32.
    """
    xcol = jnp.concatenate(_shifted_taps(x, hh, ww), axis=0)   # (9*Cin, P) bf16
    y = jnp.dot(w_ref[...], xcol, preferred_element_type=jnp.float32)
    y = y * sc_ref[...] + bi_ref[...]
    return jnp.maximum(y, 0.0)


def _make_mask_head_kernel(H, W, TH, TW):
    def kernel(x_ref,
               w0_ref, s0_ref, b0_ref,
               w1_ref, s1_ref, b1_ref,
               w2_ref, s2_ref, b2_ref,
               w3_ref, s3_ref, b3_ref,
               m_ref, o_ref):
        x = x_ref[...].astype(jnp.float32)                      # (Cin0, H*W)
        h = _conv3x3_bn_relu(x, w0_ref, s0_ref, b0_ref, H, W)
        h = _conv3x3_bn_relu(h, w1_ref, s1_ref, b1_ref, H, W)
        h = _conv3x3_bn_relu(h, w2_ref, s2_ref, b2_ref, H, W)
        # Bilinear x2 upsample (align_corners=False, matches the reference's
        # hardcoded `idx == 3` placement) as one matmul with the precomputed
        # kron(Ah, Aw)^T interpolation matrix: (C, H*W) @ (H*W, TH*TW).
        h = jnp.dot(h.astype(jnp.bfloat16), m_ref[...],
                    preferred_element_type=jnp.float32)
        h = _conv3x3_bn_relu(h, w3_ref, s3_ref, b3_ref, TH, TW)
        o_ref[...] = h.astype(o_ref.dtype)
    return kernel


# --------------------------------------------------------------------------
# Host-side wrapper
# --------------------------------------------------------------------------
def mask_head_forward(x_nchw, params, m_t, th, tw):
    """x_nchw: (N, Cin, H, W); params: 4x (w (Cout,9Cin) bf16, scale, bias);
    m_t: (H*W, th*tw) bf16 bilinear interpolation matrix."""
    N, C0, H, W = x_nchw.shape
    P0, P1 = H * W, th * tw
    c_out = params[-1][0].shape[0]

    x = x_nchw.reshape(N, C0, P0)            # contiguous reshape, no transpose

    in_specs = [pl.BlockSpec((None, C0, P0), lambda n: (n, 0, 0))]
    operands = [x]
    for w2d, sc, bi in params:
        in_specs += [pl.BlockSpec(w2d.shape, lambda n: (0, 0)),
                     pl.BlockSpec(sc.shape, lambda n: (0, 0)),
                     pl.BlockSpec(bi.shape, lambda n: (0, 0))]
        operands += [w2d, sc, bi]
    in_specs.append(pl.BlockSpec(m_t.shape, lambda n: (0, 0)))
    operands.append(m_t)

    out = pl.pallas_call(
        _make_mask_head_kernel(H, W, th, tw),
        out_shape=jax.ShapeDtypeStruct((N, c_out, P1), jnp.float32),
        grid=(N,),
        in_specs=in_specs,
        out_specs=pl.BlockSpec((None, c_out, P1), lambda n: (n, 0, 0)),
        compiler_params=pltpu.CompilerParams(
            dimension_semantics=("parallel",)),
    )(*operands)
    return out.reshape(N, c_out, th, tw)     # back to NCHW, contiguous reshape


def _interp_matrix(in_size, out_size):
    """1-D bilinear weights matching PyTorch F.interpolate(align_corners=False)."""
    scale = in_size / out_size
    dst = np.arange(out_size, dtype=np.float64)
    src = np.clip((dst + 0.5) * scale - 0.5, 0.0, None)
    x0 = np.minimum(np.floor(src).astype(np.int64), in_size - 1)
    x1 = np.minimum(x0 + 1, in_size - 1)
    w1 = (src - x0).astype(np.float32)
    A = np.zeros((out_size, in_size), np.float32)
    A[np.arange(out_size), x0] += 1.0 - w1
    A[np.arange(out_size), x1] += w1
    return A


class Args:
    mask_head_num_convs = 4
    mask_head_hidden_channel = 32
    mask_head_out_channel = 16
    mask_scale_ratio = 2.0


class MaskHeadPallas:
    """Fused Pallas implementation of MaskHead.forward (eval-mode BN)."""

    def __init__(self, in_channels, args, key):
        # The reference module hardcodes the resize at idx == 3 (before the 4th
        # conv); the fused kernel assumes the default 4-conv head.
        assert args.mask_head_num_convs == 4, "fused kernel assumes 4 convs"
        self.num_convs = args.mask_head_num_convs
        self.mask_scale_ratio = args.mask_scale_ratio
        self.params = []
        eps = 1e-5
        for i in range(self.num_convs):
            cin = in_channels if i == 0 else args.mask_head_hidden_channel
            cout = (args.mask_head_hidden_channel
                    if i < self.num_convs - 1 else args.mask_head_out_channel)
            key, kw, kg, kb, km, kv = jax.random.split(key, 6)
            w = jax.random.normal(kw, (3, 3, cin, cout), jnp.float32)
            w = w * (1.0 / math.sqrt(9 * cin))
            gamma = 1.0 + 0.1 * jax.random.normal(kg, (cout,), jnp.float32)
            beta = 0.1 * jax.random.normal(kb, (cout,), jnp.float32)
            mean = 0.1 * jax.random.normal(km, (cout,), jnp.float32)
            var = jnp.abs(1.0 + 0.1 * jax.random.normal(kv, (cout,), jnp.float32))
            scale = gamma / jnp.sqrt(var + eps)          # eval-mode BN fold
            bias = beta - mean * scale
            # (Cout, 9*Cin), tap-major columns, bf16 operands for the MXU.
            w2d = jnp.transpose(w.reshape(9 * cin, cout)).astype(jnp.bfloat16)
            self.params.append((w2d,
                                scale.reshape(cout, 1).astype(jnp.float32),
                                bias.reshape(cout, 1).astype(jnp.float32)))
        self._m_cache = {}

    def _resize_matrix(self, h, w):
        th = int(h * self.mask_scale_ratio)
        tw = int(w * self.mask_scale_ratio)
        cache_key = (h, w, th, tw)
        if cache_key not in self._m_cache:
            m = np.kron(_interp_matrix(h, th), _interp_matrix(w, tw))  # (th*tw, h*w)
            # scale=2 align_corners=False weights (0.25/0.75 products) are exact
            # in bf16; built once and cached (no per-call host->device rebuild).
            self._m_cache[cache_key] = jnp.asarray(m.T, dtype=jnp.bfloat16)
        return self._m_cache[cache_key], th, tw

    def __call__(self, x_nchw):
        _, _, h, w = x_nchw.shape
        m_t, th, tw = self._resize_matrix(h, w)
        return mask_head_forward(x_nchw, self.params, m_t, th, tw)


if __name__ == "__main__":
    key = jax.random.PRNGKey(0)
    key, kx, kp = jax.random.split(key, 3)

    in_channels = 16                     # small stand-in for the default 2048
    args = Args()
    head = MaskHeadPallas(in_channels, args, kp)

    # NCHW input, like the PyTorch module expects.
    x = jax.random.normal(kx, (2, in_channels, 16, 16), jnp.float32)

    out = head(x)
    out = jax.block_until_ready(out)

    expected = (2, args.mask_head_out_channel,
                int(16 * args.mask_scale_ratio), int(16 * args.mask_scale_ratio))
    assert out.shape == expected, (out.shape, expected)
    assert jnp.all(jnp.isfinite(out))
    print("KERNEL_OK")
</pallas_src>

<mosaic_0001>
module attributes {stable_mosaic.version = 11 : i64} {
  func.func @kernel(%arg0: i32, %arg1: memref<1x16x256xf32, #tpu.memory_space<vmem>>, %arg2: memref<32x144xbf16, #tpu.memory_space<vmem>>, %arg3: memref<32x1xf32, #tpu.memory_space<vmem>>, %arg4: memref<32x1xf32, #tpu.memory_space<vmem>>, %arg5: memref<32x288xbf16, #tpu.memory_space<vmem>>, %arg6: memref<32x1xf32, #tpu.memory_space<vmem>>, %arg7: memref<32x1xf32, #tpu.memory_space<vmem>>, %arg8: memref<32x288xbf16, #tpu.memory_space<vmem>>, %arg9: memref<32x1xf32, #tpu.memory_space<vmem>>, %arg10: memref<32x1xf32, #tpu.memory_space<vmem>>, %arg11: memref<16x288xbf16, #tpu.memory_space<vmem>>, %arg12: memref<16x1xf32, #tpu.memory_space<vmem>>, %arg13: memref<16x1xf32, #tpu.memory_space<vmem>>, %arg14: memref<256x1024xbf16, #tpu.memory_space<vmem>>, %arg15: memref<1x16x1024xf32, #tpu.memory_space<vmem>>) attributes {dimension_semantics = [#tpu.dimension_semantics<parallel>], iteration_bounds = array<i64: 2>, scalar_prefetch = 0 : i64, scratch_operands = 0 : i64, tpu.core_type = #tpu.core_type<tc>, window_params = [{transform_indices = @transform_0, window_bounds = array<i64: 1, 16, 256>}, {pipeline_mode = #tpu.pipeline_mode<synchronous>, transform_indices = @transform_1, window_bounds = array<i64: 32, 144>}, {pipeline_mode = #tpu.pipeline_mode<synchronous>, transform_indices = @transform_2, window_bounds = array<i64: 32, 1>}, {pipeline_mode = #tpu.pipeline_mode<synchronous>, transform_indices = @transform_3, window_bounds = array<i64: 32, 1>}, {pipeline_mode = #tpu.pipeline_mode<synchronous>, transform_indices = @transform_4, window_bounds = array<i64: 32, 288>}, {pipeline_mode = #tpu.pipeline_mode<synchronous>, transform_indices = @transform_5, window_bounds = array<i64: 32, 1>}, {pipeline_mode = #tpu.pipeline_mode<synchronous>, transform_indices = @transform_6, window_bounds = array<i64: 32, 1>}, {pipeline_mode = #tpu.pipeline_mode<synchronous>, transform_indices = @transform_7, window_bounds = array<i64: 32, 288>}, {pipeline_mode = #tpu.pipeline_mode<synchronous>, transform_indices = @transform_8, window_bounds = array<i64: 32, 1>}, {pipeline_mode = #tpu.pipeline_mode<synchronous>, transform_indices = @transform_9, window_bounds = array<i64: 32, 1>}, {pipeline_mode = #tpu.pipeline_mode<synchronous>, transform_indices = @transform_10, window_bounds = array<i64: 16, 288>}, {pipeline_mode = #tpu.pipeline_mode<synchronous>, transform_indices = @transform_11, window_bounds = array<i64: 16, 1>}, {pipeline_mode = #tpu.pipeline_mode<synchronous>, transform_indices = @transform_12, window_bounds = array<i64: 16, 1>}, {pipeline_mode = #tpu.pipeline_mode<synchronous>, transform_indices = @transform_13, window_bounds = array<i64: 256, 1024>}, {transform_indices = @transform_14, window_bounds = array<i64: 1, 16, 1024>}]} {
    %c0 = arith.constant 0 : index
    %c0_0 = arith.constant 0 : index
    %c0_1 = arith.constant 0 : index
    %0 = vector.load %arg1[%c0, %c0_0, %c0_1] : memref<1x16x256xf32, #tpu.memory_space<vmem>>, vector<1x16x256xf32>
    %1 = vector.shape_cast %0 : vector<1x16x256xf32> to vector<16x256xf32>
    %2 = tpu.iota {dimensions = array<i32: 1>} : vector<16x256xi32>
    %c15_i32 = arith.constant 15 : i32
    %3 = vector.broadcast %c15_i32 : i32 to vector<16x256xi32>
    %4 = arith.andi %2, %3 : vector<16x256xi32>
    %c17_i32 = arith.constant 17 : i32
    %5 = tpu.dynamic_rotate %1 by %c17_i32 dim 1 : vector<16x256xf32>, i32 -> vector<16x256xf32>
    %c16_i32 = arith.constant 16 : i32
    %6 = vector.broadcast %c16_i32 : i32 to vector<16x256xi32>
    %7 = arith.cmpi sge, %2, %6 : vector<16x256xi32>
    %c1_i32 = arith.constant 1 : i32
    %8 = vector.broadcast %c1_i32 : i32 to vector<16x256xi32>
    %9 = arith.cmpi sge, %4, %8 : vector<16x256xi32>
    %10 = arith.andi %7, %9 : vector<16x256xi1>
    %cst = arith.constant 0.000000e+00 : f32
    %11 = vector.broadcast %cst : f32 to vector<16x256xf32>
    %12 = arith.select %10, %5, %11 : vector<16x256xi1>, vector<16x256xf32>
    %13 = arith.truncf %12 : vector<16x256xf32> to vector<16x256xbf16>
    %c16_i32_2 = arith.constant 16 : i32
    %14 = tpu.dynamic_rotate %1 by %c16_i32_2 dim 1 : vector<16x256xf32>, i32 -> vector<16x256xf32>
    %c16_i32_3 = arith.constant 16 : i32
    %15 = vector.broadcast %c16_i32_3 : i32 to vector<16x256xi32>
    %16 = arith.cmpi sge, %2, %15 : vector<16x256xi32>
    %cst_4 = arith.constant 0.000000e+00 : f32
    %17 = vector.broadcast %cst_4 : f32 to vector<16x256xf32>
    %18 = arith.select %16, %14, %17 : vector<16x256xi1>, vector<16x256xf32>
    %19 = arith.truncf %18 : vector<16x256xf32> to vector<16x256xbf16>
    %c15_i32_5 = arith.constant 15 : i32
    %20 = tpu.dynamic_rotate %1 by %c15_i32_5 dim 1 : vector<16x256xf32>, i32 -> vector<16x256xf32>
    %c16_i32_6 = arith.constant 16 : i32
    %21 = vector.broadcast %c16_i32_6 : i32 to vector<16x256xi32>
    %22 = arith.cmpi sge, %2, %21 : vector<16x256xi32>
    %c14_i32 = arith.constant 14 : i32
    %23 = vector.broadcast %c14_i32 : i32 to vector<16x256xi32>
    %24 = arith.cmpi sle, %4, %23 : vector<16x256xi32>
    %25 = arith.andi %22, %24 : vector<16x256xi1>
    %cst_7 = arith.constant 0.000000e+00 : f32
    %26 = vector.broadcast %cst_7 : f32 to vector<16x256xf32>
    %27 = arith.select %25, %20, %26 : vector<16x256xi1>, vector<16x256xf32>
    %28 = arith.truncf %27 : vector<16x256xf32> to vector<16x256xbf16>
    %c1_i32_8 = arith.constant 1 : i32
    %29 = tpu.dynamic_rotate %1 by %c1_i32_8 dim 1 : vector<16x256xf32>, i32 -> vector<16x256xf32>
    %c1_i32_9 = arith.constant 1 : i32
    %30 = vector.broadcast %c1_i32_9 : i32 to vector<16x256xi32>
    %31 = arith.cmpi sge, %4, %30 : vector<16x256xi32>
    %cst_10 = arith.constant 0.000000e+00 : f32
    %32 = vector.broadcast %cst_10 : f32 to vector<16x256xf32>
    %33 = arith.select %31, %29, %32 : vector<16x256xi1>, vector<16x256xf32>
    %34 = arith.truncf %33 : vector<16x256xf32> to vector<16x256xbf16>
    %35 = arith.truncf %1 : vector<16x256xf32> to vector<16x256xbf16>
    %c255_i32 = arith.constant 255 : i32
    %36 = tpu.dynamic_rotate %1 by %c255_i32 dim 1 : vector<16x256xf32>, i32 -> vector<16x256xf32>
    %c14_i32_11 = arith.constant 14 : i32
    %37 = vector.broadcast %c14_i32_11 : i32 to vector<16x256xi32>
    %38 = arith.cmpi sle, %4, %37 : vector<16x256xi32>
    %cst_12 = arith.constant 0.000000e+00 : f32
    %39 = vector.broadcast %cst_12 : f32 to vector<16x256xf32>
    %40 = arith.select %38, %36, %39 : vector<16x256xi1>, vector<16x256xf32>
    %41 = arith.truncf %40 : vector<16x256xf32> to vector<16x256xbf16>
    %c241_i32 = arith.constant 241 : i32
    %42 = tpu.dynamic_rotate %1 by %c241_i32 dim 1 : vector<16x256xf32>, i32 -> vector<16x256xf32>
    %c240_i32 = arith.constant 240 : i32
    %43 = vector.broadcast %c240_i32 : i32 to vector<16x256xi32>
    %44 = arith.cmpi slt, %2, %43 : vector<16x256xi32>
    %c1_i32_13 = arith.constant 1 : i32
    %45 = vector.broadcast %c1_i32_13 : i32 to vector<16x256xi32>
    %46 = arith.cmpi sge, %4, %45 : vector<16x256xi32>
    %47 = arith.andi %44, %46 : vector<16x256xi1>
    %cst_14 = arith.constant 0.000000e+00 : f32
    %48 = vector.broadcast %cst_14 : f32 to vector<16x256xf32>
    %49 = arith.select %47, %42, %48 : vector<16x256xi1>, vector<16x256xf32>
    %50 = arith.truncf %49 : vector<16x256xf32> to vector<16x256xbf16>
    %c240_i32_15 = arith.constant 240 : i32
    %51 = tpu.dynamic_rotate %1 by %c240_i32_15 dim 1 : vector<16x256xf32>, i32 -> vector<16x256xf32>
    %c240_i32_16 = arith.constant 240 : i32
    %52 = vector.broadcast %c240_i32_16 : i32 to vector<16x256xi32>
    %53 = arith.cmpi slt, %2, %52 : vector<16x256xi32>
    %cst_17 = arith.constant 0.000000e+00 : f32
    %54 = vector.broadcast %cst_17 : f32 to vector<16x256xf32>
    %55 = arith.select %53, %51, %54 : vector<16x256xi1>, vector<16x256xf32>
    %56 = arith.truncf %55 : vector<16x256xf32> to vector<16x256xbf16>
    %c239_i32 = arith.constant 239 : i32
    %57 = tpu.dynamic_rotate %1 by %c239_i32 dim 1 : vector<16x256xf32>, i32 -> vector<16x256xf32>
    %c240_i32_18 = arith.constant 240 : i32
    %58 = vector.broadcast %c240_i32_18 : i32 to vector<16x256xi32>
    %59 = arith.cmpi slt, %2, %58 : vector<16x256xi32>
    %c14_i32_19 = arith.constant 14 : i32
    %60 = vector.broadcast %c14_i32_19 : i32 to vector<16x256xi32>
    %61 = arith.cmpi sle, %4, %60 : vector<16x256xi32>
    %62 = arith.andi %59, %61 : vector<16x256xi1>
    %cst_20 = arith.constant 0.000000e+00 : f32
    %63 = vector.broadcast %cst_20 : f32 to vector<16x256xf32>
    %64 = arith.select %62, %57, %63 : vector<16x256xi1>, vector<16x256xf32>
    %65 = arith.truncf %64 : vector<16x256xf32> to vector<16x256xbf16>
    %66 = tpu.concatenate %13, %19, %28, %34, %35, %41, %50, %56, %65 in 0 : vector<16x256xbf16>, vector<16x256xbf16>, vector<16x256xbf16>, vector<16x256xbf16>, vector<16x256xbf16>, vector<16x256xbf16>, vector<16x256xbf16>, vector<16x256xbf16>, vector<16x256xbf16> -> vector<144x256xbf16>
    %c0_21 = arith.constant 0 : index
    %c0_22 = arith.constant 0 : index
    %67 = vector.load %arg2[%c0_21, %c0_22] : memref<32x144xbf16, #tpu.memory_space<vmem>>, vector<32x144xbf16>
    %cst_23 = arith.constant dense<0.000000e+00> : vector<32x256xf32>
    %68 = tpu.matmul %67, %66, %cst_23 {dimension_numbers = #tpu.dot_dimension_numbers<[1], [0], [0], [1], [0, 0, 1, 1], [], []>} : vector<32x144xbf16>, vector<144x256xbf16>, vector<32x256xf32> -> vector<32x256xf32>
    %c0_24 = arith.constant 0 : index
    %c0_25 = arith.constant 0 : index
    %69 = vector.load %arg3[%c0_24, %c0_25] : memref<32x1xf32, #tpu.memory_space<vmem>>, vector<32x1xf32>
    %70 = vector.broadcast %69 : vector<32x1xf32> to vector<32x256xf32>
    %71 = arith.mulf %68, %70 : vector<32x256xf32>
    %c0_26 = arith.constant 0 : index
    %c0_27 = arith.constant 0 : index
    %72 = vector.load %arg4[%c0_26, %c0_27] : memref<32x1xf32, #tpu.memory_space<vmem>>, vector<32x1xf32>
    %73 = vector.broadcast %72 : vector<32x1xf32> to vector<32x256xf32>
    %74 = arith.addf %71, %73 : vector<32x256xf32>
    %cst_28 = arith.constant 0.000000e+00 : f32
    %75 = vector.broadcast %cst_28 : f32 to vector<32x256xf32>
    %76 = arith.maximumf %74, %75 : vector<32x256xf32>
    %77 = tpu.iota {dimensions = array<i32: 1>} : vector<32x256xi32>
    %c15_i32_29 = arith.constant 15 : i32
    %78 = vector.broadcast %c15_i32_29 : i32 to vector<32x256xi32>
    %79 = arith.andi %77, %78 : vector<32x256xi32>
    %c17_i32_30 = arith.constant 17 : i32
    %80 = tpu.dynamic_rotate %76 by %c17_i32_30 dim 1 : vector<32x256xf32>, i32 -> vector<32x256xf32>
    %c16_i32_31 = arith.constant 16 : i32
    %81 = vector.broadcast %c16_i32_31 : i32 to vector<32x256xi32>
    %82 = arith.cmpi sge, %77, %81 : vector<32x256xi32>
    %c1_i32_32 = arith.constant 1 : i32
    %83 = vector.broadcast %c1_i32_32 : i32 to vector<32x256xi32>
    %84 = arith.cmpi sge, %79, %83 : vector<32x256xi32>
    %85 = arith.andi %82, %84 : vector<32x256xi1>
    %cst_33 = arith.constant 0.000000e+00 : f32
    %86 = vector.broadcast %cst_33 : f32 to vector<32x256xf32>
    %87 = arith.select %85, %80, %86 : vector<32x256xi1>, vector<32x256xf32>
    %88 = arith.truncf %87 : vector<32x256xf32> to vector<32x256xbf16>
    %c16_i32_34 = arith.constant 16 : i32
    %89 = tpu.dynamic_rotate %76 by %c16_i32_34 dim 1 : vector<32x256xf32>, i32 -> vector<32x256xf32>
    %c16_i32_35 = arith.constant 16 : i32
    %90 = vector.broadcast %c16_i32_35 : i32 to vector<32x256xi32>
    %91 = arith.cmpi sge, %77, %90 : vector<32x256xi32>
    %cst_36 = arith.constant 0.000000e+00 : f32
    %92 = vector.broadcast %cst_36 : f32 to vector<32x256xf32>
    %93 = arith.select %91, %89, %92 : vector<32x256xi1>, vector<32x256xf32>
    %94 = arith.truncf %93 : vector<32x256xf32> to vector<32x256xbf16>
    %c15_i32_37 = arith.constant 15 : i32
    %95 = tpu.dynamic_rotate %76 by %c15_i32_37 dim 1 : vector<32x256xf32>, i32 -> vector<32x256xf32>
    %c16_i32_38 = arith.constant 16 : i32
    %96 = vector.broadcast %c16_i32_38 : i32 to vector<32x256xi32>
    %97 = arith.cmpi sge, %77, %96 : vector<32x256xi32>
    %c14_i32_39 = arith.constant 14 : i32
    %98 = vector.broadcast %c14_i32_39 : i32 to vector<32x256xi32>
    %99 = arith.cmpi sle, %79, %98 : vector<32x256xi32>
    %100 = arith.andi %97, %99 : vector<32x256xi1>
    %cst_40 = arith.constant 0.000000e+00 : f32
    %101 = vector.broadcast %cst_40 : f32 to vector<32x256xf32>
    %102 = arith.select %100, %95, %101 : vector<32x256xi1>, vector<32x256xf32>
    %103 = arith.truncf %102 : vector<32x256xf32> to vector<32x256xbf16>
    %c1_i32_41 = arith.constant 1 : i32
    %104 = tpu.dynamic_rotate %76 by %c1_i32_41 dim 1 : vector<32x256xf32>, i32 -> vector<32x256xf32>
    %c1_i32_42 = arith.constant 1 : i32
    %105 = vector.broadcast %c1_i32_42 : i32 to vector<32x256xi32>
    %106 = arith.cmpi sge, %79, %105 : vector<32x256xi32>
    %cst_43 = arith.constant 0.000000e+00 : f32
    %107 = vector.broadcast %cst_43 : f32 to vector<32x256xf32>
    %108 = arith.select %106, %104, %107 : vector<32x256xi1>, vector<32x256xf32>
    %109 = arith.truncf %108 : vector<32x256xf32> to vector<32x256xbf16>
    %110 = arith.truncf %76 : vector<32x256xf32> to vector<32x256xbf16>
    %c255_i32_44 = arith.constant 255 : i32
    %111 = tpu.dynamic_rotate %76 by %c255_i32_44 dim 1 : vector<32x256xf32>, i32 -> vector<32x256xf32>
    %c14_i32_45 = arith.constant 14 : i32
    %112 = vector.broadcast %c14_i32_45 : i32 to vector<32x256xi32>
    %113 = arith.cmpi sle, %79, %112 : vector<32x256xi32>
    %cst_46 = arith.constant 0.000000e+00 : f32
    %114 = vector.broadcast %cst_46 : f32 to vector<32x256xf32>
    %115 = arith.select %113, %111, %114 : vector<32x256xi1>, vector<32x256xf32>
    %116 = arith.truncf %115 : vector<32x256xf32> to vector<32x256xbf16>
    %c241_i32_47 = arith.constant 241 : i32
    %117 = tpu.dynamic_rotate %76 by %c241_i32_47 dim 1 : vector<32x256xf32>, i32 -> vector<32x256xf32>
    %c240_i32_48 = arith.constant 240 : i32
    %118 = vector.broadcast %c240_i32_48 : i32 to vector<32x256xi32>
    %119 = arith.cmpi slt, %77, %118 : vector<32x256xi32>
    %c1_i32_49 = arith.constant 1 : i32
    %120 = vector.broadcast %c1_i32_49 : i32 to vector<32x256xi32>
    %121 = arith.cmpi sge, %79, %120 : vector<32x256xi32>
    %122 = arith.andi %119, %121 : vector<32x256xi1>
    %cst_50 = arith.constant 0.000000e+00 : f32
    %123 = vector.broadcast %cst_50 : f32 to vector<32x256xf32>
    %124 = arith.select %122, %117, %123 : vector<32x256xi1>, vector<32x256xf32>
    %125 = arith.truncf %124 : vector<32x256xf32> to vector<32x256xbf16>
    %c240_i32_51 = arith.constant 240 : i32
    %126 = tpu.dynamic_rotate %76 by %c240_i32_51 dim 1 : vector<32x256xf32>, i32 -> vector<32x256xf32>
    %c240_i32_52 = arith.constant 240 : i32
    %127 = vector.broadcast %c240_i32_52 : i32 to vector<32x256xi32>
    %128 = arith.cmpi slt, %77, %127 : vector<32x256xi32>
    %cst_53 = arith.constant 0.000000e+00 : f32
    %129 = vector.broadcast %cst_53 : f32 to vector<32x256xf32>
    %130 = arith.select %128, %126, %129 : vector<32x256xi1>, vector<32x256xf32>
    %131 = arith.truncf %130 : vector<32x256xf32> to vector<32x256xbf16>
    %c239_i32_54 = arith.constant 239 : i32
    %132 = tpu.dynamic_rotate %76 by %c239_i32_54 dim 1 : vector<32x256xf32>, i32 -> vector<32x256xf32>
    %c240_i32_55 = arith.constant 240 : i32
    %133 = vector.broadcast %c240_i32_55 : i32 to vector<32x256xi32>
    %134 = arith.cmpi slt, %77, %133 : vector<32x256xi32>
    %c14_i32_56 = arith.constant 14 : i32
    %135 = vector.broadcast %c14_i32_56 : i32 to vector<32x256xi32>
    %136 = arith.cmpi sle, %79, %135 : vector<32x256xi32>
    %137 = arith.andi %134, %136 : vector<32x256xi1>
    %cst_57 = arith.constant 0.000000e+00 : f32
    %138 = vector.broadcast %cst_57 : f32 to vector<32x256xf32>
    %139 = arith.select %137, %132, %138 : vector<32x256xi1>, vector<32x256xf32>
    %140 = arith.truncf %139 : vector<32x256xf32> to vector<32x256xbf16>
    %141 = tpu.concatenate %88, %94, %103, %109, %110, %116, %125, %131, %140 in 0 : vector<32x256xbf16>, vector<32x256xbf16>, vector<32x256xbf16>, vector<32x256xbf16>, vector<32x256xbf16>, vector<32x256xbf16>, vector<32x256xbf16>, vector<32x256xbf16>, vector<32x256xbf16> -> vector<288x256xbf16>
    %c0_58 = arith.constant 0 : index
    %c0_59 = arith.constant 0 : index
    %142 = vector.load %arg5[%c0_58, %c0_59] : memref<32x288xbf16, #tpu.memory_space<vmem>>, vector<32x288xbf16>
    %cst_60 = arith.constant dense<0.000000e+00> : vector<32x256xf32>
    %143 = tpu.matmul %142, %141, %cst_60 {dimension_numbers = #tpu.dot_dimension_numbers<[1], [0], [0], [1], [0, 0, 1, 1], [], []>} : vector<32x288xbf16>, vector<288x256xbf16>, vector<32x256xf32> -> vector<32x256xf32>
    %c0_61 = arith.constant 0 : index
    %c0_62 = arith.constant 0 : index
    %144 = vector.load %arg6[%c0_61, %c0_62] : memref<32x1xf32, #tpu.memory_space<vmem>>, vector<32x1xf32>
    %145 = vector.broadcast %144 : vector<32x1xf32> to vector<32x256xf32>
    %146 = arith.mulf %143, %145 : vector<32x256xf32>
    %c0_63 = arith.constant 0 : index
    %c0_64 = arith.constant 0 : index
    %147 = vector.load %arg7[%c0_63, %c0_64] : memref<32x1xf32, #tpu.memory_space<vmem>>, vector<32x1xf32>
    %148 = vector.broadcast %147 : vector<32x1xf32> to vector<32x256xf32>
    %149 = arith.addf %146, %148 : vector<32x256xf32>
    %cst_65 = arith.constant 0.000000e+00 : f32
    %150 = vector.broadcast %cst_65 : f32 to vector<32x256xf32>
    %151 = arith.maximumf %149, %150 : vector<32x256xf32>
    %152 = tpu.iota {dimensions = array<i32: 1>} : vector<32x256xi32>
    %c15_i32_66 = arith.constant 15 : i32
    %153 = vector.broadcast %c15_i32_66 : i32 to vector<32x256xi32>
    %154 = arith.andi %152, %153 : vector<32x256xi32>
    %c17_i32_67 = arith.constant 17 : i32
    %155 = tpu.dynamic_rotate %151 by %c17_i32_67 dim 1 : vector<32x256xf32>, i32 -> vector<32x256xf32>
    %c16_i32_68 = arith.constant 16 : i32
    %156 = vector.broadcast %c16_i32_68 : i32 to vector<32x256xi32>
    %157 = arith.cmpi sge, %152, %156 : vector<32x256xi32>
    %c1_i32_69 = arith.constant 1 : i32
    %158 = vector.broadcast %c1_i32_69 : i32 to vector<32x256xi32>
    %159 = arith.cmpi sge, %154, %158 : vector<32x256xi32>
    %160 = arith.andi %157, %159 : vector<32x256xi1>
    %cst_70 = arith.constant 0.000000e+00 : f32
    %161 = vector.broadcast %cst_70 : f32 to vector<32x256xf32>
    %162 = arith.select %160, %155, %161 : vector<32x256xi1>, vector<32x256xf32>
    %163 = arith.truncf %162 : vector<32x256xf32> to vector<32x256xbf16>
    %c16_i32_71 = arith.constant 16 : i32
    %164 = tpu.dynamic_rotate %151 by %c16_i32_71 dim 1 : vector<32x256xf32>, i32 -> vector<32x256xf32>
    %c16_i32_72 = arith.constant 16 : i32
    %165 = vector.broadcast %c16_i32_72 : i32 to vector<32x256xi32>
    %166 = arith.cmpi sge, %152, %165 : vector<32x256xi32>
    %cst_73 = arith.constant 0.000000e+00 : f32
    %167 = vector.broadcast %cst_73 : f32 to vector<32x256xf32>
    %168 = arith.select %166, %164, %167 : vector<32x256xi1>, vector<32x256xf32>
    %169 = arith.truncf %168 : vector<32x256xf32> to vector<32x256xbf16>
    %c15_i32_74 = arith.constant 15 : i32
    %170 = tpu.dynamic_rotate %151 by %c15_i32_74 dim 1 : vector<32x256xf32>, i32 -> vector<32x256xf32>
    %c16_i32_75 = arith.constant 16 : i32
    %171 = vector.broadcast %c16_i32_75 : i32 to vector<32x256xi32>
    %172 = arith.cmpi sge, %152, %171 : vector<32x256xi32>
    %c14_i32_76 = arith.constant 14 : i32
    %173 = vector.broadcast %c14_i32_76 : i32 to vector<32x256xi32>
    %174 = arith.cmpi sle, %154, %173 : vector<32x256xi32>
    %175 = arith.andi %172, %174 : vector<32x256xi1>
    %cst_77 = arith.constant 0.000000e+00 : f32
    %176 = vector.broadcast %cst_77 : f32 to vector<32x256xf32>
    %177 = arith.select %175, %170, %176 : vector<32x256xi1>, vector<32x256xf32>
    %178 = arith.truncf %177 : vector<32x256xf32> to vector<32x256xbf16>
    %c1_i32_78 = arith.constant 1 : i32
    %179 = tpu.dynamic_rotate %151 by %c1_i32_78 dim 1 : vector<32x256xf32>, i32 -> vector<32x256xf32>
    %c1_i32_79 = arith.constant 1 : i32
    %180 = vector.broadcast %c1_i32_79 : i32 to vector<32x256xi32>
    %181 = arith.cmpi sge, %154, %180 : vector<32x256xi32>
    %cst_80 = arith.constant 0.000000e+00 : f32
    %182 = vector.broadcast %cst_80 : f32 to vector<32x256xf32>
    %183 = arith.select %181, %179, %182 : vector<32x256xi1>, vector<32x256xf32>
    %184 = arith.truncf %183 : vector<32x256xf32> to vector<32x256xbf16>
    %185 = arith.truncf %151 : vector<32x256xf32> to vector<32x256xbf16>
    %c255_i32_81 = arith.constant 255 : i32
    %186 = tpu.dynamic_rotate %151 by %c255_i32_81 dim 1 : vector<32x256xf32>, i32 -> vector<32x256xf32>
    %c14_i32_82 = arith.constant 14 : i32
    %187 = vector.broadcast %c14_i32_82 : i32 to vector<32x256xi32>
    %188 = arith.cmpi sle, %154, %187 : vector<32x256xi32>
    %cst_83 = arith.constant 0.000000e+00 : f32
    %189 = vector.broadcast %cst_83 : f32 to vector<32x256xf32>
    %190 = arith.select %188, %186, %189 : vector<32x256xi1>, vector<32x256xf32>
    %191 = arith.truncf %190 : vector<32x256xf32> to vector<32x256xbf16>
    %c241_i32_84 = arith.constant 241 : i32
    %192 = tpu.dynamic_rotate %151 by %c241_i32_84 dim 1 : vector<32x256xf32>, i32 -> vector<32x256xf32>
    %c240_i32_85 = arith.constant 240 : i32
    %193 = vector.broadcast %c240_i32_85 : i32 to vector<32x256xi32>
    %194 = arith.cmpi slt, %152, %193 : vector<32x256xi32>
    %c1_i32_86 = arith.constant 1 : i32
    %195 = vector.broadcast %c1_i32_86 : i32 to vector<32x256xi32>
    %196 = arith.cmpi sge, %154, %195 : vector<32x256xi32>
    %197 = arith.andi %194, %196 : vector<32x256xi1>
    %cst_87 = arith.constant 0.000000e+00 : f32
    %198 = vector.broadcast %cst_87 : f32 to vector<32x256xf32>
    %199 = arith.select %197, %192, %198 : vector<32x256xi1>, vector<32x256xf32>
    %200 = arith.truncf %199 : vector<32x256xf32> to vector<32x256xbf16>
    %c240_i32_88 = arith.constant 240 : i32
    %201 = tpu.dynamic_rotate %151 by %c240_i32_88 dim 1 : vector<32x256xf32>, i32 -> vector<32x256xf32>
    %c240_i32_89 = arith.constant 240 : i32
    %202 = vector.broadcast %c240_i32_89 : i32 to vector<32x256xi32>
    %203 = arith.cmpi slt, %152, %202 : vector<32x256xi32>
    %cst_90 = arith.constant 0.000000e+00 : f32
    %204 = vector.broadcast %cst_90 : f32 to vector<32x256xf32>
    %205 = arith.select %203, %201, %204 : vector<32x256xi1>, vector<32x256xf32>
    %206 = arith.truncf %205 : vector<32x256xf32> to vector<32x256xbf16>
    %c239_i32_91 = arith.constant 239 : i32
    %207 = tpu.dynamic_rotate %151 by %c239_i32_91 dim 1 : vector<32x256xf32>, i32 -> vector<32x256xf32>
    %c240_i32_92 = arith.constant 240 : i32
    %208 = vector.broadcast %c240_i32_92 : i32 to vector<32x256xi32>
    %209 = arith.cmpi slt, %152, %208 : vector<32x256xi32>
    %c14_i32_93 = arith.constant 14 : i32
    %210 = vector.broadcast %c14_i32_93 : i32 to vector<32x256xi32>
    %211 = arith.cmpi sle, %154, %210 : vector<32x256xi32>
    %212 = arith.andi %209, %211 : vector<32x256xi1>
    %cst_94 = arith.constant 0.000000e+00 : f32
    %213 = vector.broadcast %cst_94 : f32 to vector<32x256xf32>
    %214 = arith.select %212, %207, %213 : vector<32x256xi1>, vector<32x256xf32>
    %215 = arith.truncf %214 : vector<32x256xf32> to vector<32x256xbf16>
    %216 = tpu.concatenate %163, %169, %178, %184, %185, %191, %200, %206, %215 in 0 : vector<32x256xbf16>, vector<32x256xbf16>, vector<32x256xbf16>, vector<32x256xbf16>, vector<32x256xbf16>, vector<32x256xbf16>, vector<32x256xbf16>, vector<32x256xbf16>, vector<32x256xbf16> -> vector<288x256xbf16>
    %c0_95 = arith.constant 0 : index
    %c0_96 = arith.constant 0 : index
    %217 = vector.load %arg8[%c0_95, %c0_96] : memref<32x288xbf16, #tpu.memory_space<vmem>>, vector<32x288xbf16>
    %cst_97 = arith.constant dense<0.000000e+00> : vector<32x256xf32>
    %218 = tpu.matmul %217, %216, %cst_97 {dimension_numbers = #tpu.dot_dimension_numbers<[1], [0], [0], [1], [0, 0, 1, 1], [], []>} : vector<32x288xbf16>, vector<288x256xbf16>, vector<32x256xf32> -> vector<32x256xf32>
    %c0_98 = arith.constant 0 : index
    %c0_99 = arith.constant 0 : index
    %219 = vector.load %arg9[%c0_98, %c0_99] : memref<32x1xf32, #tpu.memory_space<vmem>>, vector<32x1xf32>
    %220 = vector.broadcast %219 : vector<32x1xf32> to vector<32x256xf32>
    %221 = arith.mulf %218, %220 : vector<32x256xf32>
    %c0_100 = arith.constant 0 : index
    %c0_101 = arith.constant 0 : index
    %222 = vector.load %arg10[%c0_100, %c0_101] : memref<32x1xf32, #tpu.memory_space<vmem>>, vector<32x1xf32>
    %223 = vector.broadcast %222 : vector<32x1xf32> to vector<32x256xf32>
    %224 = arith.addf %221, %223 : vector<32x256xf32>
    %cst_102 = arith.constant 0.000000e+00 : f32
    %225 = vector.broadcast %cst_102 : f32 to vector<32x256xf32>
    %226 = arith.maximumf %224, %225 : vector<32x256xf32>
    %227 = arith.truncf %226 : vector<32x256xf32> to vector<32x256xbf16>
    %c0_103 = arith.constant 0 : index
    %c0_104 = arith.constant 0 : index
    %228 = vector.load %arg14[%c0_103, %c0_104] : memref<256x1024xbf16, #tpu.memory_space<vmem>>, vector<256x1024xbf16>
    %cst_105 = arith.constant dense<0.000000e+00> : vector<32x1024xf32>
    %229 = tpu.matmul %227, %228, %cst_105 {dimension_numbers = #tpu.dot_dimension_numbers<[1], [0], [0], [1], [0, 0, 1, 1], [], []>} : vector<32x256xbf16>, vector<256x1024xbf16>, vector<32x1024xf32> -> vector<32x1024xf32>
    %230 = tpu.iota {dimensions = array<i32: 1>} : vector<32x1024xi32>
    %c31_i32 = arith.constant 31 : i32
    %231 = vector.broadcast %c31_i32 : i32 to vector<32x1024xi32>
    %232 = arith.andi %230, %231 : vector<32x1024xi32>
    %c33_i32 = arith.constant 33 : i32
    %233 = tpu.dynamic_rotate %229 by %c33_i32 dim 1 : vector<32x1024xf32>, i32 -> vector<32x1024xf32>
    %c32_i32 = arith.constant 32 : i32
    %234 = vector.broadcast %c32_i32 : i32 to vector<32x1024xi32>
    %235 = arith.cmpi sge, %230, %234 : vector<32x1024xi32>
    %c1_i32_106 = arith.constant 1 : i32
    %236 = vector.broadcast %c1_i32_106 : i32 to vector<32x1024xi32>
    %237 = arith.cmpi sge, %232, %236 : vector<32x1024xi32>
    %238 = arith.andi %235, %237 : vector<32x1024xi1>
    %cst_107 = arith.constant 0.000000e+00 : f32
    %239 = vector.broadcast %cst_107 : f32 to vector<32x1024xf32>
    %240 = arith.select %238, %233, %239 : vector<32x1024xi1>, vector<32x1024xf32>
    %241 = arith.truncf %240 : vector<32x1024xf32> to vector<32x1024xbf16>
    %c32_i32_108 = arith.constant 32 : i32
    %242 = tpu.dynamic_rotate %229 by %c32_i32_108 dim 1 : vector<32x1024xf32>, i32 -> vector<32x1024xf32>
    %c32_i32_109 = arith.constant 32 : i32
    %243 = vector.broadcast %c32_i32_109 : i32 to vector<32x1024xi32>
    %244 = arith.cmpi sge, %230, %243 : vector<32x1024xi32>
    %cst_110 = arith.constant 0.000000e+00 : f32
    %245 = vector.broadcast %cst_110 : f32 to vector<32x1024xf32>
    %246 = arith.select %244, %242, %245 : vector<32x1024xi1>, vector<32x1024xf32>
    %247 = arith.truncf %246 : vector<32x1024xf32> to vector<32x1024xbf16>
    %c31_i32_111 = arith.constant 31 : i32
    %248 = tpu.dynamic_rotate %229 by %c31_i32_111 dim 1 : vector<32x1024xf32>, i32 -> vector<32x1024xf32>
    %c32_i32_112 = arith.constant 32 : i32
    %249 = vector.broadcast %c32_i32_112 : i32 to vector<32x1024xi32>
    %250 = arith.cmpi sge, %230, %249 : vector<32x1024xi32>
    %c30_i32 = arith.constant 30 : i32
    %251 = vector.broadcast %c30_i32 : i32 to vector<32x1024xi32>
    %252 = arith.cmpi sle, %232, %251 : vector<32x1024xi32>
    %253 = arith.andi %250, %252 : vector<32x1024xi1>
    %cst_113 = arith.constant 0.000000e+00 : f32
    %254 = vector.broadcast %cst_113 : f32 to vector<32x1024xf32>
    %255 = arith.select %253, %248, %254 : vector<32x1024xi1>, vector<32x1024xf32>
    %256 = arith.truncf %255 : vector<32x1024xf32> to vector<32x1024xbf16>
    %c1_i32_114 = arith.constant 1 : i32
    %257 = tpu.dynamic_rotate %229 by %c1_i32_114 dim 1 : vector<32x1024xf32>, i32 -> vector<32x1024xf32>
    %c1_i32_115 = arith.constant 1 : i32
    %258 = vector.broadcast %c1_i32_115 : i32 to vector<32x1024xi32>
    %259 = arith.cmpi sge, %232, %258 : vector<32x1024xi32>
    %cst_116 = arith.constant 0.000000e+00 : f32
    %260 = vector.broadcast %cst_116 : f32 to vector<32x1024xf32>
    %261 = arith.select %259, %257, %260 : vector<32x1024xi1>, vector<32x1024xf32>
    %262 = arith.truncf %261 : vector<32x1024xf32> to vector<32x1024xbf16>
    %263 = arith.truncf %229 : vector<32x1024xf32> to vector<32x1024xbf16>
    %c1023_i32 = arith.constant 1023 : i32
    %264 = tpu.dynamic_rotate %229 by %c1023_i32 dim 1 : vector<32x1024xf32>, i32 -> vector<32x1024xf32>
    %c30_i32_117 = arith.constant 30 : i32
    %265 = vector.broadcast %c30_i32_117 : i32 to vector<32x1024xi32>
    %266 = arith.cmpi sle, %232, %265 : vector<32x1024xi32>
    %cst_118 = arith.constant 0.000000e+00 : f32
    %267 = vector.broadcast %cst_118 : f32 to vector<32x1024xf32>
    %268 = arith.select %266, %264, %267 : vector<32x1024xi1>, vector<32x1024xf32>
    %269 = arith.truncf %268 : vector<32x1024xf32> to vector<32x1024xbf16>
    %c993_i32 = arith.constant 993 : i32
    %270 = tpu.dynamic_rotate %229 by %c993_i32 dim 1 : vector<32x1024xf32>, i32 -> vector<32x1024xf32>
    %c992_i32 = arith.constant 992 : i32
    %271 = vector.broadcast %c992_i32 : i32 to vector<32x1024xi32>
    %272 = arith.cmpi slt, %230, %271 : vector<32x1024xi32>
    %c1_i32_119 = arith.constant 1 : i32
    %273 = vector.broadcast %c1_i32_119 : i32 to vector<32x1024xi32>
    %274 = arith.cmpi sge, %232, %273 : vector<32x1024xi32>
    %275 = arith.andi %272, %274 : vector<32x1024xi1>
    %cst_120 = arith.constant 0.000000e+00 : f32
    %276 = vector.broadcast %cst_120 : f32 to vector<32x1024xf32>
    %277 = arith.select %275, %270, %276 : vector<32x1024xi1>, vector<32x1024xf32>
    %278 = arith.truncf %277 : vector<32x1024xf32> to vector<32x1024xbf16>
    %c992_i32_121 = arith.constant 992 : i32
    %279 = tpu.dynamic_rotate %229 by %c992_i32_121 dim 1 : vector<32x1024xf32>, i32 -> vector<32x1024xf32>
    %c992_i32_122 = arith.constant 992 : i32
    %280 = vector.broadcast %c992_i32_122 : i32 to vector<32x1024xi32>
    %281 = arith.cmpi slt, %230, %280 : vector<32x1024xi32>
    %cst_123 = arith.constant 0.000000e+00 : f32
    %282 = vector.broadcast %cst_123 : f32 to vector<32x1024xf32>
    %283 = arith.select %281, %279, %282 : vector<32x1024xi1>, vector<32x1024xf32>
    %284 = arith.truncf %283 : vector<32x1024xf32> to vector<32x1024xbf16>
    %c991_i32 = arith.constant 991 : i32
    %285 = tpu.dynamic_rotate %229 by %c991_i32 dim 1 : vector<32x1024xf32>, i32 -> vector<32x1024xf32>
    %c992_i32_124 = arith.constant 992 : i32
    %286 = vector.broadcast %c992_i32_124 : i32 to vector<32x1024xi32>
    %287 = arith.cmpi slt, %230, %286 : vector<32x1024xi32>
    %c30_i32_125 = arith.constant 30 : i32
    %288 = vector.broadcast %c30_i32_125 : i32 to vector<32x1024xi32>
    %289 = arith.cmpi sle, %232, %288 : vector<32x1024xi32>
    %290 = arith.andi %287, %289 : vector<32x1024xi1>
    %cst_126 = arith.constant 0.000000e+00 : f32
    %291 = vector.broadcast %cst_126 : f32 to vector<32x1024xf32>
    %292 = arith.select %290, %285, %291 : vector<32x1024xi1>, vector<32x1024xf32>
    %293 = arith.truncf %292 : vector<32x1024xf32> to vector<32x1024xbf16>
    %294 = tpu.concatenate %241, %247, %256, %262, %263, %269, %278, %284, %293 in 0 : vector<32x1024xbf16>, vector<32x1024xbf16>, vector<32x1024xbf16>, vector<32x1024xbf16>, vector<32x1024xbf16>, vector<32x1024xbf16>, vector<32x1024xbf16>, vector<32x1024xbf16>, vector<32x1024xbf16> -> vector<288x1024xbf16>
    %c0_127 = arith.constant 0 : index
    %c0_128 = arith.constant 0 : index
    %295 = vector.load %arg11[%c0_127, %c0_128] : memref<16x288xbf16, #tpu.memory_space<vmem>>, vector<16x288xbf16>
    %cst_129 = arith.constant dense<0.000000e+00> : vector<16x1024xf32>
    %296 = tpu.matmul %295, %294, %cst_129 {dimension_numbers = #tpu.dot_dimension_numbers<[1], [0], [0], [1], [0, 0, 1, 1], [], []>} : vector<16x288xbf16>, vector<288x1024xbf16>, vector<16x1024xf32> -> vector<16x1024xf32>
    %c0_130 = arith.constant 0 : index
    %c0_131 = arith.constant 0 : index
    %297 = vector.load %arg12[%c0_130, %c0_131] : memref<16x1xf32, #tpu.memory_space<vmem>>, vector<16x1xf32>
    %298 = vector.broadcast %297 : vector<16x1xf32> to vector<16x1024xf32>
    %299 = arith.mulf %296, %298 : vector<16x1024xf32>
    %c0_132 = arith.constant 0 : index
    %c0_133 = arith.constant 0 : index
    %300 = vector.load %arg13[%c0_132, %c0_133] : memref<16x1xf32, #tpu.memory_space<vmem>>, vector<16x1xf32>
    %301 = vector.broadcast %300 : vector<16x1xf32> to vector<16x1024xf32>
    %302 = arith.addf %299, %301 : vector<16x1024xf32>
    %cst_134 = arith.constant 0.000000e+00 : f32
    %303 = vector.broadcast %cst_134 : f32 to vector<16x1024xf32>
    %304 = arith.maximumf %302, %303 : vector<16x1024xf32>
    %c0_135 = arith.constant 0 : index
    %c0_136 = arith.constant 0 : index
    %c0_137 = arith.constant 0 : index
    %305 = vector.load %arg15[%c0_135, %c0_136, %c0_137] : memref<1x16x1024xf32, #tpu.memory_space<vmem>>, vector<1x16x1024xf32>
    %306 = vector.shape_cast %305 : vector<1x16x1024xf32> to vector<16x1024xf32>
    %307 = vector.shape_cast %304 : vector<16x1024xf32> to vector<1x16x1024xf32>
    tpu.vector_store %arg15[%c0_135, %c0_136, %c0_137], %307 {strides = array<i32>} : memref<1x16x1024xf32, #tpu.memory_space<vmem>>, vector<1x16x1024xf32>,
    return
  }
  func.func @transform_0(%arg0: i32) -> (i32, i32, i32) {
    %c0_i32 = arith.constant 0 : i32
    %c0_i32_0 = arith.constant 0 : i32
    %c0_i32_1 = arith.constant 0 : i32
    return %arg0, %c0_i32, %c0_i32_0 : i32, i32, i32
  }
  func.func @transform_1(%arg0: i32) -> (i32, i32) {
    %c0_i32 = arith.constant 0 : i32
    %c0_i32_0 = arith.constant 0 : i32
    %c0_i32_1 = arith.constant 0 : i32
    return %c0_i32, %c0_i32_0 : i32, i32
  }
  func.func @transform_2(%arg0: i32) -> (i32, i32) {
    %c0_i32 = arith.constant 0 : i32
    %c0_i32_0 = arith.constant 0 : i32
    %c0_i32_1 = arith.constant 0 : i32
    return %c0_i32, %c0_i32_0 : i32, i32
  }
  func.func @transform_3(%arg0: i32) -> (i32, i32) {
    %c0_i32 = arith.constant 0 : i32
    %c0_i32_0 = arith.constant 0 : i32
    %c0_i32_1 = arith.constant 0 : i32
    return %c0_i32, %c0_i32_0 : i32, i32
  }
  func.func @transform_4(%arg0: i32) -> (i32, i32) {
    %c0_i32 = arith.constant 0 : i32
    %c0_i32_0 = arith.constant 0 : i32
    %c0_i32_1 = arith.constant 0 : i32
    return %c0_i32, %c0_i32_0 : i32, i32
  }
  func.func @transform_5(%arg0: i32) -> (i32, i32) {
    %c0_i32 = arith.constant 0 : i32
    %c0_i32_0 = arith.constant 0 : i32
    %c0_i32_1 = arith.constant 0 : i32
    return %c0_i32, %c0_i32_0 : i32, i32
  }
  func.func @transform_6(%arg0: i32) -> (i32, i32) {
    %c0_i32 = arith.constant 0 : i32
    %c0_i32_0 = arith.constant 0 : i32
    %c0_i32_1 = arith.constant 0 : i32
    return %c0_i32, %c0_i32_0 : i32, i32
  }
  func.func @transform_7(%arg0: i32) -> (i32, i32) {
    %c0_i32 = arith.constant 0 : i32
    %c0_i32_0 = arith.constant 0 : i32
    %c0_i32_1 = arith.constant 0 : i32
    return %c0_i32, %c0_i32_0 : i32, i32
  }
  func.func @transform_8(%arg0: i32) -> (i32, i32) {
    %c0_i32 = arith.constant 0 : i32
    %c0_i32_0 = arith.constant 0 : i32
    %c0_i32_1 = arith.constant 0 : i32
    return %c0_i32, %c0_i32_0 : i32, i32
  }
  func.func @transform_9(%arg0: i32) -> (i32, i32) {
    %c0_i32 = arith.constant 0 : i32
    %c0_i32_0 = arith.constant 0 : i32
    %c0_i32_1 = arith.constant 0 : i32
    return %c0_i32, %c0_i32_0 : i32, i32
  }
  func.func @transform_10(%arg0: i32) -> (i32, i32) {
    %c0_i32 = arith.constant 0 : i32
    %c0_i32_0 = arith.constant 0 : i32
    %c0_i32_1 = arith.constant 0 : i32
    return %c0_i32, %c0_i32_0 : i32, i32
  }
  func.func @transform_11(%arg0: i32) -> (i32, i32) {
    %c0_i32 = arith.constant 0 : i32
    %c0_i32_0 = arith.constant 0 : i32
    %c0_i32_1 = arith.constant 0 : i32
    return %c0_i32, %c0_i32_0 : i32, i32
  }
  func.func @transform_12(%arg0: i32) -> (i32, i32) {
    %c0_i32 = arith.constant 0 : i32
    %c0_i32_0 = arith.constant 0 : i32
    %c0_i32_1 = arith.constant 0 : i32
    return %c0_i32, %c0_i32_0 : i32, i32
  }
  func.func @transform_13(%arg0: i32) -> (i32, i32) {
    %c0_i32 = arith.constant 0 : i32
    %c0_i32_0 = arith.constant 0 : i32
    %c0_i32_1 = arith.constant 0 : i32
    return %c0_i32, %c0_i32_0 : i32, i32
  }
  func.func @transform_14(%arg0: i32) -> (i32, i32, i32) {
    %c0_i32 = arith.constant 0 : i32
    %c0_i32_0 = arith.constant 0 : i32
    %c0_i32_1 = arith.constant 0 : i32
    return %arg0, %c0_i32, %c0_i32_0 : i32, i32, i32
  }
}

</mosaic_0001>

<bundles_post_ra>
// kernel: tpu_custom_call.1
= control target key start
LH: loop header
LB: loop body
LE: loop exit
PB: predicated region body
PF: predicated region fallthrough
CT: control target
= control target key end

     0   :  { %s10258_s0 = inlined_call_operand.vmem [shape: f32[2,16,256], index: 0, kind: input, shape index: {}]   ;;  %s10259_s1 = inlined_call_operand.vmem [shape: bf16[32,144], index: 1, kind: input, shape index: {}]   ;;  %s10260_s2 = inlined_call_operand.vmem [shape: f32[32,1], index: 2, kind: input, shape index: {}]   ;;  %s10261_s3 = inlined_call_operand.vmem [shape: f32[32,1], index: 3, kind: input, shape index: {}]   ;;  %s10262_s4 = inlined_call_operand.vmem [shape: bf16[32,288], index: 4, kind: input, shape index: {}]   ;;  %s10263_s5 = inlined_call_operand.vmem [shape: f32[32,1], index: 5, kind: input, shape index: {}]   ;;  %s10264_s6 = inlined_call_operand.vmem [shape: f32[32,1], index: 6, kind: input, shape index: {}]   ;;  %s10265_s7 = inlined_call_operand.vmem [shape: bf16[32,288], index: 7, kind: input, shape index: {}]   ;;  %s10266_s8 = inlined_call_operand.vmem [shape: f32[32,1], index: 8, kind: input, shape index: {}]   ;;  %s10267_s9 = inlined_call_operand.vmem [shape: f32[32,1], index: 9, kind: input, shape index: {}]   ;;  %s10268_s10 = inlined_call_operand.vmem [shape: bf16[16,288], index: 10, kind: input, shape index: {}]   ;;  %s10269_s11 = inlined_call_operand.vmem [shape: f32[16,1], index: 11, kind: input, shape index: {}]   ;;  %s10270_s12 = inlined_call_operand.vmem [shape: f32[16,1], index: 12, kind: input, shape index: {}]   ;;  %s10271_s13 = inlined_call_operand.hbm [shape: bf16[256,1024], index: 13, kind: input, shape index: {}]   ;;  %s10272_s14 = inlined_call_operand.hbm [shape: f32[2,16,1024], index: 14, kind: output, shape index: {}]  }
   0x1   :  { %10448 = sst [smem:[#allocation86_spill]] %s10258_s0 }
   0x2   :  { %10449 = sst [smem:[#allocation87_spill]] %s10259_s1 }
   0x3   :  { %10450 = sst [smem:[#allocation88_spill]] %s10260_s2 }
   0x4   :  { %10451 = sst [smem:[#allocation89_spill]] %s10261_s3 }
   0x5   :  { %10452 = sst [smem:[#allocation90_spill]] %s10271_s13 }
   0x6   :  { %19 = vsyncpa [#allocation3], 0 }
   0x7   :  { %20 = vsyncpa [#allocation4], 0 }
   0x8   :  { %22 = vsyncpa [#allocation4 + $0x1], 0  ;;  %s6631_s29 = smov 0   ;;  %s6633_s30 = smov 0  }
   0x9   :  { %s6635_s15 = smov 0   ;;  %s6637_s16 = smov 0  }
   0xa LB: > { %10453 = sst [smem:[#allocation8_spill]] %s6521_s29  ;;  %s6652_s17 = sadd.s32 4294967295, %s6533_s16   ;;  %s6533_s16 = sphi %s6637_s16, %s11125_s16   ;;  %s6529_s15 = sphi %s6635_s15, %s11127_s15   ;;  %s6525_s30 = sphi %s6633_s30, %s11129_s30   ;;  %s6521_s29 = sphi %s6631_s29, %s11128_s29  }
   0xb   : > { %10454 = sst [smem:[#allocation9_spill]] %s6529_s15  ;;  %s4622_s18 = sadd.s32 4294967294, %s6533_s16  }
   0xc   : > { %s6656_s19 = sadd.s32 1, %s6533_s16   ;;  %s334_s20 = sadd.s32 1, %s6529_s15 }
   0xd   : > { %10455 = sst [smem:[#allocation10_spill]] %s6656_s19  ;;  %s331_s21 = ssub.s32 %s6533_s16, %s6656_s19 }
   0xe   : > { %p344_p0 = scmp.ne.s32.totalorder %s6529_s15, %s6525_s30  ;;  %p332_p1 = scmp.eq.s32.totalorder %s331_s21, 0 }
   0xf   : > { %p345_p2 = scmp.eq.s32.totalorder %s6652_s17, 1  ;;  %p350_p3 = scmp.ne.s32.totalorder %s6525_s30, %s6521_s29 }
  0x10   : > { %p351_p4 = scmp.eq.s32.totalorder %s4622_s18, 1  ;;  %p4623_p7 = scmp.ge.s32.totalorder %s6533_s16, 1 }
  0x11   : > { %s6667_s22 = scalar_select %p332_p1, %s6529_s15, %s334_s20  }
  0x12   : > { %p6669_p5 = por %p345_p2, %p344_p0  ;;  %p6673_p6 = por %p351_p4, %p350_p3 }
  0x13   : > { %10456 = sst [smem:[#allocation11_spill]] %s6667_s22  ;;  %p358_p8 = scmp.lt.s32.totalorder %s6533_s16, 3 }
  0x14   : > { %s10458_s24 = scalar_select %p6673_p6, 1, 0 }
  0x15   : > { %p5319_p9 = scmp.eq.s32.totalorder %s6652_s17, 0  ;;  %p6680_p10 = pnand %p4623_p7, %p358_p8 }
  0x16   : > { %10459 = sst [smem:[#allocation12_spill]] %s10458_s24  ;;  %s6535_s26 = smov [#allocation2]  }
  0x17   : > { %s406_s27 = sshll.u32 %s6535_s26, 4  ;;  %p5311_p11 = pneg %p6680_p10  ;;  %s407_s27 = int_to_ptr.vmem [resolvable:$true] %s406_s27 }
  0x18   : > { %s6454_s28 = scalar_lea.vmem %s407_s27, 16384  ;;  %p6462_p3 = scmp.lt.s32.totalorder %s407_s27, %s407_s27 }
  0x19   : > { %p5312_p12 = pnand %p5319_p9, %p5311_p11  ;;  %p6455_p0 = scmp.ne.s32.totalorder %s407_s27, %s6454_s28 }
  0x1a   : > { %p6463_p4 = scmp.lt.s32.totalorder %s6454_s28, %s6454_s28 }
  0x1b   : > { %p6445_p13 = pneg %p5312_p12 }
  0x1c   : > { %p6464_p6 = por %p6463_p4, %p6462_p3 }
  0x1d   : > { %p6457_p1 = pnand %p6455_p0, %p6445_p13 }
  0x1f   : > { %p6458_p2 = pneg %p6457_p1 }
  0x21   : > { %p6465_p7 = pnand %p6464_p6, %p6458_p2 }
  0x23   : > { %6468 = shalt.err (!%p6465_p7)
}
  0x24   : > { %s6536_s18 = smov 512   ;;  %s6537_s20 = smov 32  }
  0x25   : > { %s10461_s13 = sld [smem:[#allocation90_spill]] }
  0x27   : > { %430 = sbr.rel (%p6680_p10) target bundleno = 2068 (0x814), region = 76 }
  0x2b   : > { %5314 = dma.hbm_to_vmem [thread:$0]  (!%p5312_p12), %s10461_s13, 16384, %s407_s27, [#allocation3], %s6536_s18, %s6536_s18, %s6537_s20  }
  0x2c   : > { %6512 = dma.done.wait (%p5319_p9), [#allocation3], 16384  }
  0x2d   : > { %6514 = vsyncadd (%p5319_p9), [#allocation3], 4294950912  ;;  %p476_p8 = scmp.lt.s32.totalorder %s6652_s17, 1  ;;  %s10462_s0 = sld [smem:[#allocation86_spill]]  ;;  %vm10298_vm0 = vcmask 130048   ;;  %v10303_v11 = vmov 0   ;;  %v486_v18 = vlaneseq }
  0x2e   : > { %s10279_s22 = smov 113   ;;  %s10281_s25 = smov 112   ;;  %5455 = vset.pattern.permute.xlu1 %v10303_v11  ;;  %5454 = vset.pattern.permute.xlu0 %v10303_v11 }
  0x2f   : > { %s477_s26 = scalar_select %p476_p8, %s6652_s17, 1  ;;  %v6764_v19 = vand.u32 127, %v486_v18 }
  0x30   : > { %s10277_s15 = smov 127   ;;  %s10299_s19 = smov 1  }
  0x31   : > { %s5303_s28 = sshll.u32 %s477_s26, 5  ;;  %s10287_s27 = smov 16   ;;  %v6767_v20 = vadd.s32 128, %v6764_v19  ;;  %v489_v26 = vand.u32 15, %v6764_v19  ;;  %vm10292_vm1 = vcmp.lt.s32.totalorder %v6764_v19, 113  ;;  %vm10293_vm3 = vcmp.lt.s32.totalorder %v6764_v19, 112 }
  0x32   : > { %s10285_s18 = smov 17   ;;  %s10283_s20 = smov 111   ;;  %vm10291_vm5 = vcmp.lt.s32.totalorder %v6764_v19, 127  ;;  %vm10294_vm14 = vcmp.lt.s32.totalorder %v6764_v19, 1 }
  0x33   : > { %s480_s24 = scalar_lea.vmem %s10462_s0, %s5303_s28  ;;  %s10463_s1 = sld [smem:[#allocation87_spill]]  ;;  %v490_v23 = vand.u32 15, %v6767_v20  ;;  %vm612_vm2 = vcmp.lt.s32.totalorder %v6767_v20, 240  ;;  %vm6791_vm7 = vcmp.ge.s32.totalorder %v489_v26, 1  ;;  %vm6831_vm11 = vcmp.le.s32.totalorder %v489_v26, 14 }
  0x34   : > { %v6702_v0 = vld [vmem:[%s480_s24] sm:$0xff]  ;;  %v6704_v1 = vld [vmem:[%s480_s24 + $0x10] sm:$0xff]  ;;  %v6706_v2 = vld [vmem:[%s480_s24 + $0x8] sm:$0xff]  ;;  %s10464_s2 = sld [smem:[#allocation88_spill]]  ;;  %s10498_s28 = smov 16  }
  0x35   : > { %v5384_v3 = vpack.i.bf16 %v6704_v1, %v6702_v0  ;;  %v6710_v4 = vld [vmem:[%s480_s24 + $0x18] sm:$0xff]  ;;  %v577_v7 = vpack.c.bf16 %v6704_v1, %v6702_v0  ;;  %s10289_s24 = smov 15   ;;  %s10465_s3 = sld [smem:[#allocation89_spill]]  ;;  %vm6774_vm4 = vcmp.ge.s32.totalorder %v490_v23, 1  ;;  %vm6802_vm8 = vmpackc.low %vm612_vm2, %vm612_vm2  ;;  %vm6823_vm10 = vcmp.le.s32.totalorder %v490_v23, 14 }
  0x36   : > { %v5389_v5 = vpack.i.bf16 %v6710_v4, %v6706_v2  ;;  %v578_v6 = vpack.c.bf16 %v6710_v4, %v6706_v2  ;;  %vm6787_vm6 = vmand %vm612_vm2, %vm6774_vm4  ;;  %s10499_s21 = smov 17   ;;  %s10500_s26 = smov 112  }
  0x37   : > { %5385 = vrot.lane.b32.xlu1 %v5384_v3, %s10279_s22  ;;  %5375 = vrot.lane.b32.xlu0 %v5384_v3, %s10281_s25  ;;  %vm6817_vm9 = vmpackc.low %vm6787_vm6, %vm6787_vm6  ;;  %vm10297_vm6 = vcmp.lt.s32.totalorder %v6764_v19, 15  ;;  %s10556_s13 = smov 1   ;;  %s6553_s0 = smov [#allocation5]  }
  0x38   : > { %vm6844_vm12 = vmpackc.low %vm6791_vm7, %vm6791_vm7 }
  0x39   : > { %v6418_v8 = vld [vmem:[%s10463_s1 + $0x4] ss:$8 sps:$4 sm:$0xff]   ;;  %vm6851_vm13 = vmpackc.low %vm6823_vm10, %vm6823_vm10 }
  0x3a   : > { %4677 = vmatprep.mubr.msk.bf16.mxu0 %vm10298_vm0, %v6418_v8  ;;  %v746_v9 = vld [vmem:[%s10464_s2 + $0x18] sm:$0xff]  ;;  %v745_v10 = vld [vmem:[%s10464_s2 + $0x10] sm:$0xff]  ;;  %v743_v14 = vld [vmem:[%s10464_s2] sm:$0xff] }
  0x3b   : > { %5390 = vrot.lane.b32.xlu1 %v5389_v5, %s10279_s22  ;;  %5380 = vrot.lane.b32.xlu0 %v5389_v5, %s10281_s25  ;;  %v777_v12 = vld [vmem:[%s10465_s3 + $0x10] sm:$0xff]  ;;  %v778_v13 = vld [vmem:[%s10465_s3 + $0x18] sm:$0xff]  ;;  %vm6863_vm15 = vmpackc.low %vm6831_vm11, %vm6831_vm11  ;;  %s10497_s25 = smov 15  }
  0x3c   : > { %v744_v15 = vld [vmem:[%s10464_s2 + $0x8] sm:$0xff]  ;;  %v775_v16 = vld [vmem:[%s10465_s3] sm:$0xff]  ;;  %s6547_s2 = smov 33  }
  0x3d   : > { %v776_v17 = vld [vmem:[%s10465_s3 + $0x8] sm:$0xff]  ;;  %s6548_s3 = smov 96  }
  0x3f   : > { %5400 = vrot.lane.b32.xlu1 %v5389_v5, %s10277_s15  ;;  %5395 = vrot.lane.b32.xlu0 %v5384_v3, %s10277_s15 }
  0x43   : > { %5410 = vrot.lane.b32.xlu1 %v5389_v5, %s10299_s19  ;;  %5405 = vrot.lane.b32.xlu0 %v5384_v3, %s10299_s19 }
  0x47   : > { %5420 = vrot.lane.b32.xlu1 %v5389_v5, %s10289_s24  ;;  %5415 = vrot.lane.b32.xlu0 %v5384_v3, %s10289_s24  ;;  %s10501_s24 = smov 113  }
  0x4b   : > { %5430 = vrot.lane.b32.xlu1 %v5389_v5, %s10287_s27  ;;  %5425 = vrot.lane.b32.xlu0 %v5384_v3, %s10287_s27  ;;  %s10502_s27 = smov 127  }
  0x4f   : > { %5440 = vrot.lane.b32.xlu1 %v5389_v5, %s10285_s18  ;;  %5435 = vrot.lane.b32.xlu0 %v5384_v3, %s10285_s18  ;;  %s10503_s18 = smov 111  }
  0x53   : > { %5450 = vrot.lane.b32.xlu1 %v5389_v5, %s10283_s20  ;;  %5445 = vrot.lane.b32.xlu0 %v5384_v3, %s10283_s20 }
  0x57   : > { %764 = vperm.xlu1 %5455, %v746_v9   ;;  %759 = vperm.xlu0 %5454, %v745_v10  }
  0x5b   : > { %791 = vperm.xlu1 %5455, %v777_v12   ;;  %796 = vperm.xlu0 %5454, %v778_v13  }
  0x5f   : > { %749 = vperm.xlu1 %5455, %v743_v14   ;;  %754 = vperm.xlu0 %5454, %v744_v15  }
  0x63   : > { %781 = vperm.xlu1 %5455, %v775_v16   ;;  %786 = vperm.xlu0 %5454, %v776_v17  }
  0xa9   : > { %v5386_v21 = vpop.permute.xlu1 %5385  ;;  %v5376_v22 = vpop.permute.xlu0 %5375 }
  0xaa   : > { %v5388_v24 = vunpack.i.h.bf16 %v5386_v21  ;;  %v5387_v25 = vunpack.i.l.bf16 %v5386_v21  ;;  %v5378_v34 = vunpack.i.h.bf16 %v5376_v22  ;;  %v5377_v35 = vunpack.i.l.bf16 %v5376_v22 }
  0xad   : > { %v5391_v27 = vpop.permute.xlu1 %5390  ;;  %v5381_v28 = vpop.permute.xlu0 %5380 }
  0xae   : > { %v5393_v30 = vunpack.i.h.bf16 %v5391_v27  ;;  %v5392_v31 = vunpack.i.l.bf16 %v5391_v27  ;;  %v5383_v32 = vunpack.i.h.bf16 %v5381_v28  ;;  %v5382_v33 = vunpack.i.l.bf16 %v5381_v28 }
  0xb0   : > { %v609_v36 = vsel %vm10292_vm1, %v5392_v31, %v5387_v25  ;;  %v610_v37 = vsel %vm10292_vm1, %v5393_v30, %v5388_v24  ;;  %v632_v40 = vsel %vm10293_vm3, %v5382_v33, %v5377_v35  ;;  %v633_v41 = vsel %vm10293_vm3, %v5383_v32, %v5378_v34 }
  0xb1   : > { %v630_v43 = vsel %vm10293_vm3, %v5377_v35, %v5382_v33  ;;  %v631_v44 = vsel %vm10293_vm3, %v5378_v34, %v5383_v32  ;;  %v5401_v45 = vpop.permute.xlu1 %5400  ;;  %v5396_v46 = vpop.permute.xlu0 %5395  ;;  %v4636_v47 = vpack.c.bf16 %v633_v41, %v632_v40  ;;  %v607_v51 = vsel %vm10292_vm1, %v5387_v25, %v5392_v31 }
  0xb2   : > { %v638_v48 = vpack.c.bf16 %v631_v44, %v630_v43  ;;  %v5403_v49 = vunpack.i.h.bf16 %v5401_v45  ;;  %v5402_v50 = vunpack.i.l.bf16 %v5401_v45  ;;  %v608_v52 = vsel %vm10292_vm1, %v5388_v24, %v5393_v30 }
  0xb3   : > { %v5398_v53 = vunpack.i.h.bf16 %v5396_v46  ;;  %v5397_v54 = vunpack.i.l.bf16 %v5396_v46  ;;  %4637 = vmatprep.subr.msk.bf16.mxu0 %vm6802_vm8, %v4636_v47  ;;  %v4639_v57 = vpack.c.bf16 %v610_v37, %v609_v36  ;;  %v4642_v8 = vpack.c.bf16 %v608_v52, %v607_v51 }
  0xb4   : > { %691 = vmatpush1.bf16.msra.mxu0 %v638_v48  ;;  %vm10295_vm1 = vcmp.lt.s32.totalorder %v6764_v19, 16  ;;  %vm504_vm3 = vcmp.ge.s32.totalorder %v6764_v19, 16 }
  0xb5   : > { %v591_v58 = vsel %vm10291_vm5, %v5403_v49, %v5398_v53  ;;  %v590_v59 = vsel %vm10291_vm5, %v5402_v50, %v5397_v54  ;;  %v5411_v61 = vpop.permute.xlu1 %5410  ;;  %v5406_v62 = vpop.permute.xlu0 %5405  ;;  %v589_v63 = vsel %vm10291_vm5, %v5398_v53, %v5403_v49  ;;  %v588_v3 = vsel %vm10291_vm5, %v5397_v54, %v5402_v50  ;;  %4640 = vmatprep.subr.msk.bf16.mxu0 %vm6817_vm9, %v4639_v57  ;;  %vm6888_vm5 = vmpackc.low %vm6774_vm4, %vm6774_vm4 }
  0xb6   : > { %v4645_v9 = vpack.c.bf16 %v591_v58, %v590_v59  ;;  %v5413_v12 = vunpack.i.h.bf16 %v5411_v61  ;;  %v5412_v13 = vunpack.i.l.bf16 %v5411_v61  ;;  %v5408_v14 = vunpack.i.h.bf16 %v5406_v62  ;;  %vm550_vm4 = vmand %vm504_vm3, %vm6831_vm11 }
  0xb7   : > { %v5407_v15 = vunpack.i.l.bf16 %v5406_v62  ;;  %v4648_v16 = vpack.c.bf16 %v589_v63, %v588_v3  ;;  %vm6920_vm11 = vmpackc.low %vm550_vm4, %vm550_vm4 }
  0xb8   : > { %4643 = vmatpush1.bf16.msk.msra.mxu0 %vm6844_vm12, %v4642_v8  ;;  %v568_v26 = vsel %vm10294_vm14, %v5408_v14, %v5413_v12  ;;  %v570_v28 = vsel %vm10294_vm14, %v5413_v12, %v5408_v14  ;;  %vm6938_vm4 = vmpackc.low %vm504_vm3, %vm504_vm3 }
  0xb9   : > { %v5421_v17 = vpop.permute.xlu1 %5420  ;;  %v5416_v18 = vpop.permute.xlu0 %5415  ;;  %4646 = vmatprep.subr.msk.bf16.mxu0 %vm6851_vm13, %v4645_v9  ;;  %v567_v27 = vsel %vm10294_vm14, %v5407_v15, %v5412_v13  ;;  %v569_v32 = vsel %vm10294_vm14, %v5412_v13, %v5407_v15  ;;  %vm10296_vm14 = vcmp.lt.s32.totalorder %v6764_v19, 17 }
  0xba   : > { %v5423_v22 = vunpack.i.h.bf16 %v5421_v17  ;;  %v5422_v23 = vunpack.i.l.bf16 %v5421_v17  ;;  %v5418_v24 = vunpack.i.h.bf16 %v5416_v18  ;;  %v5417_v25 = vunpack.i.l.bf16 %v5416_v18  ;;  %v6434_v18 = vld [vmem:[%s10265_s7 + $0x1c] ss:$12 sps:$4 sm:$0xff]  }
  0xbb   : > { %v4651_v35 = vpack.c.bf16 %v568_v26, %v567_v27 }
  0xbc   : > { %4649 = vmatpush1.bf16.msk.msra.mxu0 %vm6863_vm15, %v4648_v16  ;;  %v545_v33 = vsel %vm10297_vm6, %v5418_v24, %v5423_v22  ;;  %v544_v34 = vsel %vm10297_vm6, %v5417_v25, %v5422_v23  ;;  %v547_v2 = vsel %vm10297_vm6, %v5423_v22, %v5418_v24  ;;  %v546_v4 = vsel %vm10297_vm6, %v5422_v23, %v5417_v25  ;;  %vm654_vm6 = vmand %vm612_vm2, %vm6823_vm10  ;;  %v6416_v23 = vld [vmem:[%s10463_s1] ss:$8 sps:$4 sm:$0xff]   ;;  %v6419_v24 = vld [vmem:[%s10463_s1 + $0x14] ss:$8 sps:$4 sm:$0xff]  }
  0xbd   : > { %v5431_v30 = vpop.permute.xlu1 %5430  ;;  %v5426_v31 = vpop.permute.xlu0 %5425  ;;  %696 = vmatprep.subr.bf16.mxu0 %v578_v6  ;;  %v4654_v6 = vpack.c.bf16 %v570_v28, %v569_v32  ;;  %v4657_v29 = vpack.c.bf16 %v545_v33, %v544_v34  ;;  %v4660_v49 = vpack.c.bf16 %v547_v2, %v546_v4  ;;  %vm10496_vm2 = vcmask 130048   ;;  %v6421_v25 = vld [vmem:[%s10463_s1 + $0x10] ss:$8 sps:$4 sm:$0xff]   ;;  %s6473_s1 = sshll.u32 %s6553_s0, 4  ;;  %s6474_s1 = int_to_ptr.vmem [resolvable:$false] %s6473_s1 }
  0xbe   : > { %v5433_v37 = vunpack.i.h.bf16 %v5431_v30  ;;  %v5432_v38 = vunpack.i.l.bf16 %v5431_v30  ;;  %v5428_v40 = vunpack.i.h.bf16 %v5426_v31  ;;  %v5427_v41 = vunpack.i.l.bf16 %v5426_v31 }
  0xc0   : > { %697 = vmatpush1.bf16.msra.mxu0 %v577_v7  ;;  %v525_v0 = vsel %vm10295_vm1, %v5427_v41, %v5432_v38  ;;  %v526_v1 = vsel %vm10295_vm1, %v5428_v40, %v5433_v37  ;;  %v528_v7 = vsel %vm10295_vm1, %v5433_v37, %v5428_v40  ;;  %v527_v52 = vsel %vm10295_vm1, %v5432_v38, %v5427_v41 }
  0xc1   : > { %v5441_v43 = vpop.permute.xlu1 %5440  ;;  %v5436_v44 = vpop.permute.xlu0 %5435  ;;  %4652 = vmatprep.subr.msk.bf16.mxu0 %vm6888_vm5, %v4651_v35  ;;  %v534_v58 = vpack.c.bf16 %v526_v1, %v525_v0  ;;  %vm648_vm1 = vcmp.lt.s32.totalorder %v6764_v19, 111  ;;  %v4663_v63 = vpack.c.bf16 %v528_v7, %v527_v52 }
  0xc2   : > { %v5443_v45 = vunpack.i.h.bf16 %v5441_v43  ;;  %v5442_v46 = vunpack.i.l.bf16 %v5441_v43  ;;  %v5438_v47 = vunpack.i.h.bf16 %v5436_v44  ;;  %v5437_v48 = vunpack.i.l.bf16 %v5436_v44 }
  0xc4   : > { %4655 = vmatpush1.bf16.msk.msra.mxu0 %vm6844_vm12, %v4654_v6  ;;  %v501_v54 = vsel %vm10296_vm14, %v5438_v47, %v5443_v45  ;;  %v500_v57 = vsel %vm10296_vm14, %v5437_v48, %v5442_v46  ;;  %v503_v3 = vsel %vm10296_vm14, %v5443_v45, %v5438_v47  ;;  %v502_v8 = vsel %vm10296_vm14, %v5442_v46, %v5437_v48  ;;  %vm508_vm14 = vmand %vm504_vm3, %vm6791_vm7 }
  0xc5   : > { %v5451_v50 = vpop.permute.xlu1 %5450  ;;  %v5446_v51 = vpop.permute.xlu0 %5445  ;;  %4658 = vmatprep.subr.msk.bf16.mxu0 %vm6851_vm13, %v4657_v29  ;;  %v4666_v12 = vpack.c.bf16 %v501_v54, %v500_v57  ;;  %v4669_v15 = vpack.c.bf16 %v503_v3, %v502_v8  ;;  %vm6962_vm0 = vmpackc.low %vm508_vm14, %vm508_vm14  ;;  %vm10504_vm7 = vcmp.lt.s32.totalorder %v6764_v19, 1 }
  0xc6   : > { %v5453_v59 = vunpack.i.h.bf16 %v5451_v50  ;;  %v5452_v60 = vunpack.i.l.bf16 %v5451_v50  ;;  %v5448_v61 = vunpack.i.h.bf16 %v5446_v51  ;;  %v5447_v62 = vunpack.i.l.bf16 %v5446_v51  ;;  %vm6966_vm3 = vmpackc.low %vm654_vm6, %vm654_vm6 }
  0xc7   : > { %vm10505_vm10 = vmmov %vm10504_vm7 }
  0xc8   : > { %4661 = vmatpush1.bf16.msk.msra.mxu0 %vm6920_vm11, %v4660_v49  ;;  %v652_v13 = vsel %vm648_vm1, %v5453_v59, %v5448_v61  ;;  %v651_v14 = vsel %vm648_vm1, %v5452_v60, %v5447_v62  ;;  %v650_v16 = vsel %vm648_vm1, %v5448_v61, %v5453_v59  ;;  %v649_v17 = vsel %vm648_vm1, %v5447_v62, %v5452_v60  ;;  %vm10506_vm14 = vmmov %vm10504_vm7 }
  0xc9   : > { %702 = vmatprep.subr.bf16.mxu0 %v534_v58  ;;  %v4672_v56 = vpack.c.bf16 %v652_v13, %v651_v14  ;;  %v4675_v22 = vpack.c.bf16 %v650_v16, %v649_v17  ;;  %vm10507_vm6 = vmmov %vm10504_vm7 }
  0xcc   : > { %4664 = vmatpush1.bf16.msk.msra.mxu0 %vm6938_vm4, %v4663_v63 }
  0xcd   : > { %4667 = vmatprep.subr.msk.bf16.mxu0 %vm6888_vm5, %v4666_v12 }
  0xd0   : > { %4670 = vmatpush1.bf16.msk.msra.mxu0 %vm6962_vm0, %v4669_v15 }
  0xd1   : > { %4673 = vmatprep.subr.msk.bf16.mxu0 %vm6966_vm3, %v4672_v56 }
  0xd2   : > { %v760_v26 = vpop.permute.xlu0 %759  ;;  %v765_v27 = vpop.permute.xlu1 %764 }
  0xd4   : > { %4676 = vmatpush2.bf16.msk.msra.mxu0 %vm6863_vm15, %v4675_v22 }
  0xd6   : > { %v797_v28 = vpop.permute.xlu0 %796  ;;  %v792_v30 = vpop.permute.xlu1 %791 }
  0xd7   : > { %723 = vmatmul.mubr.bf16.vlgmr.msra.gmra.mxu0 %v6416_v23  ;;  %v6424_v23 = vld [vmem:[%s10262_s4 + $0x4] ss:$12 sps:$4 sm:$0xff]  }
  0xd8   : > { %4678 = vmatprep.mubr.msk.bf16.mxu0 %vm10496_vm2, %v6419_v24  ;;  %1184 = vmatprep.mubr.bf16.mxu1 %v6424_v23  ;;  %v1260_v24 = vld [vmem:[%s10263_s5 + $0x10] sm:$0xff]  ;;  %vm10508_vm2 = vmmov %vm10507_vm6 }
  0xda   : > { %v755_v32 = vpop.permute.xlu0 %754  ;;  %v750_v34 = vpop.permute.xlu1 %749 }
  0xde   : > { %v787_v41 = vpop.permute.xlu0 %786  ;;  %v782_v29 = vpop.permute.xlu1 %781 }
  0xdf   : > { %733 = vmatmul.mubr.bf16.gmra.mxu0 %v6421_v25  ;;  %v1261_v25 = vld [vmem:[%s10263_s5 + $0x18] sm:$0xff] }
 0x197   : > { %v724_v31 = vpop.f32.mrf.mxu0 }
 0x198   : > { %v767_v4 = vmul.f32 %v750_v34, %v724_v31  ;;  %v1290_v31 = vld [vmem:[%s10264_s6] sm:$0xff] }
 0x199   : > { %v726_v33 = vpop.f32.mrf.mxu0 }
 0x19a   : > { %v768_v40 = vmul.f32 %v750_v34, %v726_v33  ;;  %v799_v0 = vadd.f32 %v782_v29, %v767_v4 }
 0x19b   : > { %v728_v35 = vpop.f32.mrf.mxu0 }
 0x19c   : > { %v769_v37 = vmul.f32 %v755_v32, %v728_v35  ;;  %v800_v47 = vadd.f32 %v782_v29, %v768_v40  ;;  %v807_v60 = vmax.f32 %v799_v0, 0.0 }
 0x19d   : > { %v730_v38 = vpop.f32.mrf.mxu0 }
 0x19e   : > { %v770_v2 = vmul.f32 %v755_v32, %v730_v38  ;;  %v801_v45 = vadd.f32 %v787_v41, %v769_v37  ;;  %v808_v54 = vmax.f32 %v800_v47, 0.0  ;;  %v1291_v32 = vld [vmem:[%s10264_s6 + $0x8] sm:$0xff] }
 0x19f   : > { %v734_v6 = vpop.f32.mrf.mxu0 }
 0x1a0   : > { %v802_v43 = vadd.f32 %v787_v41, %v770_v2  ;;  %v771_v44 = vmul.f32 %v760_v26, %v734_v6  ;;  %v809_v51 = vmax.f32 %v801_v45, 0.0 }
 0x1a1   : > { %v736_v46 = vpop.f32.mrf.mxu0 }
 0x1a2   : > { %v772_v48 = vmul.f32 %v760_v26, %v736_v46  ;;  %v810_v7 = vmax.f32 %v802_v43, 0.0  ;;  %v803_v49 = vadd.f32 %v792_v30, %v771_v44  ;;  %v6988_v8 = vpack.c.bf16 %v809_v51, %v807_v60  ;;  %v1292_v26 = vld [vmem:[%s10264_s6 + $0x10] sm:$0xff] }
 0x1a3   : > { %v738_v1 = vpop.f32.mrf.mxu0  ;;  %v5461_v16 = vpack.i.bf16 %v809_v51, %v807_v60 }
 0x1a4   : > { %v773_v50 = vmul.f32 %v765_v27, %v738_v1  ;;  %v804_v57 = vadd.f32 %v792_v30, %v772_v48  ;;  %v811_v61 = vmax.f32 %v803_v49, 0.0  ;;  %v6986_v3 = vpack.c.bf16 %v810_v7, %v808_v54  ;;  %v1259_v30 = vld [vmem:[%s10263_s5 + $0x8] sm:$0xff] }
 0x1a5   : > { %v740_v52 = vpop.f32.mrf.mxu0  ;;  %v5471_v22 = vpack.i.bf16 %v810_v7, %v808_v54 }
 0x1a6   : > { %v805_v58 = vadd.f32 %v797_v28, %v773_v50  ;;  %v774_v59 = vmul.f32 %v765_v27, %v740_v52  ;;  %v812_v12 = vmax.f32 %v804_v57, 0.0  ;;  %v1293_v27 = vld [vmem:[%s10264_s6 + $0x18] sm:$0xff] }
 0x1a8   : > { %v813_v62 = vmax.f32 %v805_v58, 0.0  ;;  %v806_v63 = vadd.f32 %v797_v28, %v774_v59  ;;  %v1258_v28 = vld [vmem:[%s10263_s5] sm:$0xff] }
 0x1aa   : > { %v814_v13 = vmax.f32 %v806_v63, 0.0  ;;  %v5456_v14 = vpack.i.bf16 %v813_v62, %v811_v61  ;;  %v6994_v56 = vpack.c.bf16 %v813_v62, %v811_v61 }
 0x1ac   : > { %5457 = vrot.lane.b32.xlu1 %v5456_v14, %s10299_s19  ;;  %v5466_v15 = vpack.i.bf16 %v814_v13, %v812_v12  ;;  %v6992_v17 = vpack.c.bf16 %v814_v13, %v812_v12 }
 0x1ae   : > { %5467 = vrot.lane.b32.xlu0 %v5466_v15, %s10299_s19 }
 0x1b0   : > { %5462 = vrot.lane.b32.xlu1 %v5461_v16, %s10299_s19 }
 0x1b2   : > { %5472 = vrot.lane.b32.xlu0 %v5471_v22, %s10299_s19 }
 0x1b4   : > { %5477 = vrot.lane.b32.xlu1 %v5456_v14, %s10497_s25 }
 0x1b6   : > { %5487 = vrot.lane.b32.xlu0 %v5466_v15, %s10497_s25 }
 0x1b8   : > { %5482 = vrot.lane.b32.xlu1 %v5461_v16, %s10497_s25 }
 0x1ba   : > { %5492 = vrot.lane.b32.xlu0 %v5471_v22, %s10497_s25 }
 0x1bc   : > { %5497 = vrot.lane.b32.xlu1 %v5456_v14, %s10498_s28 }
 0x1be   : > { %5507 = vrot.lane.b32.xlu0 %v5466_v15, %s10498_s28 }
 0x1c0   : > { %5502 = vrot.lane.b32.xlu1 %v5461_v16, %s10498_s28 }
 0x1c2   : > { %5512 = vrot.lane.b32.xlu0 %v5471_v22, %s10498_s28 }
 0x1c4   : > { %5517 = vrot.lane.b32.xlu1 %v5456_v14, %s10499_s21 }
 0x1c6   : > { %5527 = vrot.lane.b32.xlu0 %v5466_v15, %s10499_s21 }
 0x1c8   : > { %5522 = vrot.lane.b32.xlu1 %v5461_v16, %s10499_s21 }
 0x1ca   : > { %5532 = vrot.lane.b32.xlu0 %v5471_v22, %s10499_s21 }
 0x1cc   : > { %5537 = vrot.lane.b32.xlu1 %v5456_v14, %s10500_s26 }
 0x1ce   : > { %5547 = vrot.lane.b32.xlu0 %v5466_v15, %s10500_s26 }
 0x1d0   : > { %5542 = vrot.lane.b32.xlu1 %v5461_v16, %s10500_s26 }
 0x1d2   : > { %5552 = vrot.lane.b32.xlu0 %v5471_v22, %s10500_s26 }
 0x1d4   : > { %5557 = vrot.lane.b32.xlu1 %v5456_v14, %s10501_s24 }
 0x1d6   : > { %5567 = vrot.lane.b32.xlu0 %v5466_v15, %s10501_s24 }
 0x1d8   : > { %5562 = vrot.lane.b32.xlu1 %v5461_v16, %s10501_s24 }
 0x1da   : > { %5572 = vrot.lane.b32.xlu0 %v5471_v22, %s10501_s24 }
 0x1dc   : > { %5577 = vrot.lane.b32.xlu1 %v5456_v14, %s10502_s27 }
 0x1de   : > { %5587 = vrot.lane.b32.xlu0 %v5466_v15, %s10502_s27 }
 0x1e0   : > { %5582 = vrot.lane.b32.xlu1 %v5461_v16, %s10502_s27 }
 0x1e2   : > { %5592 = vrot.lane.b32.xlu0 %v5471_v22, %s10502_s27 }
 0x1e4   : > { %5597 = vrot.lane.b32.xlu1 %v5456_v14, %s10503_s18 }
 0x1e6   : > { %5607 = vrot.lane.b32.xlu0 %v5466_v15, %s10503_s18 }
 0x1e8   : > { %5602 = vrot.lane.b32.xlu1 %v5461_v16, %s10503_s18 }
 0x1ea   : > { %5612 = vrot.lane.b32.xlu0 %v5471_v22, %s10503_s18 }
 0x1ec   : > { %1274 = vperm.xlu1 %5455, %v1260_v24  }
 0x1ee   : > { %1279 = vperm.xlu0 %5454, %v1261_v25  }
 0x1f0   : > { %1306 = vperm.xlu1 %5455, %v1292_v26  }
 0x1f2   : > { %1311 = vperm.xlu0 %5454, %v1293_v27  }
 0x1f4   : > { %1264 = vperm.xlu1 %5455, %v1258_v28  }
 0x1f6   : > { %1269 = vperm.xlu0 %5454, %v1259_v30  }
 0x1f8   : > { %1296 = vperm.xlu1 %5455, %v1290_v31  }
 0x1fa   : > { %1301 = vperm.xlu0 %5454, %v1291_v32  }
 0x21e   : > { %v5458_v33 = vpop.permute.xlu1 %5457 }
 0x21f   : > { %v5460_v35 = vunpack.i.h.bf16 %v5458_v33  ;;  %v5459_v37 = vunpack.i.l.bf16 %v5458_v33 }
 0x220   : > { %v5468_v34 = vpop.permute.xlu0 %5467 }
 0x221   : > { %v5470_v38 = vunpack.i.h.bf16 %v5468_v34  ;;  %v5469_v40 = vunpack.i.l.bf16 %v5468_v34 }
 0x222   : > { %v5463_v41 = vpop.permute.xlu1 %5462 }
 0x223   : > { %v941_v2 = vsel %vm10504_vm7, %v5459_v37, %v5469_v40  ;;  %v942_v4 = vsel %vm10505_vm10, %v5460_v35, %v5470_v38  ;;  %v5465_v6 = vunpack.i.h.bf16 %v5463_v41  ;;  %v945_v44 = vsel %vm10506_vm14, %v5469_v40, %v5459_v37  ;;  %vm10509_vm7 = vmmov %vm10508_vm2 }
 0x224   : > { %v5473_v29 = vpop.permute.xlu0 %5472  ;;  %v4686_v43 = vpack.c.bf16 %v942_v4, %v941_v2  ;;  %v946_v45 = vsel %vm10507_vm6, %v5470_v38, %v5460_v35  ;;  %v5464_v46 = vunpack.i.l.bf16 %v5463_v41  ;;  %vm10510_vm10 = vmmov %vm10508_vm2  ;;  %vm10512_vm6 = vcmp.lt.s32.totalorder %v6764_v19, 15 }
 0x225   : > { %v5475_v47 = vunpack.i.h.bf16 %v5473_v29  ;;  %v5474_v48 = vunpack.i.l.bf16 %v5473_v29  ;;  %v4689_v0 = vpack.c.bf16 %v946_v45, %v945_v44  ;;  %vm10511_vm14 = vmmov %vm10508_vm2 }
 0x226   : > { %v5478_v1 = vpop.permute.xlu1 %5477  ;;  %4687 = vmatprep.subr.msk.bf16.mxu1 %vm6888_vm5, %v4686_v43 }
 0x227   : > { %v940_v7 = vsel %vm10508_vm2, %v5465_v6, %v5475_v47  ;;  %v944_v49 = vsel %vm10509_vm7, %v5475_v47, %v5465_v6  ;;  %v939_v50 = vsel %vm10510_vm10, %v5464_v46, %v5474_v48  ;;  %v943_v51 = vsel %vm10511_vm14, %v5474_v48, %v5464_v46  ;;  %4690 = vmatpush1.bf16.msk.msra.mxu1 %vm6844_vm12, %v4689_v0  ;;  %vm10513_vm2 = vmmov %vm10512_vm6 }
 0x228   : > { %v5488_v52 = vpop.permute.xlu0 %5487  ;;  %v4692_v54 = vpack.c.bf16 %v940_v7, %v939_v50  ;;  %v4695_v57 = vpack.c.bf16 %v944_v49, %v943_v51  ;;  %v5480_v58 = vunpack.i.h.bf16 %v5478_v1  ;;  %v5479_v59 = vunpack.i.l.bf16 %v5478_v1  ;;  %vm10514_vm7 = vmmov %vm10513_vm2 }
 0x229   : > { %v5490_v60 = vunpack.i.h.bf16 %v5488_v52  ;;  %v5489_v61 = vunpack.i.l.bf16 %v5488_v52  ;;  %vm10515_vm10 = vmmov %vm10513_vm2 }
 0x22a   : > { %v5483_v62 = vpop.permute.xlu1 %5482  ;;  %4693 = vmatprep.subr.msk.bf16.mxu1 %vm6888_vm5, %v4692_v54  ;;  %vm10516_vm14 = vmmov %vm10513_vm2 }
 0x22b   : > { %v906_v63 = vsel %vm10512_vm6, %v5480_v58, %v5490_v60  ;;  %v910_v12 = vsel %vm10513_vm2, %v5490_v60, %v5480_v58  ;;  %v905_v13 = vsel %vm10514_vm7, %v5479_v59, %v5489_v61  ;;  %v909_v14 = vsel %vm10515_vm10, %v5489_v61, %v5479_v59  ;;  %4696 = vmatpush1.bf16.msk.msra.mxu1 %vm6844_vm12, %v4695_v57  ;;  %vm10517_vm6 = vmmov %vm10513_vm2 }
 0x22c   : > { %v5493_v15 = vpop.permute.xlu0 %5492  ;;  %v4698_v16 = vpack.c.bf16 %v906_v63, %v905_v13  ;;  %v4701_v22 = vpack.c.bf16 %v910_v12, %v909_v14  ;;  %v5485_v23 = vunpack.i.h.bf16 %v5483_v62  ;;  %v5484_v24 = vunpack.i.l.bf16 %v5483_v62  ;;  %vm10518_vm7 = vmmov %vm10513_vm2 }
 0x22d   : > { %v5495_v25 = vunpack.i.h.bf16 %v5493_v15  ;;  %v5494_v26 = vunpack.i.l.bf16 %v5493_v15  ;;  %vm10519_vm10 = vcmp.lt.s32.totalorder %v6764_v19, 16 }
 0x22e   : > { %v5498_v27 = vpop.permute.xlu1 %5497  ;;  %4699 = vmatprep.subr.msk.bf16.mxu1 %vm6851_vm13, %v4698_v16 }
 0x22f   : > { %v904_v28 = vsel %vm10516_vm14, %v5485_v23, %v5495_v25  ;;  %v908_v30 = vsel %vm10517_vm6, %v5495_v25, %v5485_v23  ;;  %v903_v31 = vsel %vm10513_vm2, %v5484_v24, %v5494_v26  ;;  %v907_v32 = vsel %vm10518_vm7, %v5494_v26, %v5484_v24  ;;  %4702 = vmatpush1.bf16.msk.msra.mxu1 %vm6920_vm11, %v4701_v22  ;;  %vm10520_vm14 = vmmov %vm10519_vm10 }
 0x230   : > { %v5508_v33 = vpop.permute.xlu0 %5507  ;;  %v4704_v34 = vpack.c.bf16 %v904_v28, %v903_v31  ;;  %v4707_v35 = vpack.c.bf16 %v908_v30, %v907_v32  ;;  %v5500_v37 = vunpack.i.h.bf16 %v5498_v27  ;;  %v5499_v38 = vunpack.i.l.bf16 %v5498_v27  ;;  %vm10521_vm6 = vmmov %vm10519_vm10 }
 0x231   : > { %v5510_v40 = vunpack.i.h.bf16 %v5508_v33  ;;  %v5509_v41 = vunpack.i.l.bf16 %v5508_v33  ;;  %vm10522_vm2 = vmmov %vm10521_vm6 }
 0x232   : > { %v5503_v2 = vpop.permute.xlu1 %5502  ;;  %4705 = vmatprep.subr.msk.bf16.mxu1 %vm6851_vm13, %v4704_v34  ;;  %vm10523_vm7 = vmmov %vm10522_vm2 }
 0x233   : > { %v874_v4 = vsel %vm10519_vm10, %v5510_v40, %v5500_v37  ;;  %v873_v6 = vsel %vm10520_vm14, %v5509_v41, %v5499_v38  ;;  %4708 = vmatpush1.bf16.msk.msra.mxu1 %vm6920_vm11, %v4707_v35  ;;  %v5505_v29 = vunpack.i.h.bf16 %v5503_v2  ;;  %v869_v44 = vsel %vm10521_vm6, %v5499_v38, %v5509_v41  ;;  %vm10524_vm10 = vmmov %vm10522_vm2 }
 0x234   : > { %v5513_v43 = vpop.permute.xlu0 %5512  ;;  %v870_v45 = vsel %vm10522_vm2, %v5500_v37, %v5510_v40  ;;  %v4710_v46 = vpack.c.bf16 %v874_v4, %v873_v6  ;;  %v5504_v47 = vunpack.i.l.bf16 %v5503_v2  ;;  %vm10525_vm14 = vmmov %vm10522_vm2 }
 0x235   : > { %v5515_v48 = vunpack.i.h.bf16 %v5513_v43  ;;  %v5514_v0 = vunpack.i.l.bf16 %v5513_v43  ;;  %v886_v1 = vpack.c.bf16 %v870_v45, %v869_v44  ;;  %vm10526_vm6 = vmmov %vm10522_vm2  ;;  %vm10527_vm2 = vcmp.lt.s32.totalorder %v6764_v19, 17 }
 0x236   : > { %v5518_v7 = vpop.permute.xlu1 %5517 }
 0x237   : > { %v872_v49 = vsel %vm10523_vm7, %v5515_v48, %v5505_v29  ;;  %v871_v50 = vsel %vm10524_vm10, %v5514_v0, %v5504_v47  ;;  %1160 = vmatprep.subr.bf16.mxu1 %v886_v1  ;;  %v5520_v51 = vunpack.i.h.bf16 %v5518_v7  ;;  %v867_v54 = vsel %vm10525_vm14, %v5504_v47, %v5514_v0  ;;  %vm10528_vm7 = vmmov %vm10527_vm2 }
 0x238   : > { %4711 = vmatpush1.bf16.msk.msra.mxu1 %vm6938_vm4, %v4710_v46  ;;  %v5528_v52 = vpop.permute.xlu0 %5527  ;;  %v868_v57 = vsel %vm10526_vm6, %v5505_v29, %v5515_v48  ;;  %v4713_v58 = vpack.c.bf16 %v872_v49, %v871_v50  ;;  %v5519_v59 = vunpack.i.l.bf16 %v5518_v7  ;;  %vm10529_vm10 = vmmov %vm10527_vm2 }
 0x239   : > { %v5530_v60 = vunpack.i.h.bf16 %v5528_v52  ;;  %v5529_v61 = vunpack.i.l.bf16 %v5528_v52  ;;  %v884_v62 = vpack.c.bf16 %v868_v57, %v867_v54  ;;  %vm10530_vm14 = vmmov %vm10527_vm2 }
 0x23a   : > { %v5523_v63 = vpop.permute.xlu1 %5522  ;;  %vm10531_vm6 = vmmov %vm10527_vm2 }
 0x23b   : > { %v834_v12 = vsel %vm10527_vm2, %v5520_v51, %v5530_v60  ;;  %v838_v13 = vsel %vm10528_vm7, %v5530_v60, %v5520_v51  ;;  %v833_v14 = vsel %vm10529_vm10, %v5519_v59, %v5529_v61  ;;  %v837_v15 = vsel %vm10530_vm14, %v5529_v61, %v5519_v59  ;;  %1162 = vmatprep.subr.bf16.mxu1 %v884_v62  ;;  %vm10532_vm7 = vmmov %vm10527_vm2 }
 0x23c   : > { %4714 = vmatpush1.bf16.msk.msra.mxu1 %vm6938_vm4, %v4713_v58  ;;  %v5533_v16 = vpop.permute.xlu0 %5532  ;;  %v4716_v22 = vpack.c.bf16 %v834_v12, %v833_v14  ;;  %v4719_v23 = vpack.c.bf16 %v838_v13, %v837_v15  ;;  %v5525_v24 = vunpack.i.h.bf16 %v5523_v63  ;;  %v5524_v25 = vunpack.i.l.bf16 %v5523_v63  ;;  %vm10533_vm10 = vmmov %vm10527_vm2 }
 0x23d   : > { %v5535_v26 = vunpack.i.h.bf16 %v5533_v16  ;;  %v5534_v27 = vunpack.i.l.bf16 %v5533_v16  ;;  %vm10534_vm14 = vcmp.lt.s32.totalorder %v6764_v19, 112 }
 0x23e   : > { %v5538_v28 = vpop.permute.xlu1 %5537  ;;  %4717 = vmatprep.subr.msk.bf16.mxu1 %vm6888_vm5, %v4716_v22 }
 0x23f   : > { %v832_v30 = vsel %vm10531_vm6, %v5525_v24, %v5535_v26  ;;  %v836_v31 = vsel %vm10527_vm2, %v5535_v26, %v5525_v24  ;;  %v831_v32 = vsel %vm10532_vm7, %v5524_v25, %v5534_v27  ;;  %v835_v33 = vsel %vm10533_vm10, %v5534_v27, %v5524_v25  ;;  %vm10535_vm6 = vmmov %vm10534_vm14 }
 0x240   : > { %4720 = vmatpush1.bf16.msk.msra.mxu1 %vm6962_vm0, %v4719_v23  ;;  %v5548_v34 = vpop.permute.xlu0 %5547  ;;  %v4722_v35 = vpack.c.bf16 %v832_v30, %v831_v32  ;;  %v4725_v37 = vpack.c.bf16 %v836_v31, %v835_v33  ;;  %v5540_v38 = vunpack.i.h.bf16 %v5538_v28  ;;  %v5539_v40 = vunpack.i.l.bf16 %v5538_v28  ;;  %vm10536_vm2 = vmmov %vm10535_vm6 }
 0x241   : > { %v5550_v41 = vunpack.i.h.bf16 %v5548_v34  ;;  %v5549_v2 = vunpack.i.l.bf16 %v5548_v34  ;;  %vm10537_vm7 = vmmov %vm10536_vm2 }
 0x242   : > { %v5543_v4 = vpop.permute.xlu1 %5542  ;;  %4723 = vmatprep.subr.msk.bf16.mxu1 %vm6888_vm5, %v4722_v35  ;;  %vm10538_vm10 = vmmov %vm10536_vm2 }
 0x243   : > { %v1058_v6 = vsel %vm10534_vm14, %v5550_v41, %v5540_v38  ;;  %v1057_v29 = vsel %vm10535_vm6, %v5549_v2, %v5539_v40  ;;  %v5545_v43 = vunpack.i.h.bf16 %v5543_v4  ;;  %v1053_v46 = vsel %vm10536_vm2, %v5539_v40, %v5549_v2  ;;  %vm10539_vm14 = vmmov %vm10536_vm2 }
 0x244   : > { %4726 = vmatpush1.bf16.msk.msra.mxu1 %vm6962_vm0, %v4725_v37  ;;  %v5553_v44 = vpop.permute.xlu0 %5552  ;;  %v4728_v45 = vpack.c.bf16 %v1058_v6, %v1057_v29  ;;  %v1054_v47 = vsel %vm10537_vm7, %v5540_v38, %v5550_v41  ;;  %v5544_v48 = vunpack.i.l.bf16 %v5543_v4  ;;  %vm10540_vm6 = vmmov %vm10536_vm2  ;;  %vm10541_vm7 = vcmp.lt.s32.totalorder %v6764_v19, 113 }
 0x245   : > { %v5555_v0 = vunpack.i.h.bf16 %v5553_v44  ;;  %v5554_v1 = vunpack.i.l.bf16 %v5553_v44  ;;  %v1069_v7 = vpack.c.bf16 %v1054_v47, %v1053_v46 }
 0x246   : > { %v5558_v49 = vpop.permute.xlu1 %5557  ;;  %4729 = vmatprep.subr.msk.bf16.mxu1 %vm6802_vm8, %v4728_v45 }
 0x247   : > { %v1056_v50 = vsel %vm10538_vm10, %v5555_v0, %v5545_v43  ;;  %v1055_v51 = vsel %vm10539_vm14, %v5554_v1, %v5544_v48  ;;  %v5560_v52 = vunpack.i.h.bf16 %v5558_v49  ;;  %v1051_v58 = vsel %vm10540_vm6, %v5544_v48, %v5554_v1  ;;  %vm10542_vm10 = vmmov %vm10541_vm7 }
 0x248   : > { %1169 = vmatpush2.bf16.msra.mxu1 %v1069_v7  ;;  %v5568_v54 = vpop.permute.xlu0 %5567  ;;  %v4731_v57 = vpack.c.bf16 %v1056_v50, %v1055_v51  ;;  %v1052_v59 = vsel %vm10536_vm2, %v5545_v43, %v5555_v0  ;;  %v5559_v60 = vunpack.i.l.bf16 %v5558_v49  ;;  %vm10543_vm14 = vmmov %vm10541_vm7 }
 0x249   : > { %v5570_v61 = vunpack.i.h.bf16 %v5568_v54  ;;  %v5569_v62 = vunpack.i.l.bf16 %v5568_v54  ;;  %v1067_v63 = vpack.c.bf16 %v1052_v59, %v1051_v58  ;;  %vm10544_vm6 = vmmov %vm10541_vm7 }
 0x24a   : > { %v5563_v12 = vpop.permute.xlu1 %5562  ;;  %4732 = vmatprep.subr.msk.bf16.mxu1 %vm6802_vm8, %v4731_v57  ;;  %vm10545_vm2 = vmmov %vm10544_vm6 }
 0x24b   : > { %v1018_v13 = vsel %vm10541_vm7, %v5560_v52, %v5570_v61  ;;  %v1022_v14 = vsel %vm10542_vm10, %v5570_v61, %v5560_v52  ;;  %v1017_v15 = vsel %vm10543_vm14, %v5559_v60, %v5569_v62  ;;  %v1021_v16 = vsel %vm10544_vm6, %v5569_v62, %v5559_v60  ;;  %vm10546_vm7 = vmmov %vm10545_vm2 }
 0x24c   : > { %1171 = vmatpush2.bf16.msra.mxu1 %v1067_v63  ;;  %v5573_v22 = vpop.permute.xlu0 %5572  ;;  %v4734_v23 = vpack.c.bf16 %v1022_v14, %v1021_v16  ;;  %v4737_v24 = vpack.c.bf16 %v1018_v13, %v1017_v15  ;;  %v5565_v25 = vunpack.i.h.bf16 %v5563_v12  ;;  %v5564_v26 = vunpack.i.l.bf16 %v5563_v12  ;;  %vm10547_vm10 = vmmov %vm10545_vm2 }
 0x24d   : > { %v5575_v27 = vunpack.i.h.bf16 %v5573_v22  ;;  %v5574_v28 = vunpack.i.l.bf16 %v5573_v22  ;;  %vm10548_vm14 = vmmov %vm10545_vm2  ;;  %vm10549_vm6 = vcmp.lt.s32.totalorder %v6764_v19, 127 }
 0x24e   : > { %v5578_v30 = vpop.permute.xlu1 %5577  ;;  %4735 = vmatprep.subr.msk.bf16.mxu1 %vm6817_vm9, %v4734_v23 }
 0x24f   : > { %v1016_v31 = vsel %vm10545_vm2, %v5565_v25, %v5575_v27  ;;  %v1020_v32 = vsel %vm10546_vm7, %v5575_v27, %v5565_v25  ;;  %v1015_v33 = vsel %vm10547_vm10, %v5564_v26, %v5574_v28  ;;  %v1019_v34 = vsel %vm10548_vm14, %v5574_v28, %v5564_v26  ;;  %vm10550_vm2 = vmmov %vm10549_vm6  ;;  %v6422_v28 = vld [vmem:[%s10262_s4] ss:$12 sps:$4 sm:$0xff]  }
 0x250   : > { %4738 = vmatpush2.bf16.msk.msra.mxu1 %vm6844_vm12, %v4737_v24  ;;  %v5588_v35 = vpop.permute.xlu0 %5587  ;;  %v4740_v37 = vpack.c.bf16 %v1020_v32, %v1019_v34  ;;  %v4743_v38 = vpack.c.bf16 %v1016_v31, %v1015_v33  ;;  %v5580_v40 = vunpack.i.h.bf16 %v5578_v30  ;;  %v5579_v41 = vunpack.i.l.bf16 %v5578_v30  ;;  %vm10551_vm7 = vmmov %vm10550_vm2 }
 0x251   : > { %v5590_v2 = vunpack.i.h.bf16 %v5588_v35  ;;  %v5589_v4 = vunpack.i.l.bf16 %v5588_v35  ;;  %vm10552_vm10 = vmmov %vm10550_vm2  ;;  %v6427_v35 = vld [vmem:[%s10262_s4 + $0x18] ss:$12 sps:$4 sm:$0xff]  }
 0x252   : > { %v5583_v6 = vpop.permute.xlu1 %5582  ;;  %4741 = vmatprep.subr.msk.bf16.mxu1 %vm6817_vm9, %v4740_v37  ;;  %vm10553_vm14 = vmmov %vm10550_vm2  ;;  %v6428_v37 = vld [vmem:[%s10262_s4 + $0x8] ss:$12 sps:$4 sm:$0xff]  }
 0x253   : > { %v982_v29 = vsel %vm10549_vm6, %v5580_v40, %v5590_v2  ;;  %v986_v43 = vsel %vm10550_vm2, %v5590_v2, %v5580_v40  ;;  %v981_v44 = vsel %vm10551_vm7, %v5579_v41, %v5589_v4  ;;  %v985_v45 = vsel %vm10552_vm10, %v5589_v4, %v5579_v41  ;;  %vm10554_vm6 = vmmov %vm10550_vm2 }
 0x254   : > { %4744 = vmatpush2.bf16.msk.msra.mxu1 %vm6844_vm12, %v4743_v38  ;;  %v5593_v46 = vpop.permute.xlu0 %5592  ;;  %v4746_v47 = vpack.c.bf16 %v986_v43, %v985_v45  ;;  %v4749_v48 = vpack.c.bf16 %v982_v29, %v981_v44  ;;  %v5585_v0 = vunpack.i.h.bf16 %v5583_v6  ;;  %v5584_v1 = vunpack.i.l.bf16 %v5583_v6  ;;  %vm10555_vm7 = vmmov %vm10550_vm2  ;;  %v6429_v38 = vld [vmem:[%s10262_s4 + $0x20] ss:$12 sps:$4 sm:$0xff]  }
 0x255   : > { %v5595_v7 = vunpack.i.h.bf16 %v5593_v46  ;;  %v5594_v49 = vunpack.i.l.bf16 %v5593_v46  ;;  %vm10302_vm10 = vcmask 261120  }
 0x256   : > { %4747 = vmatprep.subr.msk.bf16.mxu1 %vm6851_vm13, %v4746_v47  ;;  %v5598_v60 = vpop.permute.xlu1 %5597 }
 0x257   : > { %v980_v50 = vsel %vm10553_vm14, %v5585_v0, %v5595_v7  ;;  %v984_v51 = vsel %vm10554_vm6, %v5595_v7, %v5585_v0  ;;  %v979_v52 = vsel %vm10550_vm2, %v5584_v1, %v5594_v49  ;;  %v983_v54 = vsel %vm10555_vm7, %v5594_v49, %v5584_v1 }
 0x258   : > { %4750 = vmatpush2.bf16.msk.msra.mxu1 %vm6863_vm15, %v4749_v48  ;;  %v5608_v57 = vpop.permute.xlu0 %5607  ;;  %v4752_v58 = vpack.c.bf16 %v984_v51, %v983_v54  ;;  %v4755_v59 = vpack.c.bf16 %v980_v50, %v979_v52  ;;  %v5600_v12 = vunpack.i.h.bf16 %v5598_v60  ;;  %v5599_v13 = vunpack.i.l.bf16 %v5598_v60 }
 0x259   : > { %v5610_v61 = vunpack.i.h.bf16 %v5608_v57  ;;  %v5609_v62 = vunpack.i.l.bf16 %v5608_v57  ;;  %vm10557_vm14 = vcmp.lt.s32.totalorder %v6764_v19, 1 }
 0x25a   : > { %4753 = vmatprep.subr.msk.bf16.mxu1 %vm6851_vm13, %v4752_v58  ;;  %v5603_v14 = vpop.permute.xlu1 %5602  ;;  %vm10558_vm6 = vmmov %vm10557_vm14 }
 0x25b   : > { %v1094_v15 = vsel %vm648_vm1, %v5610_v61, %v5600_v12  ;;  %v1093_v16 = vsel %vm648_vm1, %v5609_v62, %v5599_v13  ;;  %v5605_v24 = vunpack.i.h.bf16 %v5603_v14  ;;  %v5604_v25 = vunpack.i.l.bf16 %v5603_v14  ;;  %vm10559_vm2 = vmmov %vm10558_vm6 }
 0x25c   : > { %4756 = vmatpush2.bf16.msk.msra.mxu1 %vm6863_vm15, %v4755_v59  ;;  %v5613_v63 = vpop.permute.xlu0 %5612  ;;  %v1089_v26 = vsel %vm648_vm1, %v5599_v13, %v5609_v62  ;;  %v4758_v27 = vpack.c.bf16 %v1094_v15, %v1093_v16  ;;  %vm10560_vm7 = vmmov %vm10559_vm2 }
 0x25d   : > { %1180 = vmatprep.subr.bf16.mxu1 %v6992_v17  ;;  %v5615_v22 = vunpack.i.h.bf16 %v5613_v63  ;;  %v5614_v23 = vunpack.i.l.bf16 %v5613_v63  ;;  %v1090_v17 = vsel %vm648_vm1, %v5600_v12, %v5610_v61 }
 0x25e   : > { %v4761_v31 = vpack.c.bf16 %v1090_v17, %v1089_v26 }
 0x25f   : > { %v1092_v30 = vsel %vm648_vm1, %v5615_v22, %v5605_v24  ;;  %v1088_v32 = vsel %vm648_vm1, %v5605_v24, %v5615_v22  ;;  %v1087_v33 = vsel %vm648_vm1, %v5604_v25, %v5614_v23 }
 0x260   : > { %1181 = vmatpush2.bf16.msra.mxu1 %v6994_v56  ;;  %v1091_v56 = vsel %vm648_vm1, %v5614_v23, %v5604_v25 }
 0x261   : > { %1182 = vmatprep.subr.bf16.mxu1 %v6986_v3  ;;  %v6425_v3 = vld [vmem:[%s10262_s4 + $0x1c] ss:$12 sps:$4 sm:$0xff]   ;;  %v4764_v34 = vpack.c.bf16 %v1092_v30, %v1091_v56 }
 0x264   : > { %1183 = vmatpush2.bf16.msra.mxu1 %v6988_v8  ;;  %v4767_v8 = vpack.c.bf16 %v1088_v32, %v1087_v33 }
 0x265   : > { %4759 = vmatprep.subr.msk.bf16.mxu1 %vm6966_vm3, %v4758_v27 }
 0x267   : > { %1185 = vmatmul.mubr.bf16.vlgmr.msra.gmra.mxu1 %v6422_v28  ;;  %v1275_v44 = vpop.permute.xlu1 %1274 }
 0x268   : > { %4762 = vmatpush1.bf16.msk.msra.mxu1 %vm6863_vm15, %v4761_v31  ;;  %1194 = vmatprep.mubr.bf16.mxu1 %v6425_v3 }
 0x269   : > { %4765 = vmatprep.subr.msk.bf16.mxu1 %vm6966_vm3, %v4764_v34  ;;  %v1280_v29 = vpop.permute.xlu0 %1279 }
 0x26b   : > { %v1307_v0 = vpop.permute.xlu1 %1306 }
 0x26c   : > { %4768 = vmatpush1.bf16.msk.msra.mxu1 %vm6863_vm15, %v4767_v8 }
 0x26d   : > { %v1312_v47 = vpop.permute.xlu0 %1311 }
 0x26f   : > { %1195 = vmatmul.mubr.bf16.gmra.mxu1 %v6427_v35  ;;  %v1265_v57 = vpop.permute.xlu1 %1264 }
 0x270   : > { %1237 = vmatprep.mubr.bf16.mxu1 %v10303_v11 }
 0x271   : > { %v1270_v49 = vpop.permute.xlu0 %1269 }
 0x273   : > { %v1297_v25 = vpop.permute.xlu1 %1296 }
 0x275   : > { %v1302_v14 = vpop.permute.xlu0 %1301 }
 0x277   : > { %4769 = vmatmul.mubr.msk.bf16.vlgmr.msra.gmra.mxu1 %vm10302_vm10, %v6428_v37 }
 0x278   : > { %1247 = vmatprep.mubr.bf16.mxu1 %v10303_v11 }
 0x27f   : > { %4770 = vmatmul.mubr.msk.bf16.gmra.mxu1 %vm10302_vm10, %v6429_v38 }
 0x280   : > { %1751 = vmatprep.mubr.bf16.mxu1 %v10303_v11 }
 0x327   : > { %v1186_v40 = vpop.f32.mrf.mxu1 }
 0x329   : > { %v1188_v41 = vpop.f32.mrf.mxu1 }
 0x32b   : > { %v1190_v2 = vpop.f32.mrf.mxu1 }
 0x32d   : > { %v1192_v4 = vpop.f32.mrf.mxu1 }
 0x32f   : > { %v1196_v6 = vpop.f32.mrf.mxu1 }
 0x331   : > { %v1198_v43 = vpop.f32.mrf.mxu1 }
 0x333   : > { %v1200_v45 = vpop.f32.mrf.mxu1 }
 0x335   : > { %v1202_v46 = vpop.f32.mrf.mxu1 }
 0x337   : > { %v1239_v48 = vpop.f32.mrf.mxu1 }
 0x338   : > { %v1240_v51 = vadd.f32 %v1239_v48, %v1186_v40 }
 0x339   : > { %v1241_v1 = vpop.f32.mrf.mxu1 }
 0x33a   : > { %v1242_v52 = vadd.f32 %v1241_v1, %v1188_v41  ;;  %v1282_v63 = vmul.f32 %v1265_v57, %v1240_v51  ;;  %v6432_v1 = vld [vmem:[%s10265_s7 + $0x4] ss:$12 sps:$4 sm:$0xff]   ;;  %v1805_v51 = vld [vmem:[%s10267_s9 + $0x8] sm:$0xff] }
 0x33b   : > { %v1243_v7 = vpop.f32.mrf.mxu1  ;;  %1698 = vmatprep.mubr.bf16.mxu0 %v6432_v1 }
 0x33c   : > { %v1244_v50 = vadd.f32 %v1243_v7, %v1190_v2  ;;  %v1283_v12 = vmul.f32 %v1265_v57, %v1242_v52  ;;  %v1314_v27 = vadd.f32 %v1297_v25, %v1282_v63  ;;  %v1772_v7 = vld [vmem:[%s10266_s8] sm:$0xff]  ;;  %v1774_v52 = vld [vmem:[%s10266_s8 + $0x10] sm:$0xff] }
 0x33d   : > { %v1245_v54 = vpop.f32.mrf.mxu1  ;;  %v1806_v57 = vld [vmem:[%s10267_s9 + $0x10] sm:$0xff] }
 0x33e   : > { %v1246_v58 = vadd.f32 %v1245_v54, %v1192_v4  ;;  %v1284_v59 = vmul.f32 %v1270_v49, %v1244_v50  ;;  %v1315_v28 = vadd.f32 %v1297_v25, %v1283_v12  ;;  %v1322_v37 = vmax.f32 %v1314_v27, 0.0  ;;  %v1804_v50 = vld [vmem:[%s10267_s9] sm:$0xff]  ;;  %v1775_v54 = vld [vmem:[%s10266_s8 + $0x18] sm:$0xff] }
 0x33f   : > { %v1249_v60 = vpop.f32.mrf.mxu1 }
 0x340   : > { %v1285_v61 = vmul.f32 %v1270_v49, %v1246_v58  ;;  %v1250_v62 = vadd.f32 %v1249_v60, %v1196_v6  ;;  %v1316_v22 = vadd.f32 %v1302_v14, %v1284_v59  ;;  %v1323_v38 = vmax.f32 %v1315_v28, 0.0  ;;  %v1773_v49 = vld [vmem:[%s10266_s8 + $0x8] sm:$0xff]  ;;  %v1807_v58 = vld [vmem:[%s10267_s9 + $0x18] sm:$0xff] }
 0x341   : > { %v1251_v13 = vpop.f32.mrf.mxu1 }
 0x342   : > { %v1286_v15 = vmul.f32 %v1275_v44, %v1250_v62  ;;  %v1252_v16 = vadd.f32 %v1251_v13, %v1198_v43  ;;  %v1317_v23 = vadd.f32 %v1302_v14, %v1285_v61  ;;  %v1324_v32 = vmax.f32 %v1316_v22, 0.0 }
 0x343   : > { %v1253_v24 = vpop.f32.mrf.mxu1 }
 0x344   : > { %v1287_v17 = vmul.f32 %v1275_v44, %v1252_v16  ;;  %v1254_v26 = vadd.f32 %v1253_v24, %v1200_v45  ;;  %v1318_v56 = vadd.f32 %v1307_v0, %v1286_v15  ;;  %v1325_v33 = vmax.f32 %v1317_v23, 0.0 }
 0x345   : > { %v1255_v30 = vpop.f32.mrf.mxu1  ;;  %v7263_v6 = vpack.c.bf16 %v1324_v32, %v1322_v37  ;;  %v5621_v48 = vpack.i.bf16 %v1324_v32, %v1322_v37 }
 0x346   : > { %v1288_v3 = vmul.f32 %v1280_v29, %v1254_v26  ;;  %v1256_v31 = vadd.f32 %v1255_v30, %v1202_v46  ;;  %v1319_v34 = vadd.f32 %v1307_v0, %v1287_v17  ;;  %v1326_v40 = vmax.f32 %v1318_v56, 0.0 }
 0x347   : > { %v7261_v4 = vpack.c.bf16 %v1325_v33, %v1323_v38 }
 0x348   : > { %v1320_v8 = vadd.f32 %v1312_v47, %v1288_v3  ;;  %v1289_v35 = vmul.f32 %v1280_v29, %v1256_v31  ;;  %v1327_v43 = vmax.f32 %v1319_v34, 0.0 }
 0x34a   : > { %v1328_v41 = vmax.f32 %v1320_v8, 0.0  ;;  %v1321_v2 = vadd.f32 %v1312_v47, %v1289_v35  ;;  %v5631_v47 = vpack.i.bf16 %v1325_v33, %v1323_v38 }
 0x34c   : > { %v1329_v44 = vmax.f32 %v1321_v2, 0.0  ;;  %v5616_v45 = vpack.i.bf16 %v1328_v41, %v1326_v40  ;;  %v7269_v29 = vpack.c.bf16 %v1328_v41, %v1326_v40 }
 0x34e   : > { %5617 = vrot.lane.b32.xlu1 %v5616_v45, %s10556_s13  ;;  %v5626_v46 = vpack.i.bf16 %v1329_v44, %v1327_v43  ;;  %v7267_v0 = vpack.c.bf16 %v1329_v44, %v1327_v43 }
 0x350   : > { %5627 = vrot.lane.b32.xlu0 %v5626_v46, %s10556_s13 }
 0x352   : > { %5622 = vrot.lane.b32.xlu1 %v5621_v48, %s10556_s13 }
 0x354   : > { %5632 = vrot.lane.b32.xlu0 %v5631_v47, %s10556_s13 }
 0x356   : > { %5637 = vrot.lane.b32.xlu1 %v5616_v45, %s10497_s25 }
 0x358   : > { %5647 = vrot.lane.b32.xlu0 %v5626_v46, %s10497_s25 }
 0x35a   : > { %5642 = vrot.lane.b32.xlu1 %v5621_v48, %s10497_s25 }
 0x35c   : > { %5652 = vrot.lane.b32.xlu0 %v5631_v47, %s10497_s25  ;;  %s6549_s25 = smov 32  }
 0x35e   : > { %5657 = vrot.lane.b32.xlu1 %v5616_v45, %s10498_s28 }
 0x360   : > { %5667 = vrot.lane.b32.xlu0 %v5626_v46, %s10498_s28 }
 0x362   : > { %5662 = vrot.lane.b32.xlu1 %v5621_v48, %s10498_s28 }
 0x364   : > { %5672 = vrot.lane.b32.xlu0 %v5631_v47, %s10498_s28  ;;  %s6550_s28 = smov 31  }
 0x366   : > { %5677 = vrot.lane.b32.xlu1 %v5616_v45, %s10499_s21 }
 0x368   : > { %5687 = vrot.lane.b32.xlu0 %v5626_v46, %s10499_s21 }
 0x36a   : > { %5682 = vrot.lane.b32.xlu1 %v5621_v48, %s10499_s21 }
 0x36c   : > { %5692 = vrot.lane.b32.xlu0 %v5631_v47, %s10499_s21  ;;  %s6551_s21 = smov 97  }
 0x36e   : > { %5697 = vrot.lane.b32.xlu1 %v5616_v45, %s10500_s26 }
 0x370   : > { %5707 = vrot.lane.b32.xlu0 %v5626_v46, %s10500_s26 }
 0x372   : > { %5702 = vrot.lane.b32.xlu1 %v5621_v48, %s10500_s26 }
 0x374   : > { %5712 = vrot.lane.b32.xlu0 %v5631_v47, %s10500_s26  ;;  %s6552_s26 = smov 95  }
 0x376   : > { %5717 = vrot.lane.b32.xlu1 %v5616_v45, %s10501_s24 }
 0x378   : > { %5727 = vrot.lane.b32.xlu0 %v5626_v46, %s10501_s24 }
 0x37a   : > { %5722 = vrot.lane.b32.xlu1 %v5621_v48, %s10501_s24 }
 0x37c   : > { %5732 = vrot.lane.b32.xlu0 %v5631_v47, %s10501_s24 }
 0x37e   : > { %5737 = vrot.lane.b32.xlu1 %v5616_v45, %s10502_s27 }
 0x380   : > { %5747 = vrot.lane.b32.xlu0 %v5626_v46, %s10502_s27 }
 0x382   : > { %5742 = vrot.lane.b32.xlu1 %v5621_v48, %s10502_s27 }
 0x384   : > { %5752 = vrot.lane.b32.xlu0 %v5631_v47, %s10502_s27 }
 0x386   : > { %5757 = vrot.lane.b32.xlu1 %v5616_v45, %s10503_s18 }
 0x388   : > { %5767 = vrot.lane.b32.xlu0 %v5626_v46, %s10503_s18 }
 0x38a   : > { %5762 = vrot.lane.b32.xlu1 %v5621_v48, %s10503_s18 }
 0x38c   : > { %5772 = vrot.lane.b32.xlu0 %v5631_v47, %s10503_s18  ;;  %s6475_s18 = scalar_lea.vmem %s6474_s1, 4096 }
 0x38e   : > { %1778 = vperm.xlu1 %5455, %v1772_v7  }
 0x390   : > { %1783 = vperm.xlu0 %5454, %v1773_v49  }
 0x392   : > { %1810 = vperm.xlu1 %5455, %v1804_v50  }
 0x394   : > { %1815 = vperm.xlu0 %5454, %v1805_v51  }
 0x396   : > { %1788 = vperm.xlu1 %5455, %v1774_v52  }
 0x398   : > { %1793 = vperm.xlu0 %5454, %v1775_v54  }
 0x39a   : > { %1820 = vperm.xlu1 %5455, %v1806_v57  }
 0x39c   : > { %1825 = vperm.xlu0 %5454, %v1807_v58  }
 0x3c0   : > { %v5618_v59 = vpop.permute.xlu1 %5617 }
 0x3c1   : > { %v5620_v61 = vunpack.i.h.bf16 %v5618_v59  ;;  %v5619_v62 = vunpack.i.l.bf16 %v5618_v59 }
 0x3c2   : > { %v5628_v60 = vpop.permute.xlu0 %5627 }
 0x3c3   : > { %v5630_v63 = vunpack.i.h.bf16 %v5628_v60  ;;  %v5629_v12 = vunpack.i.l.bf16 %v5628_v60 }
 0x3c4   : > { %v5623_v13 = vpop.permute.xlu1 %5622 }
 0x3c5   : > { %v1456_v14 = vsel %vm10557_vm14, %v5619_v62, %v5629_v12  ;;  %v1457_v15 = vsel %vm10558_vm6, %v5620_v61, %v5630_v63  ;;  %v1460_v16 = vsel %vm10559_vm2, %v5629_v12, %v5619_v62  ;;  %v1461_v22 = vsel %vm10560_vm7, %v5630_v63, %v5620_v61  ;;  %vm10561_vm14 = vmmov %vm10559_vm2 }
 0x3c6   : > { %v4781_v23 = vpack.c.bf16 %v1461_v22, %v1460_v16  ;;  %v5633_v24 = vpop.permute.xlu0 %5632  ;;  %v4778_v25 = vpack.c.bf16 %v1457_v15, %v1456_v14  ;;  %v5625_v17 = vunpack.i.h.bf16 %v5623_v13  ;;  %v5624_v26 = vunpack.i.l.bf16 %v5623_v13  ;;  %vm10562_vm6 = vmmov %vm10559_vm2 }
 0x3c7   : > { %v5635_v27 = vunpack.i.h.bf16 %v5633_v24  ;;  %v5634_v28 = vunpack.i.l.bf16 %v5633_v24  ;;  %vm10563_vm7 = vmmov %vm10559_vm2 }
 0x3c8   : > { %4779 = vmatprep.subr.msk.bf16.mxu0 %vm6888_vm5, %v4778_v25  ;;  %v5638_v30 = vpop.permute.xlu1 %5637 }
 0x3c9   : > { %v1454_v56 = vsel %vm10561_vm14, %v5624_v26, %v5634_v28  ;;  %v1455_v3 = vsel %vm10562_vm6, %v5625_v17, %v5635_v27  ;;  %v1458_v31 = vsel %vm10559_vm2, %v5634_v28, %v5624_v26  ;;  %v1459_v32 = vsel %vm10563_vm7, %v5635_v27, %v5625_v17  ;;  %4782 = vmatpush1.bf16.msk.msra.mxu0 %vm6844_vm12, %v4781_v23 }
 0x3ca   : > { %v4787_v33 = vpack.c.bf16 %v1459_v32, %v1458_v31  ;;  %v5648_v34 = vpop.permute.xlu0 %5647  ;;  %v4784_v8 = vpack.c.bf16 %v1455_v3, %v1454_v56  ;;  %v5640_v35 = vunpack.i.h.bf16 %v5638_v30  ;;  %v5639_v37 = vunpack.i.l.bf16 %v5638_v30 }
 0x3cb   : > { %v5650_v38 = vunpack.i.h.bf16 %v5648_v34  ;;  %v5649_v40 = vunpack.i.l.bf16 %v5648_v34  ;;  %vm10564_vm14 = vcmp.lt.s32.totalorder %v6764_v19, 15 }
 0x3cc   : > { %v5643_v41 = vpop.permute.xlu1 %5642  ;;  %4785 = vmatprep.subr.msk.bf16.mxu0 %vm6888_vm5, %v4784_v8  ;;  %vm10565_vm6 = vmmov %vm10564_vm14 }
 0x3cd   : > { %v1420_v2 = vsel %vm10564_vm14, %v5639_v37, %v5649_v40  ;;  %v1421_v43 = vsel %vm10565_vm6, %v5640_v35, %v5650_v38  ;;  %vm10566_vm2 = vmmov %vm10565_vm6  ;;  %4788 = vmatpush1.bf16.msk.msra.mxu0 %vm6844_vm12, %v4787_v33  ;;  %v5645_v1 = vunpack.i.h.bf16 %v5643_v41  ;;  %v5644_v7 = vunpack.i.l.bf16 %v5643_v41 }
 0x3ce   : > { %v1424_v44 = vsel %vm10566_vm2, %v5649_v40, %v5639_v37  ;;  %vm10567_vm7 = vmmov %vm10566_vm2  ;;  %v5653_v48 = vpop.permute.xlu0 %5652  ;;  %v4790_v47 = vpack.c.bf16 %v1421_v43, %v1420_v2 }
 0x3cf   : > { %v1425_v45 = vsel %vm10567_vm7, %v5650_v38, %v5640_v35  ;;  %v5655_v49 = vunpack.i.h.bf16 %v5653_v48  ;;  %v5654_v50 = vunpack.i.l.bf16 %v5653_v48  ;;  %vm10568_vm14 = vmmov %vm10566_vm2 }
 0x3d0   : > { %v4793_v46 = vpack.c.bf16 %v1425_v45, %v1424_v44  ;;  %v5658_v51 = vpop.permute.xlu1 %5657  ;;  %4791 = vmatprep.subr.msk.bf16.mxu0 %vm6851_vm13, %v4790_v47  ;;  %vm10569_vm6 = vmmov %vm10566_vm2 }
 0x3d1   : > { %v1418_v52 = vsel %vm10568_vm14, %v5644_v7, %v5654_v50  ;;  %v1419_v54 = vsel %vm10569_vm6, %v5645_v1, %v5655_v49  ;;  %v1422_v57 = vsel %vm10566_vm2, %v5654_v50, %v5644_v7  ;;  %vm10570_vm7 = vmmov %vm10566_vm2  ;;  %v5660_v62 = vunpack.i.h.bf16 %v5658_v51 }
 0x3d2   : > { %v1423_v58 = vsel %vm10570_vm7, %v5655_v49, %v5645_v1  ;;  %4794 = vmatpush1.bf16.msk.msra.mxu0 %vm6920_vm11, %v4793_v46  ;;  %v5668_v60 = vpop.permute.xlu0 %5667  ;;  %v4796_v61 = vpack.c.bf16 %v1419_v54, %v1418_v52  ;;  %v5659_v63 = vunpack.i.l.bf16 %v5658_v51  ;;  %vm10571_vm14 = vcmp.lt.s32.totalorder %v6764_v19, 16 }
 0x3d3   : > { %v4799_v59 = vpack.c.bf16 %v1423_v58, %v1422_v57  ;;  %v5670_v12 = vunpack.i.h.bf16 %v5668_v60  ;;  %v5669_v13 = vunpack.i.l.bf16 %v5668_v60  ;;  %vm10572_vm6 = vmmov %vm10571_vm14 }
 0x3d4   : > { %v5663_v14 = vpop.permute.xlu1 %5662  ;;  %4797 = vmatprep.subr.msk.bf16.mxu0 %vm6851_vm13, %v4796_v61  ;;  %vm10573_vm2 = vmmov %vm10572_vm6 }
 0x3d5   : > { %v1388_v15 = vsel %vm10571_vm14, %v5669_v13, %v5659_v63  ;;  %v1389_v16 = vsel %vm10572_vm6, %v5670_v12, %v5660_v62  ;;  %v5665_v23 = vunpack.i.h.bf16 %v5663_v14  ;;  %v1384_v25 = vsel %vm10573_vm2, %v5659_v63, %v5669_v13  ;;  %vm10574_vm7 = vmmov %vm10573_vm2 }
 0x3d6   : > { %4800 = vmatpush1.bf16.msk.msra.mxu0 %vm6920_vm11, %v4799_v59  ;;  %v4802_v22 = vpack.c.bf16 %v1389_v16, %v1388_v15  ;;  %v5673_v24 = vpop.permute.xlu0 %5672  ;;  %v1385_v17 = vsel %vm10574_vm7, %v5660_v62, %v5670_v12  ;;  %v5664_v26 = vunpack.i.l.bf16 %v5663_v14  ;;  %vm10575_vm14 = vmmov %vm10573_vm2  ;;  %vm10578_vm7 = vcmp.lt.s32.totalorder %v6764_v19, 17 }
 0x3d7   : > { %v5675_v27 = vunpack.i.h.bf16 %v5673_v24  ;;  %v5674_v28 = vunpack.i.l.bf16 %v5673_v24  ;;  %v1401_v30 = vpack.c.bf16 %v1385_v17, %v1384_v25  ;;  %vm10576_vm6 = vmmov %vm10573_vm2 }
 0x3d8   : > { %v5678_v56 = vpop.permute.xlu1 %5677  ;;  %vm10577_vm11 = vmmov %vm10573_vm2 }
 0x3d9   : > { %v1386_v3 = vsel %vm10575_vm14, %v5674_v28, %v5664_v26  ;;  %v1387_v53 = vsel %vm10576_vm6, %v5675_v27, %v5665_v23  ;;  %1674 = vmatprep.subr.bf16.mxu0 %v1401_v30  ;;  %v5680_v32 = vunpack.i.h.bf16 %v5678_v56  ;;  %v1382_v34 = vsel %vm10577_vm11, %v5664_v26, %v5674_v28  ;;  %vm10579_vm14 = vmmov %vm10578_vm7 }
 0x3da   : > { %v4805_v31 = vpack.c.bf16 %v1387_v53, %v1386_v3  ;;  %4803 = vmatpush1.bf16.msk.msra.mxu0 %vm6938_vm4, %v4802_v22  ;;  %v5688_v33 = vpop.permute.xlu0 %5687  ;;  %v1383_v8 = vsel %vm10573_vm2, %v5665_v23, %v5675_v27  ;;  %v5679_v35 = vunpack.i.l.bf16 %v5678_v56  ;;  %vm10580_vm6 = vmmov %vm10578_vm7 }
 0x3db   : > { %v5690_v37 = vunpack.i.h.bf16 %v5688_v33  ;;  %v5689_v38 = vunpack.i.l.bf16 %v5688_v33  ;;  %v1399_v40 = vpack.c.bf16 %v1383_v8, %v1382_v34  ;;  %vm10581_vm10 = vmmov %vm10580_vm6 }
 0x3dc   : > { %v5683_v41 = vpop.permute.xlu1 %5682  ;;  %vm10582_vm11 = vmmov %vm10580_vm6 }
 0x3dd   : > { %v1348_v2 = vsel %vm10578_vm7, %v5679_v35, %v5689_v38  ;;  %v1349_v43 = vsel %vm10579_vm14, %v5680_v32, %v5690_v37  ;;  %v1352_v44 = vsel %vm10580_vm6, %v5689_v38, %v5679_v35  ;;  %v1353_v45 = vsel %vm10581_vm10, %v5690_v37, %v5680_v32  ;;  %1676 = vmatprep.subr.bf16.mxu0 %v1399_v40  ;;  %vm10583_vm10 = vmmov %vm10580_vm6 }
 0x3de   : > { %v4811_v46 = vpack.c.bf16 %v1353_v45, %v1352_v44  ;;  %4806 = vmatpush1.bf16.msk.msra.mxu0 %vm6938_vm4, %v4805_v31  ;;  %v5693_v48 = vpop.permute.xlu0 %5692  ;;  %v4808_v47 = vpack.c.bf16 %v1349_v43, %v1348_v2  ;;  %v5685_v1 = vunpack.i.h.bf16 %v5683_v41  ;;  %v5684_v7 = vunpack.i.l.bf16 %v5683_v41  ;;  %vm10584_vm2 = vmmov %vm10580_vm6 }
 0x3df   : > { %v5695_v49 = vunpack.i.h.bf16 %v5693_v48  ;;  %v5694_v50 = vunpack.i.l.bf16 %v5693_v48  ;;  %vm10585_vm4 = vmmov %vm10584_vm2  ;;  %vm10586_vm7 = vcmp.lt.s32.totalorder %v6764_v19, 112 }
 0x3e0   : > { %v5698_v51 = vpop.permute.xlu1 %5697  ;;  %4809 = vmatprep.subr.msk.bf16.mxu0 %vm6888_vm5, %v4808_v47  ;;  %vm10587_vm14 = vmmov %vm10586_vm7 }
 0x3e1   : > { %v1346_v52 = vsel %vm10582_vm11, %v5684_v7, %v5694_v50  ;;  %v1347_v54 = vsel %vm10583_vm10, %v5685_v1, %v5695_v49  ;;  %v1350_v9 = vsel %vm10584_vm2, %v5694_v50, %v5684_v7  ;;  %v1351_v57 = vsel %vm10585_vm4, %v5695_v49, %v5685_v1  ;;  %vm10588_vm6 = vmmov %vm10586_vm7 }
 0x3e2   : > { %v4817_v58 = vpack.c.bf16 %v1351_v57, %v1350_v9  ;;  %4812 = vmatpush1.bf16.msk.msra.mxu0 %vm6962_vm0, %v4811_v46  ;;  %v5708_v59 = vpop.permute.xlu0 %5707  ;;  %v4814_v60 = vpack.c.bf16 %v1347_v54, %v1346_v52  ;;  %v5700_v61 = vunpack.i.h.bf16 %v5698_v51  ;;  %v5699_v62 = vunpack.i.l.bf16 %v5698_v51  ;;  %vm10589_vm11 = vmmov %vm10588_vm6 }
 0x3e3   : > { %v5710_v63 = vunpack.i.h.bf16 %v5708_v59  ;;  %v5709_v12 = vunpack.i.l.bf16 %v5708_v59  ;;  %vm10594_vm4 = vcmp.lt.s32.totalorder %v6764_v19, 113 }
 0x3e4   : > { %v5703_v13 = vpop.permute.xlu1 %5702  ;;  %4815 = vmatprep.subr.msk.bf16.mxu0 %vm6888_vm5, %v4814_v60  ;;  %vm10590_vm5 = vmmov %vm10588_vm6 }
 0x3e5   : > { %v1568_v14 = vsel %vm10586_vm7, %v5699_v62, %v5709_v12  ;;  %v1569_v15 = vsel %vm10587_vm14, %v5700_v61, %v5710_v63  ;;  %v1572_v16 = vsel %vm10588_vm6, %v5709_v12, %v5699_v62  ;;  %v1573_v22 = vsel %vm10589_vm11, %v5710_v63, %v5700_v61  ;;  %vm10591_vm10 = vmmov %vm10590_vm5 }
 0x3e6   : > { %4818 = vmatpush1.bf16.msk.msra.mxu0 %vm6962_vm0, %v4817_v58  ;;  %v5713_v23 = vpop.permute.xlu0 %5712  ;;  %v4820_v24 = vpack.c.bf16 %v1573_v22, %v1572_v16  ;;  %v1584_v25 = vpack.c.bf16 %v1569_v15, %v1568_v14  ;;  %v5705_v36 = vunpack.i.h.bf16 %v5703_v13  ;;  %v5704_v17 = vunpack.i.l.bf16 %v5703_v13  ;;  %vm10592_vm2 = vmmov %vm10590_vm5 }
 0x3e7   : > { %v5715_v26 = vunpack.i.h.bf16 %v5713_v23  ;;  %v5714_v27 = vunpack.i.l.bf16 %v5713_v23  ;;  %vm10593_vm0 = vmmov %vm10592_vm2 }
 0x3e8   : > { %v5718_v28 = vpop.permute.xlu1 %5717  ;;  %4821 = vmatprep.subr.msk.bf16.mxu0 %vm6802_vm8, %v4820_v24  ;;  %vm10595_vm7 = vmmov %vm10594_vm4 }
 0x3e9   : > { %v1566_v30 = vsel %vm10590_vm5, %v5704_v17, %v5714_v27  ;;  %v1567_v56 = vsel %vm10591_vm10, %v5705_v36, %v5715_v26  ;;  %v1570_v39 = vsel %vm10592_vm2, %v5714_v27, %v5704_v17  ;;  %v1571_v3 = vsel %vm10593_vm0, %v5715_v26, %v5705_v36  ;;  %vm10596_vm14 = vmmov %vm10594_vm4 }
 0x3ea   : > { %1683 = vmatpush2.bf16.msra.mxu0 %v1584_v25  ;;  %v5728_v53 = vpop.permute.xlu0 %5727  ;;  %v4823_v31 = vpack.c.bf16 %v1571_v3, %v1570_v39  ;;  %v1582_v32 = vpack.c.bf16 %v1567_v56, %v1566_v30  ;;  %v5720_v33 = vunpack.i.h.bf16 %v5718_v28  ;;  %v5719_v34 = vunpack.i.l.bf16 %v5718_v28  ;;  %vm10597_vm6 = vmmov %vm10594_vm4 }
 0x3eb   : > { %v5730_v8 = vunpack.i.h.bf16 %v5728_v53  ;;  %v5729_v35 = vunpack.i.l.bf16 %v5728_v53  ;;  %vm10599_vm11 = vmmov %vm10594_vm4  ;;  %vm10602_vm2 = vcmp.lt.s32.totalorder %v6764_v19, 127 }
 0x3ec   : > { %v5723_v37 = vpop.permute.xlu1 %5722  ;;  %4824 = vmatprep.subr.msk.bf16.mxu0 %vm6802_vm8, %v4823_v31  ;;  %vm10598_vm8 = vmmov %vm10594_vm4 }
 0x3ed   : > { %v1532_v38 = vsel %vm10594_vm4, %v5719_v34, %v5729_v35  ;;  %v1533_v40 = vsel %vm10595_vm7, %v5720_v33, %v5730_v8  ;;  %v1536_v41 = vsel %vm10596_vm14, %v5729_v35, %v5719_v34  ;;  %v1537_v2 = vsel %vm10597_vm6, %v5730_v8, %v5720_v33  ;;  %vm10600_vm5 = vmmov %vm10594_vm4 }
 0x3ee   : > { %v4829_v43 = vpack.c.bf16 %v1533_v40, %v1532_v38  ;;  %1685 = vmatpush2.bf16.msra.mxu0 %v1582_v32  ;;  %v5733_v44 = vpop.permute.xlu0 %5732  ;;  %v4826_v45 = vpack.c.bf16 %v1537_v2, %v1536_v41  ;;  %v5725_v46 = vunpack.i.h.bf16 %v5723_v37  ;;  %v5724_v48 = vunpack.i.l.bf16 %v5723_v37  ;;  %vm10601_vm10 = vmmov %vm10594_vm4 }
 0x3ef   : > { %v5735_v42 = vunpack.i.h.bf16 %v5733_v44  ;;  %v5734_v47 = vunpack.i.l.bf16 %v5733_v44  ;;  %vm10603_vm0 = vmmov %vm10602_vm2  ;;  %v1908_v44 = vld [vmem:[#allocation2 + $0x1e0] sm:$0xff] }
 0x3f0   : > { %v5738_v1 = vpop.permute.xlu1 %5737  ;;  %4827 = vmatprep.subr.msk.bf16.mxu0 %vm6817_vm9, %v4826_v45  ;;  %vm10604_vm4 = vmmov %vm10603_vm0  ;;  %v1905_v45 = vld [vmem:[#allocation2 + $0x1c8] sm:$0xff] }
 0x3f1   : > { %v1530_v7 = vsel %vm10598_vm8, %v5724_v48, %v5734_v47  ;;  %v1531_v49 = vsel %vm10599_vm11, %v5725_v46, %v5735_v42  ;;  %v1534_v50 = vsel %vm10600_vm5, %v5734_v47, %v5724_v48  ;;  %v1535_v51 = vsel %vm10601_vm10, %v5735_v42, %v5725_v46  ;;  %vm10605_vm7 = vmmov %vm10603_vm0  ;;  %v1909_v46 = vld [vmem:[#allocation2 + $0x1e8] sm:$0xff] }
 0x3f2   : > { %v4835_v52 = vpack.c.bf16 %v1531_v49, %v1530_v7  ;;  %4830 = vmatpush2.bf16.msk.msra.mxu0 %vm6844_vm12, %v4829_v43  ;;  %v5748_v54 = vpop.permute.xlu0 %5747  ;;  %v4832_v9 = vpack.c.bf16 %v1535_v51, %v1534_v50  ;;  %v5740_v57 = vunpack.i.h.bf16 %v5738_v1  ;;  %v5739_v58 = vunpack.i.l.bf16 %v5738_v1  ;;  %vm10607_vm14 = vmmov %vm10603_vm0  ;;  %v1904_v43 = vld [vmem:[#allocation2 + $0x1c0] sm:$0xff]  ;;  %v6433_v51 = vld [vmem:[%s10265_s7 + $0x8] ss:$12 sps:$4 sm:$0xff]  }
 0x3f3   : > { %v5750_v59 = vunpack.i.h.bf16 %v5748_v54  ;;  %v5749_v60 = vunpack.i.l.bf16 %v5748_v54  ;;  %vm10608_vm6 = vmmov %vm10603_vm0  ;;  %v4920_v49 = vcombine.high %v1904_v43, %v1908_v44  ;;  %v4922_v50 = vcombine.high %v1905_v45, %v1909_v46  ;;  %v1900_v54 = vld [vmem:[#allocation2 + $0x1a0] sm:$0xff] }
 0x3f4   : > { %v5743_v61 = vpop.permute.xlu1 %5742  ;;  %4833 = vmatprep.subr.msk.bf16.mxu0 %vm6817_vm9, %v4832_v9  ;;  %vm10606_vm9 = vmmov %vm10603_vm0  ;;  %v1897_v9 = vld [vmem:[#allocation2 + $0x188] sm:$0xff]  ;;  %vm10418_vm8 = vcmp.lt.s32.totalorder %v6764_v19, 31  ;;  %vm10659_vm5 = vcmp.lt.s32.totalorder %v6764_v19, 1 }
 0x3f5   : > { %v1496_v62 = vsel %vm10602_vm2, %v5739_v58, %v5749_v60  ;;  %v1497_v63 = vsel %vm10603_vm0, %v5740_v57, %v5750_v59  ;;  %v1500_v12 = vsel %vm10604_vm4, %v5749_v60, %v5739_v58  ;;  %v1501_v13 = vsel %vm10605_vm7, %v5750_v59, %v5740_v57  ;;  %v1901_v57 = vld [vmem:[#allocation2 + $0x1a8] sm:$0xff]  ;;  %v1888_v60 = vld [vmem:[#allocation2 + $0x140] sm:$0xff]  ;;  %vm10661_vm10 = vmmov %vm10659_vm5 }
 0x3f6   : > { %v4841_v14 = vpack.c.bf16 %v1497_v63, %v1496_v62  ;;  %4836 = vmatpush2.bf16.msk.msra.mxu0 %vm6844_vm12, %v4835_v52  ;;  %v5753_v15 = vpop.permute.xlu0 %5752  ;;  %v4838_v16 = vpack.c.bf16 %v1501_v13, %v1500_v12  ;;  %v5745_v55 = vunpack.i.h.bf16 %v5743_v61  ;;  %v5744_v22 = vunpack.i.l.bf16 %v5743_v61  ;;  %vm10609_vm12 = vmmov %vm10603_vm0  ;;  %v1896_v52 = vld [vmem:[#allocation2 + $0x180] sm:$0xff]  ;;  %v1889_v62 = vld [vmem:[#allocation2 + $0x148] sm:$0xff] }
 0x3f7   : > { %v5755_v23 = vunpack.i.h.bf16 %v5753_v15  ;;  %v5754_v24 = vunpack.i.l.bf16 %v5753_v15  ;;  %v4921_v58 = vcombine.low %v1905_v45, %v1909_v46  ;;  %v4912_v59 = vcombine.high %v1896_v52, %v1900_v54  ;;  %v1892_v61 = vld [vmem:[#allocation2 + $0x160] sm:$0xff]  ;;  %v1893_v63 = vld [vmem:[#allocation2 + $0x168] sm:$0xff]  ;;  %vm10669_vm7 = vmmov %vm10659_vm5 }
 0x3f8   : > { %v5758_v25 = vpop.permute.xlu1 %5757  ;;  %4839 = vmatprep.subr.msk.bf16.mxu0 %vm6851_vm13, %v4838_v16  ;;  %v4914_v21 = vcombine.high %v1897_v9, %v1901_v57  ;;  %v4913_v12 = vcombine.low %v1897_v9, %v1901_v57  ;;  %v4904_v13 = vcombine.high %v1888_v60, %v1892_v61  ;;  %v4906_v15 = vcombine.high %v1889_v62, %v1893_v63  ;;  %v1880_v16 = vld [vmem:[#allocation2 + $0x100] sm:$0xff] }
 0x3f9   : > { %v1494_v36 = vsel %vm10606_vm9, %v5744_v22, %v5754_v24  ;;  %v1495_v17 = vsel %vm10607_vm14, %v5745_v55, %v5755_v23  ;;  %v1498_v5 = vsel %vm10608_vm6, %v5754_v24, %v5744_v22  ;;  %v1499_v26 = vsel %vm10609_vm12, %v5755_v23, %v5745_v55  ;;  %v1884_v55 = vld [vmem:[#allocation2 + $0x120] sm:$0xff]  ;;  %v1881_v23 = vld [vmem:[#allocation2 + $0x108] sm:$0xff]  ;;  %vm10671_vm9 = vmmov %vm10659_vm5 }
 0x3fa   : > { %v4847_v27 = vpack.c.bf16 %v1495_v17, %v1494_v36  ;;  %4842 = vmatpush2.bf16.msk.msra.mxu0 %vm6863_vm15, %v4841_v14  ;;  %v5768_v28 = vpop.permute.xlu0 %5767  ;;  %v4844_v30 = vpack.c.bf16 %v1499_v26, %v1498_v5  ;;  %v5760_v56 = vunpack.i.h.bf16 %v5758_v25  ;;  %v5759_v39 = vunpack.i.l.bf16 %v5758_v25  ;;  %v6437_v14 = vld [vmem:[%s10265_s7 + $0x20] ss:$12 sps:$4 sm:$0xff]   ;;  %v6436_v22 = vld [vmem:[%s10265_s7 + $0x18] ss:$12 sps:$4 sm:$0xff]   ;;  %vm10674_vm6 = vmmov %vm10659_vm5 }
 0x3fb   : > { %v5770_v3 = vunpack.i.h.bf16 %v5768_v28  ;;  %v5769_v53 = vunpack.i.l.bf16 %v5768_v28  ;;  %v1885_v24 = vld [vmem:[#allocation2 + $0x128] sm:$0xff]  ;;  %v4903_v25 = vcombine.low %v1888_v60, %v1892_v61  ;;  %v4905_v36 = vcombine.low %v1889_v62, %v1893_v63  ;;  %v1872_v26 = vld [vmem:[#allocation2 + $0xc0] sm:$0xff]  ;;  %vm10675_vm12 = vmmov %vm10659_vm5 }
 0x3fc   : > { %v5763_v31 = vpop.permute.xlu1 %5762  ;;  %4845 = vmatprep.subr.msk.bf16.mxu0 %vm6851_vm13, %v4844_v30  ;;  %v4896_v17 = vcombine.high %v1880_v16, %v1884_v55  ;;  %v4898_v5 = vcombine.high %v1881_v23, %v1885_v24  ;;  %v1873_v28 = vld [vmem:[#allocation2 + $0xc8] sm:$0xff]  ;;  %vm3685_vm0 = vcmp.lt.s32.totalorder %v6764_v19, 97 }
 0x3fd   : > { %v1604_v32 = vsel %vm648_vm1, %v5759_v39, %v5769_v53  ;;  %v1605_v33 = vsel %vm648_vm1, %v5760_v56, %v5770_v3  ;;  %v1608_v34 = vsel %vm648_vm1, %v5769_v53, %v5759_v39  ;;  %v1609_v8 = vsel %vm648_vm1, %v5770_v3, %v5760_v56  ;;  %v1877_v30 = vld [vmem:[#allocation2 + $0xe8] sm:$0xff] }
 0x3fe   : > { %v4853_v35 = vpack.c.bf16 %v1605_v33, %v1604_v32  ;;  %4848 = vmatpush2.bf16.msk.msra.mxu0 %vm6863_vm15, %v4847_v27  ;;  %v5773_v37 = vpop.permute.xlu0 %5772  ;;  %v4850_v38 = vpack.c.bf16 %v1609_v8, %v1608_v34  ;;  %v5765_v10 = vunpack.i.h.bf16 %v5763_v31  ;;  %v5764_v40 = vunpack.i.l.bf16 %v5763_v31  ;;  %v1876_v27 = vld [vmem:[#allocation2 + $0xe0] sm:$0xff]  ;;  %v1865_v33 = vld [vmem:[#allocation2 + $0x88] sm:$0xff] }
 0x3ff   : > { %v5775_v41 = vunpack.i.h.bf16 %v5773_v37  ;;  %v5774_v2 = vunpack.i.l.bf16 %v5773_v37  ;;  %1694 = vmatprep.subr.bf16.mxu0 %v7267_v0  ;;  %v4895_v56 = vcombine.low %v1880_v16, %v1884_v55  ;;  %v4897_v39 = vcombine.low %v1881_v23, %v1885_v24  ;;  %v1864_v31 = vld [vmem:[#allocation2 + $0x80] sm:$0xff]  ;;  %v1869_v34 = vld [vmem:[#allocation2 + $0xa8] sm:$0xff] }
 0x400   : > { %4851 = vmatprep.subr.msk.bf16.mxu1 %vm6966_vm3, %v4850_v38  ;;  %v4888_v3 = vcombine.high %v1872_v26, %v1876_v27  ;;  %v4890_v53 = vcombine.high %v1873_v28, %v1877_v30  ;;  %v1868_v32 = vld [vmem:[#allocation2 + $0xa0] sm:$0xff]  ;;  %v4887_v8 = vcombine.low %v1872_v26, %v1876_v27  ;;  %v4882_v38 = vcombine.high %v1865_v33, %v1869_v34  ;;  %v1965_v60 = vld [vmem:[#allocation2 + $0x3a8] sm:$0xff] }
 0x401   : > { %v1602_v48 = vsel %vm648_vm1, %v5764_v40, %v5774_v2  ;;  %v1603_v42 = vsel %vm648_vm1, %v5765_v10, %v5775_v41  ;;  %v1606_v47 = vsel %vm648_vm1, %v5774_v2, %v5764_v40  ;;  %v1607_v1 = vsel %vm648_vm1, %v5775_v41, %v5765_v10  ;;  %4854 = vmatpush1.bf16.msk.msra.mxu1 %vm6863_vm15, %v4853_v35  ;;  %v1856_v10 = vld [vmem:[#allocation2 + $0x40] sm:$0xff]  ;;  %v1857_v41 = vld [vmem:[#allocation2 + $0x48] sm:$0xff] }
 0x402   : > { %v4859_v0 = vpack.c.bf16 %v1603_v42, %v1602_v48  ;;  %1695 = vmatpush2.bf16.msra.mxu0 %v7269_v29  ;;  %v4856_v7 = vpack.c.bf16 %v1607_v1, %v1606_v47  ;;  %v6430_v29 = vld [vmem:[%s10265_s7] ss:$12 sps:$4 sm:$0xff]   ;;  %vm10610_vm1 = vcmask 261120   ;;  %v4889_v35 = vcombine.low %v1873_v28, %v1877_v30 }
 0x403   : > { %1696 = vmatprep.subr.bf16.mxu0 %v7261_v4  ;;  %v4919_v4 = vcombine.low %v1904_v43, %v1908_v44  ;;  %vm10611_vm13 = vmmov %vm10610_vm1  ;;  %v4880_v37 = vcombine.high %v1864_v31, %v1868_v32  ;;  %v1860_v40 = vld [vmem:[#allocation2 + $0x60] sm:$0xff]  ;;  %v1861_v2 = vld [vmem:[#allocation2 + $0x68] sm:$0xff]  ;;  %v4879_v43 = vcombine.low %v1864_v31, %v1868_v32  ;;  %v4881_v44 = vcombine.low %v1865_v33, %v1869_v34 }
 0x404   : > { %4857 = vmatprep.subr.msk.bf16.mxu1 %vm6966_vm3, %v4856_v7  ;;  %v4872_v45 = vcombine.high %v1856_v10, %v1860_v40  ;;  %v4874_v46 = vcombine.high %v1857_v41, %v1861_v2  ;;  %v1848_v48 = vld [vmem:[#allocation2] sm:$0xff]  ;;  %v1849_v47 = vld [vmem:[#allocation2 + $0x8] sm:$0xff]  ;;  %v4873_v7 = vcombine.low %v1857_v41, %v1861_v2 }
 0x405   : > { %4860 = vmatpush1.bf16.msk.msra.mxu1 %vm6863_vm15, %v4859_v0  ;;  %v1852_v42 = vld [vmem:[#allocation2 + $0x20] sm:$0xff]  ;;  %v1853_v1 = vld [vmem:[#allocation2 + $0x28] sm:$0xff]  ;;  %v4871_v0 = vcombine.low %v1856_v10, %v1860_v40 }
 0x406   : > { %1697 = vmatpush2.bf16.msra.mxu0 %v7263_v6  ;;  %2616 = vmatprep.subr.bf16.mxu1 %v4920_v49  ;;  %v4911_v6 = vcombine.low %v1896_v52, %v1900_v54  ;;  %v4864_v49 = vcombine.high %v1848_v48, %v1852_v42  ;;  %v1972_v52 = vld [vmem:[#allocation2 + $0x3e0] sm:$0xff]  ;;  %v1969_v54 = vld [vmem:[#allocation2 + $0x3c8] sm:$0xff]  ;;  %v4863_v9 = vcombine.low %v1848_v48, %v1852_v42 }
 0x407   : > { %2669 = vmatprep.subr.bf16.mxu0 %v4922_v50  ;;  %v4866_v50 = vcombine.high %v1849_v47, %v1853_v1  ;;  %v4865_v57 = vcombine.low %v1849_v47, %v1853_v1  ;;  %v1944_v24 = vld [vmem:[#allocation2 + $0x300] sm:$0xff]  ;;  %v1941_v32 = vld [vmem:[#allocation2 + $0x2e8] sm:$0xff] }
 0x408   : > { %4861 = vmatmul.mubr.msk.bf16.vlgmr.msra.gmra.mxu1 %vm10610_vm1, %v6433_v51  ;;  %v1968_v51 = vld [vmem:[#allocation2 + $0x3c0] sm:$0xff]  ;;  %v1933_v40 = vld [vmem:[#allocation2 + $0x2a8] sm:$0xff]  ;;  %vm10676_vm1 = vmmov %vm10659_vm5 }
 0x409   : > { %1699 = vmatmul.mubr.bf16.vlgmr.msra.gmra.mxu0 %v6430_v29  ;;  %1761 = vmatprep.mubr.bf16.mxu1 %v10303_v11  ;;  %v1973_v29 = vld [vmem:[#allocation2 + $0x3e8] sm:$0xff]  ;;  %v4983_v61 = vcombine.low %v1968_v51, %v1972_v52 }
 0x40a   : > { %1708 = vmatprep.mubr.bf16.mxu0 %v6434_v18  ;;  %2617 = vmatpush1.bf16.msra.mxu1 %v4919_v4  ;;  %v4984_v18 = vcombine.high %v1968_v51, %v1972_v52  ;;  %v4986_v4 = vcombine.high %v1969_v54, %v1973_v29  ;;  %v4985_v62 = vcombine.low %v1969_v54, %v1973_v29  ;;  %v1925_v42 = vld [vmem:[#allocation2 + $0x268] sm:$0xff] }
 0x40b   : > { %2670 = vmatpush1.bf16.msra.mxu0 %v4921_v58  ;;  %2618 = vmatprep.subr.bf16.mxu1 %v4912_v59  ;;  %v1960_v58 = vld [vmem:[#allocation2 + $0x380] sm:$0xff]  ;;  %v1917_v52 = vld [vmem:[#allocation2 + $0x228] sm:$0xff] }
 0x40c   : > { %2671 = vmatprep.subr.bf16.mxu0 %v4914_v21  ;;  %v1964_v59 = vld [vmem:[#allocation2 + $0x3a0] sm:$0xff]  ;;  %v1961_v21 = vld [vmem:[#allocation2 + $0x388] sm:$0xff] }
 0x40d   : > { %v4976_v63 = vcombine.high %v1960_v58, %v1964_v59  ;;  %v4975_v16 = vcombine.low %v1960_v58, %v1964_v59  ;;  %v4977_v55 = vcombine.low %v1961_v21, %v1965_v60  ;;  %v7542_v59 = vld [vmem:[#allocation2 + $0x1f8] sm:$0xff] }
 0x40e   : > { %2619 = vmatpush1.bf16.msra.mxu1 %v4911_v6  ;;  %v4978_v6 = vcombine.high %v1961_v21, %v1965_v60 }
 0x40f   : > { %2672 = vmatpush1.bf16.msra.mxu0 %v4913_v12  ;;  %2620 = vmatprep.subr.bf16.mxu1 %v4904_v13  ;;  %v1952_v12 = vld [vmem:[#allocation2 + $0x340] sm:$0xff] }
 0x410   : > { %4862 = vmatmul.mubr.msk.bf16.gmra.mxu1 %vm10611_vm13, %v6437_v14  ;;  %2673 = vmatprep.subr.bf16.mxu0 %v4906_v15  ;;  %v1956_v13 = vld [vmem:[#allocation2 + $0x360] sm:$0xff]  ;;  %v1953_v14 = vld [vmem:[#allocation2 + $0x348] sm:$0xff]  ;;  %vm10677_vm13 = vmmov %vm10676_vm1 }
 0x411   : > { %1709 = vmatmul.mubr.bf16.gmra.mxu0 %v6436_v22  ;;  %v1957_v15 = vld [vmem:[#allocation2 + $0x368] sm:$0xff]  ;;  %v4968_v22 = vcombine.high %v1952_v12, %v1956_v13 }
 0x412   : > { %2621 = vmatpush1.bf16.msra.mxu1 %v4903_v25  ;;  %v4970_v23 = vcombine.high %v1953_v14, %v1957_v15  ;;  %v1948_v25 = vld [vmem:[#allocation2 + $0x320] sm:$0xff]  ;;  %v4969_v26 = vcombine.low %v1953_v14, %v1957_v15 }
 0x413   : > { %2674 = vmatpush1.bf16.msra.mxu0 %v4905_v36  ;;  %2622 = vmatprep.subr.bf16.mxu1 %v4896_v17  ;;  %v1945_v36 = vld [vmem:[#allocation2 + $0x308] sm:$0xff]  ;;  %v4960_v27 = vcombine.high %v1944_v24, %v1948_v25  ;;  %v4959_v30 = vcombine.low %v1944_v24, %v1948_v25 }
 0x414   : > { %2675 = vmatprep.subr.bf16.mxu0 %v4898_v5  ;;  %v1949_v17 = vld [vmem:[#allocation2 + $0x328] sm:$0xff]  ;;  %v4967_v5 = vcombine.low %v1952_v12, %v1956_v13 }
 0x415   : > { %v4962_v28 = vcombine.high %v1945_v36, %v1949_v17 }
 0x416   : > { %2623 = vmatpush1.bf16.msra.mxu1 %v4895_v56  ;;  %v4961_v56 = vcombine.low %v1945_v36, %v1949_v17 }
 0x417   : > { %2676 = vmatpush1.bf16.msra.mxu0 %v4897_v39  ;;  %2624 = vmatprep.subr.bf16.mxu1 %v4888_v3  ;;  %v1936_v39 = vld [vmem:[#allocation2 + $0x2c0] sm:$0xff] }
 0x418   : > { %2677 = vmatprep.subr.bf16.mxu0 %v4890_v53  ;;  %v1940_v3 = vld [vmem:[#allocation2 + $0x2e0] sm:$0xff]  ;;  %v1937_v53 = vld [vmem:[#allocation2 + $0x2c8] sm:$0xff] }
 0x419   : > { %v4952_v31 = vcombine.high %v1936_v39, %v1940_v3  ;;  %v4951_v33 = vcombine.low %v1936_v39, %v1940_v3  ;;  %v4953_v34 = vcombine.low %v1937_v53, %v1941_v32 }
 0x41a   : > { %2625 = vmatpush1.bf16.msra.mxu1 %v4887_v8  ;;  %v4954_v8 = vcombine.high %v1937_v53, %v1941_v32 }
 0x41b   : > { %2678 = vmatpush1.bf16.msra.mxu0 %v4889_v35  ;;  %2626 = vmatprep.subr.bf16.mxu1 %v4880_v37  ;;  %v1928_v35 = vld [vmem:[#allocation2 + $0x280] sm:$0xff] }
 0x41c   : > { %2679 = vmatprep.subr.bf16.mxu0 %v4882_v38  ;;  %v1932_v37 = vld [vmem:[#allocation2 + $0x2a0] sm:$0xff]  ;;  %v1929_v38 = vld [vmem:[#allocation2 + $0x288] sm:$0xff] }
 0x41d   : > { %v4944_v10 = vcombine.high %v1928_v35, %v1932_v37  ;;  %v4943_v41 = vcombine.low %v1928_v35, %v1932_v37  ;;  %v4945_v2 = vcombine.low %v1929_v38, %v1933_v40 }
 0x41e   : > { %2627 = vmatpush1.bf16.msra.mxu1 %v4879_v43  ;;  %v4946_v43 = vcombine.high %v1929_v38, %v1933_v40 }
 0x41f   : > { %2680 = vmatpush1.bf16.msra.mxu0 %v4881_v44  ;;  %2628 = vmatprep.subr.bf16.mxu1 %v4872_v45  ;;  %v1920_v44 = vld [vmem:[#allocation2 + $0x240] sm:$0xff] }
 0x420   : > { %2681 = vmatprep.subr.bf16.mxu0 %v4874_v46  ;;  %v1924_v45 = vld [vmem:[#allocation2 + $0x260] sm:$0xff]  ;;  %v1921_v46 = vld [vmem:[#allocation2 + $0x248] sm:$0xff] }
 0x421   : > { %v4936_v48 = vcombine.high %v1920_v44, %v1924_v45  ;;  %v4935_v47 = vcombine.low %v1920_v44, %v1924_v45  ;;  %v4937_v1 = vcombine.low %v1921_v46, %v1925_v42 }
 0x422   : > { %2629 = vmatpush1.bf16.msra.mxu1 %v4871_v0  ;;  %v4938_v0 = vcombine.high %v1921_v46, %v1925_v42  ;;  %v1899_v42 = vld [vmem:[#allocation2 + $0x198] sm:$0xff] }
 0x423   : > { %2682 = vmatpush1.bf16.msra.mxu0 %v4873_v7  ;;  %2630 = vmatprep.subr.bf16.mxu1 %v4864_v49  ;;  %v1912_v7 = vld [vmem:[#allocation2 + $0x200] sm:$0xff] }
 0x424   : > { %2683 = vmatprep.subr.bf16.mxu0 %v4866_v50  ;;  %v1916_v49 = vld [vmem:[#allocation2 + $0x220] sm:$0xff]  ;;  %v1913_v50 = vld [vmem:[#allocation2 + $0x208] sm:$0xff] }
 0x425   : > { %v4928_v51 = vcombine.high %v1912_v7, %v1916_v49  ;;  %v4927_v54 = vcombine.low %v1912_v7, %v1916_v49  ;;  %v4929_v29 = vcombine.low %v1913_v50, %v1917_v52 }
 0x426   : > { %2631 = vmatpush1.bf16.msra.mxu1 %v4863_v9  ;;  %v4930_v9 = vcombine.high %v1913_v50, %v1917_v52 }
 0x427   : > { %2684 = vmatpush1.bf16.msra.mxu0 %v4865_v57  ;;  %2632 = vmatprep.subr.bf16.mxu1 %v4984_v18  ;;  %v7534_v57 = vld [vmem:[#allocation2 + $0x1d0] sm:$0xff] }
 0x428   : > { %2685 = vmatprep.subr.bf16.mxu0 %v4986_v4  ;;  %v7536_v18 = vld [vmem:[#allocation2 + $0x1f0] sm:$0xff]  ;;  %v7538_v4 = vld [vmem:[#allocation2 + $0x1d8] sm:$0xff] }
 0x429   : > { %v4924_v58 = vcombine.high %v7534_v57, %v7536_v18  ;;  %v4923_v21 = vcombine.low %v7534_v57, %v7536_v18  ;;  %v4925_v60 = vcombine.low %v7538_v4, %v7542_v59 }
 0x42a   : > { %2633 = vmatpush2.bf16.msra.mxu1 %v4983_v61  ;;  %v4926_v61 = vcombine.high %v7538_v4, %v7542_v59 }
 0x42b   : > { %2686 = vmatpush2.bf16.msra.mxu0 %v4985_v62  ;;  %2634 = vmatprep.subr.bf16.mxu1 %v4976_v63  ;;  %v1779_v62 = vpop.permute.xlu1 %1778  ;;  %v1784_v63 = vpop.permute.xlu0 %1783 }
 0x42c   : > { %2687 = vmatprep.subr.bf16.mxu0 %v4978_v6 }
 0x42e   : > { %2635 = vmatpush2.bf16.msra.mxu1 %v4975_v16 }
 0x42f   : > { %2688 = vmatpush2.bf16.msra.mxu0 %v4977_v55  ;;  %2636 = vmatprep.subr.bf16.mxu1 %v4968_v22  ;;  %v1811_v22 = vpop.permute.xlu1 %1810  ;;  %v1816_v24 = vpop.permute.xlu0 %1815 }
 0x430   : > { %2689 = vmatprep.subr.bf16.mxu0 %v4970_v23 }
 0x432   : > { %2637 = vmatpush2.bf16.msra.mxu1 %v4967_v5 }
 0x433   : > { %2690 = vmatpush2.bf16.msra.mxu0 %v4969_v26  ;;  %2638 = vmatprep.subr.bf16.mxu1 %v4960_v27  ;;  %v1789_v32 = vpop.permute.xlu1 %1788  ;;  %v1794_v35 = vpop.permute.xlu0 %1793 }
 0x434   : > { %2691 = vmatprep.subr.bf16.mxu0 %v4962_v28 }
 0x436   : > { %2639 = vmatpush2.bf16.msra.mxu1 %v4959_v30 }
 0x437   : > { %2692 = vmatpush2.bf16.msra.mxu0 %v4961_v56  ;;  %2640 = vmatprep.subr.bf16.mxu1 %v4952_v31  ;;  %v1821_v52 = vpop.permute.xlu1 %1820 }
 0x438   : > { %2693 = vmatprep.subr.bf16.mxu0 %v4954_v8 }
 0x43a   : > { %2641 = vmatpush2.bf16.msra.mxu1 %v4951_v33 }
 0x43b   : > { %2694 = vmatpush2.bf16.msra.mxu0 %v4953_v34  ;;  %2642 = vmatprep.subr.bf16.mxu1 %v4944_v10 }
 0x43c   : > { %2695 = vmatprep.subr.bf16.mxu0 %v4946_v43 }
 0x43e   : > { %2643 = vmatpush2.bf16.msra.mxu1 %v4943_v41 }
 0x43f   : > { %2696 = vmatpush2.bf16.msra.mxu0 %v4945_v2  ;;  %2644 = vmatprep.subr.bf16.mxu1 %v4936_v48  ;;  %v1898_v2 = vld [vmem:[#allocation2 + $0x190] sm:$0xff] }
 0x440   : > { %2697 = vmatprep.subr.bf16.mxu0 %v4938_v0  ;;  %v1902_v48 = vld [vmem:[#allocation2 + $0x1b0] sm:$0xff] }
 0x442   : > { %2645 = vmatpush2.bf16.msra.mxu1 %v4935_v47  ;;  %v1903_v47 = vld [vmem:[#allocation2 + $0x1b8] sm:$0xff] }
 0x443   : > { %2698 = vmatpush2.bf16.msra.mxu0 %v4937_v1  ;;  %2646 = vmatprep.subr.bf16.mxu1 %v4928_v51 }
 0x444   : > { %2699 = vmatprep.subr.bf16.mxu0 %v4930_v9  ;;  %v4916_v9 = vcombine.high %v1898_v2, %v1902_v48 }
 0x446   : > { %2647 = vmatpush2.bf16.msra.mxu1 %v4927_v54 }
 0x447   : > { %2700 = vmatpush2.bf16.msra.mxu0 %v4929_v29  ;;  %2722 = vmatprep.subr.bf16.mxu1 %v4924_v58  ;;  %v4918_v58 = vcombine.high %v1899_v42, %v1903_v47 }
 0x448   : > { %2775 = vmatprep.subr.bf16.mxu0 %v4926_v61  ;;  %v1890_v61 = vld [vmem:[#allocation2 + $0x150] sm:$0xff] }
 0x4c8   : > { %v1753_v6 = vpop.f32.mrf.mxu1 }
 0x4c9   : > { %v1700_v12 = vpop.f32.mrf.mxu0 }
 0x4ca   : > { %v1755_v13 = vpop.f32.mrf.mxu1  ;;  %v1754_v14 = vadd.f32 %v1753_v6, %v1700_v12  ;;  %v1894_v12 = vld [vmem:[#allocation2 + $0x170] sm:$0xff] }
 0x4cb   : > { %v1702_v15 = vpop.f32.mrf.mxu0  ;;  %v4907_v18 = vcombine.low %v1890_v61, %v1894_v12 }
 0x4cc   : > { %v1756_v16 = vadd.f32 %v1755_v13, %v1702_v15  ;;  %v1757_v55 = vpop.f32.mrf.mxu1  ;;  %v1796_v5 = vmul.f32 %v1779_v62, %v1754_v14  ;;  %v1891_v13 = vld [vmem:[#allocation2 + $0x158] sm:$0xff] }
 0x4cd   : > { %v1704_v23 = vpop.f32.mrf.mxu0  ;;  %v1895_v14 = vld [vmem:[#allocation2 + $0x178] sm:$0xff] }
 0x4ce   : > { %v1797_v25 = vmul.f32 %v1779_v62, %v1756_v16  ;;  %v1758_v36 = vadd.f32 %v1757_v55, %v1704_v23  ;;  %v1759_v17 = vpop.f32.mrf.mxu1  ;;  %v1828_v33 = vadd.f32 %v1811_v22, %v1796_v5  ;;  %v1826_v62 = vpop.permute.xlu0 %1825  ;;  %v4917_v23 = vcombine.low %v1899_v42, %v1903_v47 }
 0x4cf   : > { %v1706_v26 = vpop.f32.mrf.mxu0  ;;  %v4909_v4 = vcombine.low %v1891_v13, %v1895_v14 }
 0x4d0   : > { %v1798_v27 = vmul.f32 %v1784_v63, %v1758_v36  ;;  %v1760_v28 = vadd.f32 %v1759_v17, %v1706_v26  ;;  %v1763_v30 = vpop.f32.mrf.mxu1  ;;  %v1829_v39 = vadd.f32 %v1811_v22, %v1797_v25  ;;  %v1836_v1 = vmax.f32 %v1828_v33, 0.0  ;;  %v1882_v26 = vld [vmem:[#allocation2 + $0x110] sm:$0xff] }
 0x4d1   : > { %v1710_v56 = vpop.f32.mrf.mxu0  ;;  %v4915_v22 = vcombine.low %v1898_v2, %v1902_v48  ;;  %v4908_v25 = vcombine.high %v1890_v61, %v1894_v12  ;;  %v4910_v36 = vcombine.high %v1891_v13, %v1895_v14  ;;  %v1863_v48 = vld [vmem:[#allocation2 + $0x78] sm:$0xff]  ;;  %v1970_v61 = vld [vmem:[#allocation2 + $0x3d0] sm:$0xff] }
 0x4d2   : > { %v1830_v3 = vadd.f32 %v1816_v24, %v1798_v27  ;;  %v1799_v53 = vmul.f32 %v1784_v63, %v1760_v28  ;;  %v1765_v31 = vpop.f32.mrf.mxu1  ;;  %v1764_v34 = vadd.f32 %v1763_v30, %v1710_v56  ;;  %v1837_v43 = vmax.f32 %v1829_v39, 0.0  ;;  %v1886_v28 = vld [vmem:[#allocation2 + $0x130] sm:$0xff]  ;;  %v1883_v30 = vld [vmem:[#allocation2 + $0x118] sm:$0xff] }
 0x4d3   : > { %v1712_v8 = vpop.f32.mrf.mxu0  ;;  %v1887_v56 = vld [vmem:[#allocation2 + $0x138] sm:$0xff] }
 0x4d4   : > { %v1831_v37 = vadd.f32 %v1816_v24, %v1799_v53  ;;  %v1766_v38 = vadd.f32 %v1765_v31, %v1712_v8  ;;  %v1767_v10 = vpop.f32.mrf.mxu1  ;;  %v1838_v40 = vmax.f32 %v1830_v3, 0.0  ;;  %v1800_v0 = vmul.f32 %v1789_v32, %v1764_v34  ;;  %v1878_v3 = vld [vmem:[#allocation2 + $0xf0] sm:$0xff]  ;;  %v1875_v53 = vld [vmem:[#allocation2 + $0xd8] sm:$0xff] }
 0x4d5   : > { %v1714_v41 = vpop.f32.mrf.mxu0  ;;  %v4902_v39 = vcombine.high %v1883_v30, %v1887_v56  ;;  %v1879_v31 = vld [vmem:[#allocation2 + $0xf8] sm:$0xff]  ;;  %v4901_v33 = vcombine.low %v1883_v30, %v1887_v56 }
 0x4d6   : > { %v1839_v44 = vmax.f32 %v1831_v37, 0.0  ;;  %v1801_v45 = vmul.f32 %v1789_v32, %v1766_v38  ;;  %v1769_v46 = vpop.f32.mrf.mxu1  ;;  %v1768_v7 = vadd.f32 %v1767_v10, %v1714_v41  ;;  %v7550_v54 = vpack.c.bf16 %v1838_v40, %v1836_v1  ;;  %v1870_v37 = vld [vmem:[#allocation2 + $0xb0] sm:$0xff]  ;;  %v1867_v38 = vld [vmem:[#allocation2 + $0x98] sm:$0xff] }
 0x4d7   : > { %v1716_v49 = vpop.f32.mrf.mxu0  ;;  %v1832_v15 = vadd.f32 %v1821_v52, %v1800_v0  ;;  %v4899_v32 = vcombine.low %v1882_v26, %v1886_v28  ;;  %v4894_v8 = vcombine.high %v1875_v53, %v1879_v31  ;;  %v1871_v10 = vld [vmem:[#allocation2 + $0xb8] sm:$0xff]  ;;  %v4893_v41 = vcombine.low %v1875_v53, %v1879_v31 }
 0x4d8   : > { %v1845_v50 = vpack.c.bf16 %v1839_v44, %v1837_v43  ;;  %v1770_v51 = vadd.f32 %v1769_v46, %v1716_v49  ;;  %v1802_v29 = vmul.f32 %v1794_v35, %v1768_v7  ;;  %v1833_v63 = vadd.f32 %v1821_v52, %v1801_v45  ;;  %v1858_v44 = vld [vmem:[#allocation2 + $0x50] sm:$0xff]  ;;  %v1859_v46 = vld [vmem:[#allocation2 + $0x58] sm:$0xff] }
 0x4d9   : > { %v1840_v27 = vmax.f32 %v1832_v15, 0.0  ;;  %v4886_v43 = vcombine.high %v1867_v38, %v1871_v10  ;;  %v1862_v45 = vld [vmem:[#allocation2 + $0x70] sm:$0xff]  ;;  %v4885_v47 = vcombine.low %v1867_v38, %v1871_v10  ;;  %v4878_v0 = vcombine.high %v1859_v46, %v1863_v48 }
 0x4da   : > { %v1803_v6 = vmul.f32 %v1794_v35, %v1770_v51  ;;  %2648 = vmatprep.mubr.bf16.mxu1 %v1845_v50  ;;  %2701 = vmatprep.mubr.bf16.mxu0 %v1845_v50  ;;  %v1834_v16 = vadd.f32 %v1826_v62, %v1802_v29  ;;  %v1841_v17 = vmax.f32 %v1833_v63, 0.0  ;;  %v1866_v35 = vld [vmem:[#allocation2 + $0x90] sm:$0xff]  ;;  %v4876_v1 = vcombine.high %v1858_v44, %v1862_v45  ;;  %v1855_v51 = vld [vmem:[#allocation2 + $0x38] sm:$0xff] }
 0x4db   : > { %2649 = vmatmul.mubr.bf16.vlgmr.msra.gmra.mxu1 %v7550_v54  ;;  %2702 = vmatmul.mubr.bf16.vlgmr.msra.gmra.mxu0 %v7550_v54  ;;  %v4884_v2 = vcombine.high %v1866_v35, %v1870_v37  ;;  %v4883_v42 = vcombine.low %v1866_v35, %v1870_v37  ;;  %v1850_v7 = vld [vmem:[#allocation2 + $0x10] sm:$0xff]  ;;  %v4875_v52 = vcombine.low %v1858_v44, %v1862_v45  ;;  %v1971_v63 = vld [vmem:[#allocation2 + $0x3d8] sm:$0xff] }
 0x4dc   : > { %v1835_v55 = vadd.f32 %v1826_v62, %v1803_v6  ;;  %2723 = vmatpush1.bf16.msra.mxu1 %v4923_v21  ;;  %2776 = vmatpush1.bf16.msra.mxu0 %v4925_v60  ;;  %v1842_v24 = vmax.f32 %v1834_v16, 0.0  ;;  %v1874_v21 = vld [vmem:[#allocation2 + $0xd0] sm:$0xff]  ;;  %v4900_v60 = vcombine.high %v1882_v26, %v1886_v28  ;;  %v4877_v29 = vcombine.low %v1859_v46, %v1863_v48  ;;  %v1975_v6 = vld [vmem:[#allocation2 + $0x3f8] sm:$0xff] }
 0x4dd   : > { %2724 = vmatprep.subr.bf16.mxu1 %v4916_v9  ;;  %2777 = vmatprep.subr.bf16.mxu0 %v4918_v58  ;;  %v4892_v34 = vcombine.high %v1874_v21, %v1878_v3  ;;  %v4891_v40 = vcombine.low %v1874_v21, %v1878_v3  ;;  %v1854_v49 = vld [vmem:[#allocation2 + $0x30] sm:$0xff]  ;;  %v4990_v15 = vcombine.high %v1971_v63, %v1975_v6  ;;  %v1959_v28 = vld [vmem:[#allocation2 + $0x378] sm:$0xff] }
 0x4de   : > { %v1843_v5 = vmax.f32 %v1835_v55, 0.0  ;;  %v7562_v59 = vpack.c.bf16 %v1842_v24, %v1840_v27  ;;  %v4868_v9 = vcombine.high %v1850_v7, %v1854_v49  ;;  %v1974_v62 = vld [vmem:[#allocation2 + $0x3f0] sm:$0xff]  ;;  %v4867_v12 = vcombine.low %v1850_v7, %v1854_v49  ;;  %v1955_v27 = vld [vmem:[#allocation2 + $0x358] sm:$0xff] }
 0x4df   : > { %v4988_v14 = vcombine.high %v1970_v61, %v1974_v62  ;;  %v1962_v16 = vld [vmem:[#allocation2 + $0x390] sm:$0xff]  ;;  %v4987_v24 = vcombine.low %v1970_v61, %v1974_v62  ;;  %v1951_v3 = vld [vmem:[#allocation2 + $0x338] sm:$0xff]  ;;  %v4973_v31 = vcombine.low %v1955_v27, %v1959_v28 }
 0x4e0   : > { %v7560_v57 = vpack.c.bf16 %v1843_v5, %v1841_v17  ;;  %2725 = vmatpush1.bf16.msra.mxu1 %v4915_v22  ;;  %2778 = vmatpush1.bf16.msra.mxu0 %v4917_v23  ;;  %v1966_v55 = vld [vmem:[#allocation2 + $0x3b0] sm:$0xff]  ;;  %v1963_v22 = vld [vmem:[#allocation2 + $0x398] sm:$0xff] }
 0x4e1   : > { %2726 = vmatprep.subr.bf16.mxu1 %v4908_v25  ;;  %2779 = vmatprep.subr.bf16.mxu0 %v4910_v36  ;;  %v1967_v23 = vld [vmem:[#allocation2 + $0x3b8] sm:$0xff]  ;;  %v4989_v25 = vcombine.low %v1971_v63, %v1975_v6  ;;  %v4980_v36 = vcombine.high %v1962_v16, %v1966_v55  ;;  %v1954_v5 = vld [vmem:[#allocation2 + $0x350] sm:$0xff]  ;;  %v4979_v30 = vcombine.low %v1962_v16, %v1966_v55 }
 0x4e2   : > { %2658 = vmatprep.mubr.bf16.mxu1 %v7560_v57  ;;  %2711 = vmatprep.mubr.bf16.mxu0 %v7560_v57  ;;  %v4982_v17 = vcombine.high %v1963_v22, %v1967_v23  ;;  %v1958_v26 = vld [vmem:[#allocation2 + $0x370] sm:$0xff]  ;;  %v4981_v56 = vcombine.low %v1963_v22, %v1967_v23  ;;  %v1939_v35 = vld [vmem:[#allocation2 + $0x2d8] sm:$0xff] }
 0x4e3   : > { %2659 = vmatmul.mubr.bf16.gmra.mxu1 %v7562_v59  ;;  %2712 = vmatmul.mubr.bf16.gmra.mxu0 %v7562_v59  ;;  %v1946_v21 = vld [vmem:[#allocation2 + $0x310] sm:$0xff]  ;;  %v4971_v53 = vcombine.low %v1954_v5, %v1958_v26  ;;  %v1943_v37 = vld [vmem:[#allocation2 + $0x2f8] sm:$0xff] }
 0x4e4   : > { %2727 = vmatpush1.bf16.msra.mxu1 %v4907_v18  ;;  %2780 = vmatpush1.bf16.msra.mxu0 %v4909_v4  ;;  %v4972_v18 = vcombine.high %v1954_v5, %v1958_v26  ;;  %v4974_v4 = vcombine.high %v1955_v27, %v1959_v28  ;;  %v1931_v44 = vld [vmem:[#allocation2 + $0x298] sm:$0xff]  ;;  %v4957_v48 = vcombine.low %v1939_v35, %v1943_v37 }
 0x4e5   : > { %2754 = vmatprep.mubr.bf16.mxu1 %v1845_v50  ;;  %2807 = vmatprep.mubr.bf16.mxu0 %v1845_v50  ;;  %v1851_v50 = vld [vmem:[#allocation2 + $0x18] sm:$0xff] }
 0x4e6   : > { %2728 = vmatprep.subr.bf16.mxu1 %v4900_v60  ;;  %2781 = vmatprep.subr.bf16.mxu0 %v4902_v39  ;;  %v4870_v58 = vcombine.high %v1851_v50, %v1855_v51  ;;  %v4869_v13 = vcombine.low %v1851_v50, %v1855_v51  ;;  %v1950_v60 = vld [vmem:[#allocation2 + $0x330] sm:$0xff]  ;;  %v1947_v39 = vld [vmem:[#allocation2 + $0x318] sm:$0xff] }
 0x4e7   : > { %v4963_v38 = vcombine.low %v1946_v21, %v1950_v60  ;;  %v4965_v10 = vcombine.low %v1947_v39, %v1951_v3  ;;  %v1935_v45 = vld [vmem:[#allocation2 + $0x2b8] sm:$0xff] }
 0x4e8   : > { %2729 = vmatpush1.bf16.msra.mxu1 %v4899_v32  ;;  %2782 = vmatpush1.bf16.msra.mxu0 %v4901_v33  ;;  %v4964_v32 = vcombine.high %v1946_v21, %v1950_v60  ;;  %v4966_v33 = vcombine.high %v1947_v39, %v1951_v3  ;;  %v1923_v7 = vld [vmem:[#allocation2 + $0x258] sm:$0xff]  ;;  %v4949_v51 = vcombine.low %v1931_v44, %v1935_v45 }
 0x4e9   : > { %2730 = vmatprep.subr.bf16.mxu1 %v4892_v34  ;;  %2783 = vmatprep.subr.bf16.mxu0 %v4894_v8  ;;  %v1938_v34 = vld [vmem:[#allocation2 + $0x2d0] sm:$0xff]  ;;  %v1927_v49 = vld [vmem:[#allocation2 + $0x278] sm:$0xff] }
 0x4ea   : > { %v1942_v8 = vld [vmem:[#allocation2 + $0x2f0] sm:$0xff]  ;;  %v1915_v61 = vld [vmem:[#allocation2 + $0x218] sm:$0xff]  ;;  %v4941_v6 = vcombine.low %v1923_v7, %v1927_v49 }
 0x4eb   : > { %v4955_v46 = vcombine.low %v1938_v34, %v1942_v8  ;;  %v1919_v62 = vld [vmem:[#allocation2 + $0x238] sm:$0xff] }
 0x4ec   : > { %2731 = vmatpush1.bf16.msra.mxu1 %v4891_v40  ;;  %2784 = vmatpush1.bf16.msra.mxu0 %v4893_v41  ;;  %v4956_v40 = vcombine.high %v1938_v34, %v1942_v8  ;;  %v4958_v41 = vcombine.high %v1939_v35, %v1943_v37 }
 0x4ed   : > { %2732 = vmatprep.subr.bf16.mxu1 %v4884_v2  ;;  %2785 = vmatprep.subr.bf16.mxu0 %v4886_v43  ;;  %v1930_v2 = vld [vmem:[#allocation2 + $0x290] sm:$0xff] }
 0x4ee   : > { %v1934_v43 = vld [vmem:[#allocation2 + $0x2b0] sm:$0xff] }
 0x4ef   : > { %v4947_v50 = vcombine.low %v1930_v2, %v1934_v43 }
 0x4f0   : > { %2733 = vmatpush1.bf16.msra.mxu1 %v4883_v42  ;;  %2786 = vmatpush1.bf16.msra.mxu0 %v4885_v47  ;;  %v4948_v42 = vcombine.high %v1930_v2, %v1934_v43  ;;  %v4950_v47 = vcombine.high %v1931_v44, %v1935_v45 }
 0x4f1   : > { %2734 = vmatprep.subr.bf16.mxu1 %v4876_v1  ;;  %2787 = vmatprep.subr.bf16.mxu0 %v4878_v0  ;;  %v1922_v1 = vld [vmem:[#allocation2 + $0x250] sm:$0xff] }
 0x4f2   : > { %v1926_v0 = vld [vmem:[#allocation2 + $0x270] sm:$0xff] }
 0x4f3   : > { %v4939_v63 = vcombine.low %v1922_v1, %v1926_v0 }
 0x4f4   : > { %2735 = vmatpush1.bf16.msra.mxu1 %v4875_v52  ;;  %2788 = vmatpush1.bf16.msra.mxu0 %v4877_v29  ;;  %v4940_v52 = vcombine.high %v1922_v1, %v1926_v0  ;;  %v4942_v29 = vcombine.high %v1923_v7, %v1927_v49 }
 0x4f5   : > { %2736 = vmatprep.subr.bf16.mxu1 %v4868_v9  ;;  %2789 = vmatprep.subr.bf16.mxu0 %v4870_v58  ;;  %v1914_v9 = vld [vmem:[#allocation2 + $0x210] sm:$0xff] }
 0x4f6   : > { %v1918_v58 = vld [vmem:[#allocation2 + $0x230] sm:$0xff] }
 0x4f8   : > { %2737 = vmatpush1.bf16.msra.mxu1 %v4867_v12  ;;  %2790 = vmatpush1.bf16.msra.mxu0 %v4869_v13  ;;  %v4932_v12 = vcombine.high %v1914_v9, %v1918_v58  ;;  %v4934_v13 = vcombine.high %v1915_v61, %v1919_v62 }
 0x4f9   : > { %2738 = vmatprep.subr.bf16.mxu1 %v4988_v14  ;;  %2791 = vmatprep.subr.bf16.mxu0 %v4990_v15  ;;  %v4931_v14 = vcombine.low %v1914_v9, %v1918_v58  ;;  %v4933_v15 = vcombine.low %v1915_v61, %v1919_v62 }
 0x4fc   : > { %2739 = vmatpush2.bf16.msra.mxu1 %v4987_v24  ;;  %2792 = vmatpush2.bf16.msra.mxu0 %v4989_v25 }
 0x4fd   : > { %2740 = vmatprep.subr.bf16.mxu1 %v4980_v36  ;;  %2793 = vmatprep.subr.bf16.mxu0 %v4982_v17 }
 0x500   : > { %2741 = vmatpush2.bf16.msra.mxu1 %v4979_v30  ;;  %2794 = vmatpush2.bf16.msra.mxu0 %v4981_v56 }
 0x501   : > { %2742 = vmatprep.subr.bf16.mxu1 %v4972_v18  ;;  %2795 = vmatprep.subr.bf16.mxu0 %v4974_v4 }
 0x504   : > { %2743 = vmatpush2.bf16.msra.mxu1 %v4971_v53  ;;  %2796 = vmatpush2.bf16.msra.mxu0 %v4973_v31 }
 0x505   : > { %2744 = vmatprep.subr.bf16.mxu1 %v4964_v32  ;;  %2797 = vmatprep.subr.bf16.mxu0 %v4966_v33 }
 0x508   : > { %2745 = vmatpush2.bf16.msra.mxu1 %v4963_v38  ;;  %2798 = vmatpush2.bf16.msra.mxu0 %v4965_v10 }
 0x509   : > { %2746 = vmatprep.subr.bf16.mxu1 %v4956_v40  ;;  %2799 = vmatprep.subr.bf16.mxu0 %v4958_v41 }
 0x50c   : > { %2747 = vmatpush2.bf16.msra.mxu1 %v4955_v46  ;;  %2800 = vmatpush2.bf16.msra.mxu0 %v4957_v48 }
 0x50d   : > { %2748 = vmatprep.subr.bf16.mxu1 %v4948_v42  ;;  %2801 = vmatprep.subr.bf16.mxu0 %v4950_v47 }
 0x510   : > { %2749 = vmatpush2.bf16.msra.mxu1 %v4947_v50  ;;  %2802 = vmatpush2.bf16.msra.mxu0 %v4949_v51 }
 0x511   : > { %2750 = vmatprep.subr.bf16.mxu1 %v4940_v52  ;;  %2803 = vmatprep.subr.bf16.mxu0 %v4942_v29 }
 0x514   : > { %2751 = vmatpush2.bf16.msra.mxu1 %v4939_v63  ;;  %2804 = vmatpush2.bf16.msra.mxu0 %v4941_v6 }
 0x515   : > { %2752 = vmatprep.subr.bf16.mxu1 %v4932_v12  ;;  %2805 = vmatprep.subr.bf16.mxu0 %v4934_v13 }
 0x518   : > { %2753 = vmatpush2.bf16.msra.mxu1 %v4931_v14  ;;  %2806 = vmatpush2.bf16.msra.mxu0 %v4933_v15 }
 0x51b   : > { %2755 = vmatmul.mubr.bf16.vlgmr.msra.gmra.mxu1 %v7550_v54  ;;  %2808 = vmatmul.mubr.bf16.vlgmr.msra.gmra.mxu0 %v7550_v54 }
 0x51c   : > { %2764 = vmatprep.mubr.bf16.mxu1 %v7560_v57  ;;  %2817 = vmatprep.mubr.bf16.mxu0 %v7560_v57 }
 0x523   : > { %2765 = vmatmul.mubr.bf16.gmra.mxu1 %v7562_v59  ;;  %2818 = vmatmul.mubr.bf16.gmra.mxu0 %v7562_v59 }
 0x59b   : > { %v7574_v16 = vpop.f32.mrf.mxu1  ;;  %v7576_v55 = vpop.f32.mrf.mxu0 }
 0x59c   : > { %10612 = vst [vmem:[#allocation13_spill] sm:$0xff] %v7574_v16  ;;  %10613 = vst [vmem:[#allocation14_spill] sm:$0xff] %v7576_v55 }
 0x59d   : > { %v7578_v22 = vpop.f32.mrf.mxu1  ;;  %v7580_v23 = vpop.f32.mrf.mxu0 }
 0x59e   : > { %10614 = vst [vmem:[#allocation15_spill] sm:$0xff] %v7578_v22  ;;  %10615 = vst [vmem:[#allocation16_spill] sm:$0xff] %v7580_v23 }
 0x59f   : > { %v7582_v24 = vpop.f32.mrf.mxu1  ;;  %v7584_v25 = vpop.f32.mrf.mxu0 }
 0x5a0   : > { %10616 = vst [vmem:[#allocation17_spill] sm:$0xff] %v7582_v24  ;;  %10617 = vst [vmem:[#allocation18_spill] sm:$0xff] %v7584_v25  ;;  %v7588_v54 = vpack.i.bf16 %v7582_v24, %v7574_v16  ;;  %v7592_v57 = vpack.i.bf16 %v7584_v25, %v7576_v55 }
 0x5a1   : > { %v7594_v59 = vpop.f32.mrf.mxu1  ;;  %v7596_v36 = vpop.f32.mrf.mxu0 }
 0x5a2   : > { %10618 = vst [vmem:[#allocation19_spill] sm:$0xff] %v7594_v59  ;;  %10619 = vst [vmem:[#allocation20_spill] sm:$0xff] %v7596_v36  ;;  %5777 = vrot.lane.b32.xlu1 %v7588_v54, %s6547_s2  ;;  %5817 = vrot.lane.b32.xlu0 %v7592_v57, %s6548_s3  ;;  %v7608_v26 = vpack.i.bf16 %v7594_v59, %v7578_v22  ;;  %v7616_v30 = vpack.i.bf16 %v7596_v36, %v7580_v23 }
 0x5a3   : > { %v7602_v17 = vpop.f32.mrf.mxu1  ;;  %v7604_v5 = vpop.f32.mrf.mxu0 }
 0x5a4   : > { %10620 = vst [vmem:[#allocation21_spill] sm:$0xff] %v7602_v17  ;;  %10621 = vst [vmem:[#allocation22_spill] sm:$0xff] %v7604_v5 }
 0x5a5   : > { %v7610_v27 = vpop.f32.mrf.mxu1  ;;  %v7612_v28 = vpop.f32.mrf.mxu0 }
 0x5a6   : > { %10622 = vst [vmem:[#allocation23_spill] sm:$0xff] %v7610_v27  ;;  %10623 = vst [vmem:[#allocation24_spill] sm:$0xff] %v7612_v28  ;;  %5847 = vrot.lane.b32.xlu0 %v7608_v26, %s10556_s13  ;;  %5782 = vrot.lane.b32.xlu1 %v7592_v57, %s6547_s2 }
 0x5a7   : > { %v7622_v56 = vpop.f32.mrf.mxu1  ;;  %v7624_v18 = vpop.f32.mrf.mxu0 }
 0x5a8   : > { %10624 = vst [vmem:[#allocation25_spill] sm:$0xff] %v7622_v56  ;;  %10625 = vst [vmem:[#allocation26_spill] sm:$0xff] %v7624_v18  ;;  %v7644_v39 = vpack.i.bf16 %v7624_v18, %v7604_v5  ;;  %v7652_v53 = vpack.i.bf16 %v7622_v56, %v7602_v17 }
 0x5a9   : > { %v7630_v4 = vpop.f32.mrf.mxu1  ;;  %v7632_v21 = vpop.f32.mrf.mxu0 }
 0x5aa   : > { %5787 = vrot.lane.b32.xlu1 %v7588_v54, %s6549_s25  ;;  %5852 = vrot.lane.b32.xlu0 %v7616_v30, %s10556_s13  ;;  %10626 = vst [vmem:[#allocation27_spill] sm:$0xff] %v7630_v4  ;;  %10627 = vst [vmem:[#allocation28_spill] sm:$0xff] %v7632_v21  ;;  %v7640_v60 = vpack.i.bf16 %v7630_v4, %v7610_v27  ;;  %v7648_v3 = vpack.i.bf16 %v7632_v21, %v7612_v28 }
 0x5ae   : > { %5792 = vrot.lane.b32.xlu1 %v7592_v57, %s6549_s25  ;;  %5857 = vrot.lane.b32.xlu0 %v7608_v26, %s6550_s28 }
 0x5b2   : > { %5797 = vrot.lane.b32.xlu1 %v7588_v54, %s10556_s13  ;;  %5862 = vrot.lane.b32.xlu0 %v7616_v30, %s6550_s28 }
 0x5b6   : > { %5802 = vrot.lane.b32.xlu1 %v7592_v57, %s10556_s13  ;;  %5882 = vrot.lane.b32.xlu0 %v7652_v53, %s6547_s2 }
 0x5ba   : > { %5807 = vrot.lane.b32.xlu1 %v7588_v54, %s6550_s28  ;;  %5887 = vrot.lane.b32.xlu0 %v7644_v39, %s6547_s2 }
 0x5be   : > { %5812 = vrot.lane.b32.xlu1 %v7592_v57, %s6550_s28  ;;  %5892 = vrot.lane.b32.xlu0 %v7652_v53, %s6549_s25 }
 0x5c2   : > { %5822 = vrot.lane.b32.xlu1 %v7588_v54, %s6548_s3  ;;  %5897 = vrot.lane.b32.xlu0 %v7644_v39, %s6549_s25 }
 0x5c6   : > { %5827 = vrot.lane.b32.xlu1 %v7608_v26, %s6547_s2  ;;  %5902 = vrot.lane.b32.xlu0 %v7652_v53, %s10556_s13 }
 0x5ca   : > { %5832 = vrot.lane.b32.xlu1 %v7616_v30, %s6547_s2  ;;  %5907 = vrot.lane.b32.xlu0 %v7644_v39, %s10556_s13 }
 0x5ce   : > { %5837 = vrot.lane.b32.xlu1 %v7608_v26, %s6549_s25  ;;  %5912 = vrot.lane.b32.xlu0 %v7652_v53, %s6550_s28 }
 0x5d2   : > { %5842 = vrot.lane.b32.xlu1 %v7616_v30, %s6549_s25  ;;  %5917 = vrot.lane.b32.xlu0 %v7644_v39, %s6550_s28 }
 0x5d6   : > { %5867 = vrot.lane.b32.xlu1 %v7608_v26, %s6548_s3  ;;  %5927 = vrot.lane.b32.xlu0 %v7652_v53, %s6548_s3 }
 0x5da   : > { %5872 = vrot.lane.b32.xlu1 %v7616_v30, %s6548_s3  ;;  %5937 = vrot.lane.b32.xlu0 %v7652_v53, %s6551_s21 }
 0x5db   : > { %v7714_v10 = vpop.f32.mrf.mxu0  ;;  %v7716_v40 = vpop.f32.mrf.mxu1 }
 0x5dc   : > { %10628 = vst [vmem:[#allocation29_spill] sm:$0xff] %v7714_v10  ;;  %10629 = vst [vmem:[#allocation30_spill] sm:$0xff] %v7716_v40 }
 0x5dd   : > { %v7718_v41 = vpop.f32.mrf.mxu1  ;;  %v7720_v2 = vpop.f32.mrf.mxu0 }
 0x5de   : > { %10630 = vst [vmem:[#allocation31_spill] sm:$0xff] %v7718_v41  ;;  %10631 = vst [vmem:[#allocation32_spill] sm:$0xff] %v7720_v2  ;;  %5877 = vrot.lane.b32.xlu1 %v7608_v26, %s6551_s21  ;;  %5942 = vrot.lane.b32.xlu0 %v7640_v60, %s6547_s2 }
 0x5df   : > { %v7726_v43 = vpop.f32.mrf.mxu0  ;;  %v7728_v44 = vpop.f32.mrf.mxu1 }
 0x5e0   : > { %10632 = vst [vmem:[#allocation33_spill] sm:$0xff] %v7726_v43  ;;  %10633 = vst [vmem:[#allocation34_spill] sm:$0xff] %v7728_v44  ;;  %v7736_v48 = vpack.i.bf16 %v7728_v44, %v7716_v40  ;;  %v7752_v0 = vpack.i.bf16 %v7726_v43, %v7714_v10 }
 0x5e1   : > { %v7730_v45 = vpop.f32.mrf.mxu1  ;;  %v7732_v46 = vpop.f32.mrf.mxu0 }
 0x5e2   : > { %10634 = vst [vmem:[#allocation35_spill] sm:$0xff] %v7730_v45  ;;  %10635 = vst [vmem:[#allocation36_spill] sm:$0xff] %v7732_v46  ;;  %5922 = vrot.lane.b32.xlu1 %v7644_v39, %s6548_s3  ;;  %5947 = vrot.lane.b32.xlu0 %v7648_v3, %s6547_s2  ;;  %v7748_v1 = vpack.i.bf16 %v7730_v45, %v7718_v41  ;;  %v7766_v51 = vpack.i.bf16 %v7732_v46, %v7720_v2 }
 0x5e3   : > { %v7742_v42 = vpop.f32.mrf.mxu0  ;;  %v7744_v47 = vpop.f32.mrf.mxu1 }
 0x5e4   : > { %10636 = vst [vmem:[#allocation37_spill] sm:$0xff] %v7742_v42  ;;  %10637 = vst [vmem:[#allocation38_spill] sm:$0xff] %v7744_v47 }
 0x5e5   : > { %v7754_v7 = vpop.f32.mrf.mxu1  ;;  %v7756_v49 = vpop.f32.mrf.mxu0 }
 0x5e6   : > { %10638 = vst [vmem:[#allocation39_spill] sm:$0xff] %v7754_v7  ;;  %10639 = vst [vmem:[#allocation40_spill] sm:$0xff] %v7756_v49  ;;  %5932 = vrot.lane.b32.xlu1 %v7644_v39, %s6551_s21  ;;  %5952 = vrot.lane.b32.xlu0 %v7640_v60, %s6549_s25 }
 0x5e7   : > { %v7762_v50 = vpop.f32.mrf.mxu1  ;;  %v7768_v52 = vpop.f32.mrf.mxu0 }
 0x5e8   : > { %10640 = vst [vmem:[#allocation41_spill] sm:$0xff] %v7762_v50  ;;  %10641 = vst [vmem:[#allocation42_spill] sm:$0xff] %v7768_v52  ;;  %v7772_v29 = vpack.i.bf16 %v7762_v50, %v7744_v47  ;;  %v7780_v9 = vpack.i.bf16 %v7768_v52, %v7742_v42  ;;  %v6440_v47 = vld [vmem:[%s10268_s10 + $0x4] ss:$12 sps:$4 sm:$0xff]  }
 0x5e9   : > { %v7822_v13 = vpop.f32.mrf.mxu1  ;;  %v7832_v15 = vpop.f32.mrf.mxu0  ;;  %4220 = vmatprep.mubr.bf16.mxu0 %v6440_v47  ;;  %4134 = vmatprep.mubr.bf16.mxu1 %v6440_v47 }
 0x5ea   : > { %5962 = vrot.lane.b32.xlu1 %v7640_v60, %s10556_s13  ;;  %5957 = vrot.lane.b32.xlu0 %v7648_v3, %s6549_s25  ;;  %10642 = vst [vmem:[#allocation43_spill] sm:$0xff] %v7822_v13  ;;  %v7830_v14 = vpack.i.bf16 %v7822_v13, %v7754_v7  ;;  %10643 = vst [vmem:[#allocation44_spill] sm:$0xff] %v7832_v15  ;;  %v7840_v12 = vpack.i.bf16 %v7832_v15, %v7756_v49 }
 0x5ee   : > { %5967 = vrot.lane.b32.xlu1 %v7648_v3, %s10556_s13  ;;  %5982 = vrot.lane.b32.xlu0 %v7640_v60, %s6548_s3 }
 0x5f2   : > { %5972 = vrot.lane.b32.xlu1 %v7640_v60, %s6550_s28  ;;  %5987 = vrot.lane.b32.xlu0 %v7648_v3, %s6548_s3 }
 0x5f6   : > { %5977 = vrot.lane.b32.xlu1 %v7648_v3, %s6550_s28  ;;  %5992 = vrot.lane.b32.xlu0 %v7640_v60, %s6551_s21 }
 0x5fa   : > { %5997 = vrot.lane.b32.xlu0 %v7648_v3, %s6551_s21  ;;  %6002 = vrot.lane.b32.xlu1 %v7736_v48, %s6547_s2 }
 0x5fe   : > { %6022 = vrot.lane.b32.xlu0 %v7736_v48, %s6548_s3  ;;  %6007 = vrot.lane.b32.xlu1 %v7752_v0, %s6547_s2 }
 0x602   : > { %6012 = vrot.lane.b32.xlu1 %v7736_v48, %s6549_s25  ;;  %6057 = vrot.lane.b32.xlu0 %v7772_v29, %s6547_s2 }
 0x606   : > { %6017 = vrot.lane.b32.xlu1 %v7752_v0, %s6549_s25  ;;  %6062 = vrot.lane.b32.xlu0 %v7780_v9, %s6547_s2 }
 0x60a   : > { %6027 = vrot.lane.b32.xlu1 %v7748_v1, %s6547_s2  ;;  %6067 = vrot.lane.b32.xlu0 %v7772_v29, %s6549_s25 }
 0x60e   : > { %6032 = vrot.lane.b32.xlu1 %v7766_v51, %s6547_s2  ;;  %6082 = vrot.lane.b32.xlu0 %v7830_v14, %s6547_s2 }
 0x612   : > { %6037 = vrot.lane.b32.xlu1 %v7748_v1, %s6549_s25  ;;  %6087 = vrot.lane.b32.xlu0 %v7840_v12, %s6547_s2 }
 0x614   : > { %v7846_v6 = vpop.permute.xlu1 %5777  ;;  %v7848_v63 = vpop.permute.xlu0 %5817 }
 0x616   : > { %6042 = vrot.lane.b32.xlu1 %v7766_v51, %s10556_s13  ;;  %6092 = vrot.lane.b32.xlu0 %v7830_v14, %s6549_s25 }
 0x618   : > { %v7854_v62 = vpop.permute.xlu0 %5847  ;;  %v7856_v61 = vpop.permute.xlu1 %5782 }
 0x61a   : > { %6047 = vrot.lane.b32.xlu1 %v7766_v51, %s6550_s28  ;;  %6097 = vrot.lane.b32.xlu0 %v7840_v12, %s10556_s13 }
 0x61c   : > { %v7862_v58 = vpop.permute.xlu1 %5787  ;;  %v7864_v38 = vpop.permute.xlu0 %5852 }
 0x61d   : > { %10644 = vst [vmem:[#allocation45_spill] sm:$0xff] %v7864_v38 }
 0x61e   : > { %6052 = vrot.lane.b32.xlu1 %v7766_v51, %s6549_s25  ;;  %6102 = vrot.lane.b32.xlu0 %v7592_v57, %s6551_s21 }
 0x620   : > { %v7870_v37 = vpop.permute.xlu1 %5792  ;;  %v7872_v35 = vpop.permute.xlu0 %5857 }
 0x621   : > { %v10349_v17 = vunpack.i.h.bf16 %v7872_v35 }
 0x622   : > { %6072 = vrot.lane.b32.xlu1 %v7772_v29, %s6548_s3  ;;  %6112 = vrot.lane.b32.xlu0 %v7840_v12, %s6550_s28 }
 0x624   : > { %v7878_v8 = vpop.permute.xlu1 %5797  ;;  %v7880_v11 = vpop.permute.xlu0 %5862 }
 0x625   : > { %10645 = vst [vmem:[#allocation46_spill] sm:$0xff] %v7880_v11 }
 0x626   : > { %6077 = vrot.lane.b32.xlu1 %v7772_v29, %s6551_s21  ;;  %6117 = vrot.lane.b32.xlu0 %v7736_v48, %s6551_s21 }
 0x628   : > { %v7886_v34 = vpop.permute.xlu1 %5802  ;;  %v7888_v33 = vpop.permute.xlu0 %5882 }
 0x629   : > { %10646 = vst [vmem:[#allocation47_spill] sm:$0xff] %v7888_v33  ;;  %v5805_v23 = vunpack.i.h.bf16 %v7886_v34  ;;  %v5804_v36 = vunpack.i.l.bf16 %v7886_v34 }
 0x62a   : > { %6107 = vrot.lane.b32.xlu1 %v7616_v30, %s6551_s21  ;;  %6127 = vrot.lane.b32.xlu0 %v7840_v12, %s6549_s25 }
 0x62c   : > { %v7894_v32 = vpop.permute.xlu1 %5807  ;;  %v7896_v31 = vpop.permute.xlu0 %5887 }
 0x62e   : > { %6122 = vrot.lane.b32.xlu1 %v7588_v54, %s6551_s21  ;;  %6132 = vrot.lane.b32.xlu0 %v7640_v60, %s10502_s27 }
 0x630   : > { %v7902_v10 = vpop.permute.xlu1 %5812  ;;  %v7904_v43 = vpop.permute.xlu0 %5892 }
 0x631   : > { %v5815_v27 = vunpack.i.h.bf16 %v7902_v10  ;;  %v5814_v28 = vunpack.i.l.bf16 %v7902_v10 }
 0x632   : > { %6137 = vrot.lane.b32.xlu1 %v7644_v39, %s10502_s27  ;;  %6142 = vrot.lane.b32.xlu0 %v7648_v3, %s10502_s27 }
 0x634   : > { %v7910_v2 = vpop.permute.xlu1 %5822  ;;  %v7912_v46 = vpop.permute.xlu0 %5897 }
 0x635   : > { %10647 = vst [vmem:[#allocation48_spill] sm:$0xff] %v7910_v2  ;;  %v10684_v2 = vunpack.i.l.bf16 %v7880_v11 }
 0x636   : > { %6147 = vrot.lane.b32.xlu1 %v7772_v29, %s10502_s27  ;;  %6152 = vrot.lane.b32.xlu0 %v7652_v53, %s10502_s27 }
 0x637   : > { %v8112_v33 = vsel %vm10418_vm8, %v5814_v28, %v10684_v2 }
 0x638   : > { %v7918_v42 = vpop.permute.xlu1 %5827  ;;  %v7920_v52 = vpop.permute.xlu0 %5902 }
 0x639   : > { %v10660_v25 = vunpack.i.l.bf16 %v7920_v52 }
 0x63a   : > { %6157 = vrot.lane.b32.xlu1 %v7608_v26, %s10502_s27  ;;  %6162 = vrot.lane.b32.xlu0 %v7592_v57, %s10502_s27 }
 0x63c   : > { %v7926_v15 = vpop.permute.xlu1 %5832  ;;  %v7928_v49 = vpop.permute.xlu0 %5907 }
 0x63e   : > { %6167 = vrot.lane.b32.xlu1 %v7616_v30, %s10502_s27  ;;  %6172 = vrot.lane.b32.xlu0 %v7736_v48, %s10502_s27 }
 0x640   : > { %v7934_v40 = vpop.permute.xlu1 %5837  ;;  %v7936_v44 = vpop.permute.xlu0 %5912 }
 0x642   : > { %6177 = vrot.lane.b32.xlu1 %v7588_v54, %s10502_s27  ;;  %6182 = vrot.lane.b32.xlu0 %v7640_v60, %s6552_s26 }
 0x644   : > { %v7942_v41 = vpop.permute.xlu1 %5842  ;;  %v7944_v45 = vpop.permute.xlu0 %5917 }
 0x646   : > { %6187 = vrot.lane.b32.xlu1 %v7644_v39, %s6552_s26  ;;  %6192 = vrot.lane.b32.xlu0 %v7648_v3, %s6552_s26 }
 0x648   : > { %v7953_v50 = vpop.permute.xlu1 %5867  ;;  %v7955_v13 = vpop.permute.xlu0 %5927 }
 0x649   : > { %10648 = vst [vmem:[#allocation49_spill] sm:$0xff] %v7953_v50  ;;  %10649 = vst [vmem:[#allocation50_spill] sm:$0xff] %v7955_v13  ;;  %v10670_v50 = vunpack.i.l.bf16 %v7854_v62 }
 0x64a   : > { %6197 = vrot.lane.b32.xlu1 %v7772_v29, %s6552_s26  ;;  %6202 = vrot.lane.b32.xlu0 %v7652_v53, %s6552_s26  ;;  %v2829_v53 = vadd.s32 384, %v6764_v19 }
 0x64c   : > { %v7961_v60 = vpop.permute.xlu1 %5872  ;;  %v7963_v7 = vpop.permute.xlu0 %5937 }
 0x64d   : > { %10650 = vst [vmem:[#allocation51_spill] sm:$0xff] %v7963_v7  ;;  %v5909_v7 = vunpack.i.l.bf16 %v7928_v49 }
 0x64e   : > { %6207 = vrot.lane.b32.xlu1 %v7608_v26, %s6552_s26  ;;  %6212 = vrot.lane.b32.xlu0 %v7592_v57, %s6552_s26  ;;  %v2828_v26 = vadd.s32 256, %v6764_v19  ;;  %v10328_v57 = vand.u32 31, %v6767_v20 }
 0x650   : > { %v7969_v39 = vpop.permute.xlu1 %5877  ;;  %v7971_v3 = vpop.permute.xlu0 %5942  ;;  %v2836_v59 = vand.u32 31, %v2828_v26  ;;  %vm7998_vm15 = vcmp.ge.s32.totalorder %v10328_v57, 1  ;;  %v10658_v57 = vunpack.i.h.bf16 %v7920_v52 }
 0x651   : > { %10651 = vst [vmem:[#allocation52_spill] sm:$0xff] %v7969_v39  ;;  %vm8035_vm2 = vmpackc.low %vm7998_vm15, %vm7998_vm15 }
 0x652   : > { %6217 = vrot.lane.b32.xlu1 %v7616_v30, %s6552_s26  ;;  %6222 = vrot.lane.b32.xlu0 %v7736_v48, %s6552_s26  ;;  %v2837_v30 = vand.u32 31, %v2829_v53  ;;  %vm8009_vm11 = vcmp.ge.s32.totalorder %v2836_v59, 1  ;;  %vm8069_vm14 = vcmp.le.s32.totalorder %v2836_v59, 30 }
 0x654   : > { %v7978_v47 = vpop.permute.xlu1 %5922  ;;  %v7980_v16 = vpop.permute.xlu0 %5947  ;;  %vm8002_vm3 = vcmp.ge.s32.totalorder %v2837_v30, 1  ;;  %vm8047_vm4 = vcmp.le.s32.totalorder %v2837_v30, 30 }
 0x655   : > { %vm8090_vm15 = vmpackc.low %vm8002_vm3, %vm8002_vm3 }
 0x656   : > { %6227 = vrot.lane.b32.xlu1 %v7588_v54, %s6552_s26  ;;  %6232 = vrot.lane.b32.xlu0 %v7772_v29, %s10556_s13  ;;  %v5910_v54 = vunpack.i.h.bf16 %v7928_v49  ;;  %vm8123_vm3 = vmpackc.low %vm8009_vm11, %vm8009_vm11  ;;  %vm10395_vm11 = vcmp.lt.s32.totalorder %v6764_v19, 33 }
 0x658   : > { %v7988_v24 = vpop.permute.xlu1 %5932  ;;  %v7990_v22 = vpop.permute.xlu0 %5952 }
 0x65a   : > { %6237 = vrot.lane.b32.xlu1 %v7780_v9, %s6552_s26  ;;  %6242 = vrot.lane.b32.xlu0 %v7736_v48, %s10556_s13 }
 0x65c   : > { %v5963_v53 = vpop.permute.xlu1 %5962  ;;  %v8007_v26 = vpop.permute.xlu0 %5957 }
 0x65d   : > { %v5965_v4 = vunpack.i.h.bf16 %v5963_v53  ;;  %v5964_v55 = vunpack.i.l.bf16 %v5963_v53 }
 0x65e   : > { %6247 = vrot.lane.b32.xlu1 %v7748_v1, %s10556_s13  ;;  %6252 = vrot.lane.b32.xlu0 %v7748_v1, %s6552_s26 }
 0x65f   : > { %v3408_v53 = vsel %vm10659_vm5, %v10658_v57, %v5965_v4  ;;  %v3407_v34 = vsel %vm10661_vm10, %v10660_v25, %v5964_v55  ;;  %v3404_v10 = vsel %vm10674_vm6, %v5965_v4, %v5910_v54  ;;  %vm10681_vm5 = vmmov %vm10676_vm1 }
 0x660   : > { %v4995_v21 = vpack.c.bf16 %v3408_v53, %v3407_v34  ;;  %v8042_v57 = vpop.permute.xlu1 %5967  ;;  %v8044_v39 = vpop.permute.xlu0 %5982  ;;  %v10668_v34 = vunpack.i.h.bf16 %v7854_v62  ;;  %vm10683_vm10 = vmmov %vm10676_vm1 }
 0x661   : > { %10664 = vst [vmem:[#allocation53_spill] sm:$0xff] %v8042_v57  ;;  %10665 = vst [vmem:[#allocation54_spill] sm:$0xff] %v8044_v39  ;;  %v10344_v5 = vunpack.i.h.bf16 %v8042_v57  ;;  %v10343_v13 = vunpack.i.l.bf16 %v8042_v57  ;;  %v3401_v39 = vsel %vm10671_vm9, %v10670_v50, %v5804_v36  ;;  %v10350_v57 = vunpack.i.l.bf16 %v7872_v35 }
 0x662   : > { %v3402_v30 = vsel %vm10669_vm7, %v10668_v34, %v5805_v23  ;;  %4996 = vmatprep.subr.msk.bf16.mxu1 %vm8035_vm2, %v4995_v21  ;;  %6257 = vrot.lane.b32.xlu1 %v7752_v0, %s6552_s26  ;;  %v3403_v34 = vsel %vm10675_vm12, %v5964_v55, %v5909_v7  ;;  %v10680_v55 = vunpack.i.l.bf16 %v7864_v38  ;;  %vm10417_vm7 = vcmp.lt.s32.totalorder %v6764_v19, 32  ;;  %vm8201_vm9 = vmpackc.low %vm8047_vm4, %vm8047_vm4 }
 0x663   : > { %v3400_v50 = vsel %vm10676_vm1, %v5910_v54, %v10344_v5  ;;  %v3399_v21 = vsel %vm10677_vm13, %v5909_v7, %v10343_v13  ;;  %6267 = vrot.lane.b32.xlu0 %v7830_v14, %s6552_s26  ;;  %v10682_v54 = vunpack.i.h.bf16 %v7864_v38  ;;  %v8137_v56 = vsel %vm10418_vm8, %v10350_v57, %v5814_v28  ;;  %vm8229_vm4 = vmpackc.low %vm8069_vm14, %vm8069_vm14 }
 0x664   : > { %v3397_v4 = vsel %vm10681_vm5, %v5804_v36, %v10680_v55  ;;  %v5074_v13 = vpack.c.bf16 %v3400_v50, %v3399_v21  ;;  %v8102_v5 = vpop.permute.xlu1 %5972  ;;  %v8104_v53 = vpop.permute.xlu0 %5987  ;;  %v10685_v36 = vunpack.i.h.bf16 %v7880_v11  ;;  %v5083_v55 = vpack.c.bf16 %v3402_v30, %v3401_v39 }
 0x665   : > { %v3398_v7 = vsel %vm10683_vm10, %v5805_v23, %v10682_v54  ;;  %v5077_v54 = vpack.c.bf16 %v3404_v10, %v3403_v34  ;;  %v10351_v2 = vunpack.i.h.bf16 %v8102_v5  ;;  %v8143_v39 = vsel %vm10418_vm8, %v10349_v17, %v5815_v27  ;;  %vm10764_vm10 = vmmov %vm10681_vm5 }
 0x666   : > { %v8118_v23 = vsel %vm10418_vm8, %v5815_v27, %v10685_v36  ;;  %5075 = vmatprep.subr.msk.bf16.mxu0 %vm8090_vm15, %v5074_v13  ;;  %6262 = vrot.lane.b32.xlu1 %v7830_v14, %s10556_s13  ;;  %v10356_v13 = vunpack.i.l.bf16 %v8102_v5  ;;  %v5080_v10 = vpack.c.bf16 %v3398_v7, %v3397_v4  ;;  %v5920_v28 = vunpack.i.h.bf16 %v7944_v45 }
 0x667   : > { %6272 = vrot.lane.b32.xlu0 %v7772_v29, %s6550_s28  ;;  %v5919_v34 = vunpack.i.l.bf16 %v7944_v45  ;;  %5078 = vmatpush1.bf16.msk.msra.mxu0 %vm8123_vm3, %v5077_v54  ;;  %v5092_v17 = vpack.c.bf16 %v8118_v23, %v8112_v33  ;;  %v10355_v57 = vunpack.i.h.bf16 %v7988_v24  ;;  %v5899_v7 = vunpack.i.l.bf16 %v7912_v46 }
 0x668   : > { %v8155_v27 = vpop.permute.xlu1 %5977  ;;  %v8157_v36 = vpop.permute.xlu0 %5992  ;;  %5081 = vmatprep.subr.msk.bf16.mxu0 %vm8090_vm15, %v5080_v10  ;;  %v10358_v54 = vunpack.i.l.bf16 %v7988_v24  ;;  %v3244_v33 = vsel %vm10418_vm8, %v10351_v2, %v5920_v28  ;;  %v10697_v30 = vunpack.i.l.bf16 %v8007_v26  ;;  %v5889_v38 = vunpack.i.l.bf16 %v7896_v31 }
 0x669   : > { %10688 = vst [vmem:[#allocation55_spill] sm:$0xff] %v8155_v27  ;;  %v10353_v29 = vunpack.i.h.bf16 %v8155_v27  ;;  %v10352_v4 = vunpack.i.l.bf16 %v8155_v27  ;;  %v10354_v45 = vunpack.i.h.bf16 %v8157_v36  ;;  %v10357_v23 = vunpack.i.l.bf16 %v8157_v36 }
 0x66a   : > { %6282 = vrot.lane.b32.xlu1 %v7736_v48, %s6550_s28  ;;  %v3243_v10 = vsel %vm10418_vm8, %v10356_v13, %v5919_v34  ;;  %v10360_v13 = vunpack.i.h.bf16 %v7926_v15  ;;  %v10701_v11 = vunpack.i.h.bf16 %v7912_v46  ;;  %vm3846_vm14 = vcmp.lt.s32.totalorder %v6764_v19, 96 }
 0x66b   : > { %v3240_v21 = vsel %vm10418_vm8, %v5920_v28, %v10353_v29  ;;  %v3239_v2 = vsel %vm10418_vm8, %v5919_v34, %v10352_v4  ;;  %v8194_v48 = vsel %vm3685_vm0, %v10354_v45, %v10355_v57  ;;  %6277 = vrot.lane.b32.xlu0 %v7780_v9, %s10556_s13  ;;  %v8213_v45 = vsel %vm3685_vm0, %v10357_v23, %v10358_v54 }
 0x66c   : > { %v5086_v29 = vpack.c.bf16 %v3240_v21, %v3239_v2  ;;  %10691 = vst [vmem:[#allocation56_spill] sm:$0xff] %v8213_v45  ;;  %5084 = vmatpush1.bf16.msk.msra.mxu0 %vm8123_vm3, %v5083_v55  ;;  %v8217_v25 = vpop.permute.xlu0 %5997  ;;  %v8219_v57 = vpop.permute.xlu1 %6002  ;;  %v5844_v55 = vunpack.i.l.bf16 %v7942_v41  ;;  %v5089_v54 = vpack.c.bf16 %v3244_v33, %v3243_v10  ;;  %v5845_v2 = vunpack.i.h.bf16 %v7942_v41 }
 0x66d   : > { %v10359_v34 = vunpack.i.h.bf16 %v8219_v57  ;;  %v10361_v4 = vunpack.i.l.bf16 %v8219_v57  ;;  %v10695_v33 = vunpack.i.l.bf16 %v7926_v15  ;;  %v10699_v21 = vunpack.i.h.bf16 %v7912_v46 }
 0x66e   : > { %5087 = vmatprep.subr.msk.bf16.mxu0 %vm8201_vm9, %v5086_v29  ;;  %6292 = vrot.lane.b32.xlu1 %v7830_v14, %s6550_s28  ;;  %v5095_v45 = vpack.c.bf16 %v8143_v39, %v8137_v56  ;;  %vm2939_vm1 = vcmp.ge.s32.totalorder %v6764_v19, 32 }
 0x66f   : > { %6287 = vrot.lane.b32.xlu0 %v7748_v1, %s6550_s28  ;;  %v8252_v29 = vsel %vm10395_vm11, %v10360_v13, %v10359_v34  ;;  %v8260_v41 = vsel %vm10395_vm11, %v10695_v33, %v10361_v4  ;;  %v3094_v34 = vsel %vm10417_vm7, %v5899_v7, %v10697_v30  ;;  %v10698_v13 = vunpack.i.h.bf16 %v8007_v26 }
 0x670   : > { %10694 = vst [vmem:[#allocation57_spill] sm:$0xff] %v8252_v29  ;;  %10696 = vst [vmem:[#allocation58_spill] sm:$0xff] %v8260_v41  ;;  %5090 = vmatpush1.bf16.msk.msra.mxu0 %vm8229_vm4, %v5089_v54  ;;  %v8264_v10 = vpop.permute.xlu0 %6022  ;;  %v8266_v49 = vpop.permute.xlu1 %6007  ;;  %v5795_v54 = vunpack.i.h.bf16 %v7870_v37  ;;  %v5890_v30 = vunpack.i.h.bf16 %v7896_v31  ;;  %v10703_v31 = vunpack.i.l.bf16 %v7990_v22  ;;  %v10705_v41 = vunpack.i.l.bf16 %v7870_v37 }
 0x671   : > { %v3095_v33 = vsel %vm10417_vm7, %v10699_v21, %v10698_v13  ;;  %5093 = vmatprep.subr.msk.bf16.mxu0 %vm8201_vm9, %v5092_v17  ;;  %v10700_v13 = vunpack.i.l.bf16 %v7870_v37  ;;  %v10702_v17 = vunpack.i.h.bf16 %v7990_v22 }
 0x672   : > { %6297 = vrot.lane.b32.xlu1 %v7752_v0, %s10556_s13  ;;  %v3098_v56 = vsel %vm10417_vm7, %v10703_v31, %v5899_v7  ;;  %v3151_v39 = vpack.c.bf16 %v3095_v33, %v3094_v34  ;;  %v3093_v4 = vsel %vm10417_vm7, %v5795_v54, %v5845_v2  ;;  %v5950_v7 = vunpack.i.h.bf16 %v7980_v16 }
 0x673   : > { %v3092_v21 = vsel %vm10417_vm7, %v10700_v13, %v5844_v55  ;;  %v3099_v27 = vsel %vm10417_vm7, %v10702_v17, %v10701_v11  ;;  %6302 = vrot.lane.b32.xlu0 %v7780_v9, %s6550_s28  ;;  %v10704_v13 = vunpack.i.h.bf16 %v7934_v40  ;;  %v10706_v11 = vunpack.i.l.bf16 %v7934_v40 }
 0x674   : > { %v5949_v31 = vunpack.i.l.bf16 %v7980_v16  ;;  %5096 = vmatpush1.bf16.msk.msra.mxu0 %vm8229_vm4, %v5095_v45  ;;  %v8323_v34 = vpop.permute.xlu1 %6012  ;;  %v8325_v33 = vpop.permute.xlu0 %6057  ;;  %v3150_v29 = vpack.c.bf16 %v3099_v27, %v3098_v56  ;;  %v3143_v45 = vpack.c.bf16 %v3093_v4, %v3092_v21  ;;  %v10715_v16 = vunpack.i.h.bf16 %v7971_v3 }
 0x675   : > { %v3097_v46 = vsel %vm10417_vm7, %v10704_v13, %v5795_v54  ;;  %v3096_v17 = vsel %vm10417_vm7, %v10706_v11, %v10705_v41  ;;  %4196 = vmatprep.subr.bf16.mxu0 %v3151_v39  ;;  %v10371_v54 = vunpack.i.h.bf16 %v8323_v34  ;;  %v10372_v37 = vunpack.i.l.bf16 %v8323_v34 }
 0x676   : > { %v10373_v13 = vunpack.i.h.bf16 %v8325_v33  ;;  %6307 = vrot.lane.b32.xlu1 %v7752_v0, %s6550_s28  ;;  %v10710_v4 = vunpack.i.l.bf16 %v8325_v33  ;;  %v5784_v11 = vunpack.i.l.bf16 %v7856_v61  ;;  %v10716_v56 = vunpack.i.l.bf16 %v7971_v3 }
 0x677   : > { %v8339_v39 = vsel %vm10417_vm7, %v5845_v2, %v10371_v54  ;;  %v8345_v41 = vsel %vm10417_vm7, %v5844_v55, %v10372_v37  ;;  %6312 = vrot.lane.b32.xlu0 %v7780_v9, %s6549_s25  ;;  %v2926_v2 = vsel %vm10395_vm11, %v5890_v30, %v5950_v7  ;;  %v2925_v55 = vsel %vm10395_vm11, %v5889_v38, %v5949_v31 }
 0x678   : > { %10707 = vst [vmem:[#allocation59_spill] sm:$0xff] %v8339_v39  ;;  %10708 = vst [vmem:[#allocation60_spill] sm:$0xff] %v8345_v41  ;;  %v8351_v27 = vsel %vm10395_vm11, %v5950_v7, %v10373_v13  ;;  %v8357_v21 = vsel %vm10395_vm11, %v5949_v31, %v10710_v4  ;;  %4197 = vmatpush1.bf16.msra.mxu0 %v3150_v29  ;;  %v8369_v37 = vpop.permute.xlu1 %6017  ;;  %v8371_v4 = vpop.permute.xlu0 %6062  ;;  %v10712_v54 = vunpack.i.h.bf16 %v7926_v15  ;;  %v10713_v29 = vunpack.i.h.bf16 %v7856_v61 }
 0x679   : > { %10709 = vst [vmem:[#allocation61_spill] sm:$0xff] %v8351_v27  ;;  %10711 = vst [vmem:[#allocation62_spill] sm:$0xff] %v8357_v21  ;;  %4198 = vmatprep.subr.bf16.mxu0 %v3143_v45  ;;  %v3142_v13 = vpack.c.bf16 %v3097_v46, %v3096_v17  ;;  %v10714_v7 = vunpack.i.l.bf16 %v7926_v15  ;;  %v2930_v31 = vsel %vm10395_vm11, %v10715_v16, %v5890_v30  ;;  %v6010_v17 = vunpack.i.h.bf16 %v8266_v49 }
 0x67a   : > { %v2924_v21 = vsel %vm10395_vm11, %v10713_v29, %v10712_v54  ;;  %6322 = vrot.lane.b32.xlu1 %v7748_v1, %s6548_s3  ;;  %v2929_v27 = vsel %vm10395_vm11, %v10716_v56, %v5889_v38  ;;  %v5098_v54 = vpack.c.bf16 %v2926_v2, %v2925_v55  ;;  %v10717_v55 = vunpack.i.l.bf16 %v7918_v42 }
 0x67b   : > { %v2923_v45 = vsel %vm10395_vm11, %v5784_v11, %v10714_v7  ;;  %6317 = vrot.lane.b32.xlu0 %v7780_v9, %s6548_s3  ;;  %v6009_v7 = vunpack.i.l.bf16 %v8266_v49  ;;  %v10718_v49 = vunpack.i.h.bf16 %v7856_v61  ;;  %v5101_v41 = vpack.c.bf16 %v2930_v31, %v2929_v27 }
 0x67c   : > { %4199 = vmatpush1.bf16.msra.mxu0 %v3142_v13  ;;  %v6028_v29 = vpop.permute.xlu1 %6027  ;;  %v8405_v30 = vpop.permute.xlu0 %6067  ;;  %v2927_v15 = vsel %vm10395_vm11, %v10717_v55, %v5784_v11  ;;  %v10719_v13 = vunpack.i.h.bf16 %v7918_v42  ;;  %v10721_v2 = vunpack.i.h.bf16 %v8219_v57  ;;  %v10724_v27 = vunpack.i.l.bf16 %v8219_v57 }
 0x67d   : > { %5099 = vmatprep.subr.msk.bf16.mxu0 %vm8090_vm15, %v5098_v54  ;;  %v6030_v38 = vunpack.i.h.bf16 %v6028_v29  ;;  %v6029_v16 = vunpack.i.l.bf16 %v6028_v29  ;;  %v10377_v56 = vunpack.i.h.bf16 %v8405_v30  ;;  %v5104_v54 = vpack.c.bf16 %v2924_v21, %v2923_v45 }
 0x67e   : > { %v2928_v46 = vsel %vm10395_vm11, %v10719_v13, %v10718_v49  ;;  %6342 = vrot.lane.b32.xlu1 %v7752_v0, %s6551_s21  ;;  %v6065_v21 = vunpack.i.h.bf16 %v8371_v4  ;;  %v5914_v39 = vunpack.i.l.bf16 %v7936_v44 }
 0x67f   : > { %v8425_v29 = vsel %vm10395_vm11, %v6030_v38, %v6010_v17  ;;  %v8431_v11 = vsel %vm10395_vm11, %v10721_v2, %v6030_v38  ;;  %v8435_v61 = vsel %vm10395_vm11, %v6029_v16, %v6009_v7  ;;  %v8441_v31 = vsel %vm10395_vm11, %v10724_v27, %v6029_v16  ;;  %6327 = vrot.lane.b32.xlu0 %v7752_v0, %s6548_s3 }
 0x680   : > { %10720 = vst [vmem:[#allocation63_spill] sm:$0xff] %v8425_v29  ;;  %10722 = vst [vmem:[#allocation64_spill] sm:$0xff] %v8431_v11  ;;  %v10726_v38 = vunpack.i.h.bf16 %v8007_v26  ;;  %v10728_v16 = vunpack.i.l.bf16 %v8405_v30  ;;  %v10729_v2 = vunpack.i.l.bf16 %v8007_v26  ;;  %5102 = vmatpush1.bf16.msk.msra.mxu0 %vm8123_vm3, %v5101_v41  ;;  %v8467_v49 = vpop.permute.xlu1 %6032  ;;  %v6083_v13 = vpop.permute.xlu0 %6082  ;;  %v6064_v27 = vunpack.i.l.bf16 %v8371_v4 }
 0x681   : > { %10723 = vst [vmem:[#allocation65_spill] sm:$0xff] %v8435_v61  ;;  %10725 = vst [vmem:[#allocation66_spill] sm:$0xff] %v8441_v31  ;;  %5105 = vmatprep.subr.msk.bf16.mxu0 %vm8090_vm15, %v5104_v54  ;;  %v10379_v26 = vunpack.i.l.bf16 %v8467_v49  ;;  %v6085_v45 = vunpack.i.h.bf16 %v6083_v13  ;;  %v6084_v41 = vunpack.i.l.bf16 %v6083_v13  ;;  %v10737_v4 = vunpack.i.l.bf16 %v8325_v33 }
 0x682   : > { %v8455_v57 = vsel %vm10417_vm7, %v10726_v38, %v10377_v56  ;;  %v8463_v55 = vsel %vm10417_vm7, %v10729_v2, %v10728_v16  ;;  %v10378_v38 = vunpack.i.h.bf16 %v8467_v49  ;;  %v5107_v2 = vpack.c.bf16 %v2928_v46, %v2927_v15  ;;  %6362 = vrot.lane.b32.xlu1 %v7830_v14, %s6548_s3 }
 0x683   : > { %10727 = vst [vmem:[#allocation67_spill] sm:$0xff] %v8455_v57  ;;  %10730 = vst [vmem:[#allocation68_spill] sm:$0xff] %v8463_v55  ;;  %v8491_v46 = vsel %vm10395_vm11, %v6009_v7, %v10379_v26  ;;  %6332 = vrot.lane.b32.xlu0 %v7780_v9, %s6551_s21  ;;  %v8500_v13 = vsel %vm10395_vm11, %v6085_v45, %v6065_v21  ;;  %v8514_v16 = vsel %vm10395_vm11, %v6084_v41, %v6064_v27 }
 0x684   : > { %v8485_v54 = vsel %vm10395_vm11, %v6010_v17, %v10378_v38  ;;  %10732 = vst [vmem:[#allocation70_spill] sm:$0xff] %v8491_v46  ;;  %10733 = vst [vmem:[#allocation71_spill] sm:$0xff] %v8500_v13  ;;  %v10734_v17 = vunpack.i.h.bf16 %v8325_v33  ;;  %5108 = vmatpush1.bf16.msk.msra.mxu0 %vm8123_vm3, %v5107_v2  ;;  %v6038_v7 = vpop.permute.xlu1 %6037  ;;  %v8510_v26 = vpop.permute.xlu0 %6087  ;;  %v8520_v15 = vsel %vm10395_vm11, %v10737_v4, %v6084_v41  ;;  %v10739_v33 = vunpack.i.h.bf16 %v8369_v37 }
 0x685   : > { %10731 = vst [vmem:[#allocation69_spill] sm:$0xff] %v8485_v54  ;;  %10736 = vst [vmem:[#allocation73_spill] sm:$0xff] %v8514_v16  ;;  %v6040_v56 = vunpack.i.h.bf16 %v6038_v7  ;;  %v6039_v61 = vunpack.i.l.bf16 %v6038_v7  ;;  %v10741_v4 = vunpack.i.l.bf16 %v8369_v37  ;;  %v10743_v2 = vunpack.i.l.bf16 %v8323_v34 }
 0x686   : > { %v8506_v38 = vsel %vm10395_vm11, %v10734_v17, %v6085_v45  ;;  %10738 = vst [vmem:[#allocation74_spill] sm:$0xff] %v8520_v15  ;;  %6367 = vrot.lane.b32.xlu1 %v7830_v14, %s6551_s21  ;;  %v10745_v29 = vunpack.i.h.bf16 %v8323_v34  ;;  %v10747_v46 = vunpack.i.h.bf16 %v8510_v26  ;;  %v10760_v16 = vunpack.i.h.bf16 %v7854_v62 }
 0x687   : > { %10735 = vst [vmem:[#allocation72_spill] sm:$0xff] %v8506_v38  ;;  %v8534_v41 = vsel %vm10417_vm7, %v6040_v56, %v10739_v33  ;;  %v8540_v7 = vsel %vm10417_vm7, %v6039_v61, %v10741_v4  ;;  %6337 = vrot.lane.b32.xlu0 %v7748_v1, %s6551_s21  ;;  %v8548_v45 = vsel %vm10417_vm7, %v10743_v2, %v6039_v61  ;;  %v10749_v61 = vunpack.i.l.bf16 %v8510_v26 }
 0x688   : > { %10740 = vst [vmem:[#allocation75_spill] sm:$0xff] %v8534_v41  ;;  %10742 = vst [vmem:[#allocation76_spill] sm:$0xff] %v8540_v7  ;;  %v8554_v33 = vsel %vm10417_vm7, %v10745_v29, %v6040_v56  ;;  %v8563_v54 = vsel %vm10395_vm11, %v6065_v21, %v10747_v46  ;;  %v8571_v2 = vpop.permute.xlu1 %6042  ;;  %v8573_v56 = vpop.permute.xlu0 %6092  ;;  %v10752_v4 = vand.u32 31, %v6764_v19  ;;  %v10755_v46 = vand.u32 31, %v6767_v20  ;;  %v10841_v21 = vld [vmem:[#allocation48_spill] sm:$0xff] }
 0x689   : > { %10744 = vst [vmem:[#allocation77_spill] sm:$0xff] %v8548_v45  ;;  %10746 = vst [vmem:[#allocation78_spill] sm:$0xff] %v8554_v33  ;;  %v8569_v34 = vsel %vm10395_vm11, %v6064_v27, %v10749_v61  ;;  %v10761_v61 = vunpack.i.h.bf16 %v7878_v8  ;;  %v10762_v13 = vunpack.i.l.bf16 %v7854_v62  ;;  %v10766_v20 = vunpack.i.l.bf16 %v7894_v32 }
 0x68a   : > { %10748 = vst [vmem:[#allocation79_spill] sm:$0xff] %v8563_v54  ;;  %10750 = vst [vmem:[#allocation80_spill] sm:$0xff] %v8569_v34  ;;  %vm8580_vm6 = vcmp.ge.s32.totalorder %v10752_v4, 1  ;;  %vm8586_vm12 = vcmp.le.s32.totalorder %v10755_v46, 30  ;;  %6372 = vrot.lane.b32.xlu1 %v7840_v12, %s6548_s3  ;;  %vm8597_vm13 = vcmp.le.s32.totalorder %v10752_v4, 30  ;;  %v10763_v34 = vunpack.i.l.bf16 %v7878_v8 }
 0x68b   : > { %10751 = vst [vmem:[#allocation81_spill] sm:$0xff] %v8573_v56  ;;  %v3406_v17 = vsel %vm10681_vm5, %v10761_v61, %v10760_v16  ;;  %v10765_v54 = vunpack.i.l.bf16 %v7872_v35  ;;  %6347 = vrot.lane.b32.xlu0 %v7766_v51, %s6548_s3  ;;  %v10767_v16 = vunpack.i.h.bf16 %v7872_v35  ;;  %v10768_v62 = vunpack.i.h.bf16 %v7894_v32  ;;  %vm8683_vm11 = vmpackc.low %vm8580_vm6, %vm8580_vm6 }
 0x68c   : > { %v3405_v4 = vsel %vm10764_vm10, %v10763_v34, %v10762_v13  ;;  %v5915_v13 = vunpack.i.h.bf16 %v7936_v44  ;;  %v8635_v34 = vpop.permute.xlu1 %6047  ;;  %v8637_v7 = vpop.permute.xlu0 %6097  ;;  %v10771_v35 = vunpack.i.h.bf16 %v8573_v56  ;;  %v10772_v31 = vunpack.i.h.bf16 %v8405_v30  ;;  %vm10775_vm10 = vmmov %vm10681_vm5 }
 0x68d   : > { %v8622_v46 = vsel %vm10418_vm8, %v10766_v20, %v10765_v54  ;;  %v8632_v61 = vsel %vm10418_vm8, %v10768_v62, %v10767_v16  ;;  %v10769_v54 = vunpack.i.l.bf16 %v8573_v56  ;;  %v10770_v20 = vunpack.i.l.bf16 %v8405_v30 }
 0x68e   : > { %v8653_v16 = vsel %vm10417_vm7, %v10772_v31, %v10771_v35  ;;  %v10396_v15 = vunpack.i.h.bf16 %v8637_v7  ;;  %v10397_v38 = vunpack.i.l.bf16 %v8637_v7  ;;  %6377 = vrot.lane.b32.xlu1 %v7830_v14, %s10502_s27  ;;  %v10773_v31 = vunpack.i.h.bf16 %v7920_v52 }
 0x68f   : > { %v8645_v41 = vsel %vm10417_vm7, %v10770_v20, %v10769_v54  ;;  %v10774_v11 = vunpack.i.l.bf16 %v7920_v52  ;;  %6352 = vrot.lane.b32.xlu0 %v7780_v9, %s10502_s27  ;;  %v5001_v30 = vpack.c.bf16 %v3406_v17, %v3405_v4  ;;  %v10779_v9 = vunpack.i.l.bf16 %v8102_v5 }
 0x690   : > { %v3412_v35 = vsel %vm10681_vm5, %v10396_v15, %v10773_v31  ;;  %v10778_v15 = vunpack.i.h.bf16 %v8102_v5  ;;  %v8698_v54 = vpop.permute.xlu1 %6052  ;;  %v8700_v62 = vpop.permute.xlu0 %6102  ;;  %v10780_v17 = vunpack.i.h.bf16 %v7878_v8  ;;  %v10781_v4 = vunpack.i.h.bf16 %v8571_v2 }
 0x691   : > { %v3411_v44 = vsel %vm10775_vm10, %v10397_v38, %v10774_v11  ;;  %v3247_v38 = vsel %vm10418_vm8, %v5914_v39, %v10779_v9  ;;  %v10782_v31 = vunpack.i.l.bf16 %v7878_v8  ;;  %vm10784_vm10 = vmmov %vm10681_vm5  ;;  %v10785_v56 = vunpack.i.h.bf16 %v7961_v60 }
 0x692   : > { %v3248_v11 = vsel %vm10418_vm8, %v5915_v13, %v10778_v15  ;;  %v4998_v20 = vpack.c.bf16 %v3412_v35, %v3411_v44  ;;  %v3410_v52 = vsel %vm10681_vm5, %v10781_v4, %v10780_v17  ;;  %v10783_v15 = vunpack.i.l.bf16 %v8571_v2  ;;  %6382 = vrot.lane.b32.xlu1 %v7840_v12, %s6551_s21  ;;  %vm8753_vm5 = vmpackc.low %vm8586_vm12, %vm8586_vm12 }
 0x693   : > { %v10404_v44 = vunpack.i.l.bf16 %v8698_v54  ;;  %v10786_v45 = vunpack.i.h.bf16 %v7848_v63  ;;  %v10787_v8 = vunpack.i.l.bf16 %v7961_v60  ;;  %v10788_v4 = vunpack.i.l.bf16 %v7848_v63  ;;  %6357 = vrot.lane.b32.xlu0 %v7748_v1, %s10502_s27 }
 0x694   : > { %v3409_v5 = vsel %vm10784_vm10, %v10783_v15, %v10782_v31  ;;  %4999 = vmatpush1.bf16.msk.msra.mxu1 %vm8683_vm11, %v4998_v20  ;;  %v10789_v15 = vunpack.i.l.bf16 %v7934_v40  ;;  %v10790_v9 = vunpack.i.l.bf16 %v7862_v58  ;;  %v5990_v35 = vunpack.i.h.bf16 %v8104_v53  ;;  %vm8768_vm10 = vmand %vm2939_vm1, %vm8597_vm13 }
 0x695   : > { %v8723_v17 = vsel %vm3846_vm14, %v10786_v45, %v10785_v56  ;;  %v8731_v31 = vsel %vm3846_vm14, %v10788_v4, %v10787_v8  ;;  %v5007_v56 = vpack.c.bf16 %v3248_v11, %v3247_v38  ;;  %v5989_v8 = vunpack.i.l.bf16 %v8104_v53  ;;  %5002 = vmatprep.subr.msk.bf16.mxu1 %vm8035_vm2, %v5001_v30  ;;  %v8760_v38 = vpop.permute.xlu1 %6072  ;;  %v8762_v53 = vpop.permute.xlu0 %6112  ;;  %vm5009_vm12 = vmpackc.low %vm8768_vm10, %vm8768_vm10 }
 0x696   : > { %v8743_v45 = vsel %vm10417_vm7, %v10790_v9, %v10789_v15  ;;  %v5004_v15 = vpack.c.bf16 %v3410_v52, %v3409_v5  ;;  %10793 = vst [vmem:[#allocation82_spill] sm:$0xff] %v8760_v38  ;;  %v10796_v27 = vunpack.i.l.bf16 %v8369_v37  ;;  %v10798_v30 = vunpack.i.h.bf16 %v8698_v54  ;;  %6387 = vrot.lane.b32.xlu1 %v7752_v0, %s10502_s27  ;;  %vm8964_vm10 = vmpackc.low %vm2939_vm1, %vm2939_vm1 }
 0x697   : > { %v10799_v11 = vunpack.i.h.bf16 %v8369_v37  ;;  %v10410_v4 = vunpack.i.h.bf16 %v8760_v38  ;;  %v10405_v9 = vunpack.i.l.bf16 %v8760_v38  ;;  %v10406_v33 = vunpack.i.h.bf16 %v8762_v53  ;;  %6392 = vrot.lane.b32.xlu0 %v7766_v51, %s6551_s21 }
 0x698   : > { %v8778_v52 = vsel %vm10417_vm7, %v10796_v27, %v10404_v44  ;;  %v10407_v55 = vunpack.i.l.bf16 %v8762_v53  ;;  %v10408_v57 = vunpack.i.h.bf16 %v7978_v47  ;;  %v10409_v27 = vunpack.i.l.bf16 %v7978_v47  ;;  %5005 = vmatpush1.bf16.msk.msra.mxu1 %vm8683_vm11, %v5004_v15 }
 0x699   : > { %10797 = vst [vmem:[#allocation83_spill] sm:$0xff] %v8778_v52  ;;  %v8786_v5 = vsel %vm10417_vm7, %v10799_v11, %v10798_v30  ;;  %v3252_v11 = vsel %vm10418_vm8, %v10406_v33, %v5915_v13  ;;  %5008 = vmatprep.subr.msk.bf16.mxu1 %vm8753_vm5, %v5007_v56  ;;  %v3861_v0 = vsel %vm3846_vm14, %v5989_v8, %v10405_v9  ;;  %v8829_v15 = vpop.permute.xlu1 %6077  ;;  %v8831_v37 = vpop.permute.xlu0 %6117  ;;  %v10803_v30 = vunpack.i.l.bf16 %v7961_v60 }
 0x69a   : > { %10800 = vst [vmem:[#allocation84_spill] sm:$0xff] %v8786_v5  ;;  %v3251_v44 = vsel %vm10418_vm8, %v10407_v55, %v5914_v39  ;;  %v3866_v39 = vsel %vm3846_vm14, %v10408_v57, %v5990_v35  ;;  %v3865_v13 = vsel %vm3846_vm14, %v10409_v27, %v5989_v8  ;;  %10801 = vst [vmem:[#allocation85_spill] sm:$0xff] %v8829_v15  ;;  %v10802_v57 = vunpack.i.l.bf16 %v8264_v10 }
 0x69b   : > { %v5010_v56 = vpack.c.bf16 %v3252_v11, %v3251_v44  ;;  %v3862_v9 = vsel %vm3846_vm14, %v5990_v35, %v10410_v4  ;;  %v10804_v8 = vunpack.i.h.bf16 %v8264_v10  ;;  %v10805_v11 = vunpack.i.h.bf16 %v7961_v60  ;;  %6397 = vrot.lane.b32.xlu1 %v7840_v12, %s10502_s27  ;;  %6402 = vrot.lane.b32.xlu0 %v7766_v51, %s10502_s27  ;;  %s5304_s27 = sshll.u32 %s6652_s17, 11 }
 0x69c   : > { %v3859_v44 = vsel %vm3846_vm14, %v10803_v30, %v10802_v57  ;;  %v6000_v35 = vunpack.i.h.bf16 %v8217_v25  ;;  %v5999_v4 = vunpack.i.l.bf16 %v8217_v25  ;;  %v3922_v33 = vpack.c.bf16 %v3862_v9, %v3861_v0  ;;  %s10210_s19 = scalar_lea.hbm %s10272_s14, %s5304_s27 }
 0x69d   : > { %v3860_v27 = vsel %vm3846_vm14, %v10805_v11, %v10804_v8  ;;  %5011 = vmatpush1.bf16.msk.msra.mxu1 %vm5009_vm12, %v5010_v56  ;;  %v10806_v57 = vunpack.i.l.bf16 %v7990_v22  ;;  %v10807_v60 = vunpack.i.l.bf16 %v7904_v43  ;;  %v5790_v8 = vunpack.i.h.bf16 %v7862_v58 }
 0x69e   : > { %v3921_v25 = vpack.c.bf16 %v3866_v39, %v3865_v13  ;;  %v10808_v9 = vunpack.i.h.bf16 %v7894_v32  ;;  %v10809_v0 = vunpack.i.h.bf16 %v8635_v34  ;;  %v10810_v55 = vunpack.i.l.bf16 %v7894_v32  ;;  %4204 = vmatprep.subr.bf16.mxu0 %v3922_v33 }
 0x69f   : > { %v3102_v30 = vsel %vm10417_vm7, %v10807_v60, %v10806_v57  ;;  %v10811_v56 = vunpack.i.l.bf16 %v8635_v34  ;;  %v10812_v39 = vpack.c.bf16 %v8632_v61, %v8622_v46  ;;  %v10813_v13 = vunpack.i.h.bf16 %v8829_v15  ;;  %6407 = vrot.lane.b32.xlu1 %v7840_v12, %s6552_s26  ;;  %6412 = vrot.lane.b32.xlu0 %v7766_v51, %s6552_s26  ;;  %s473_s26 = sand.u32 1, %s6525_s30  }
 0x6a0   : > { %v3250_v11 = vsel %vm10418_vm8, %v10809_v0, %v10808_v9  ;;  %v10814_v32 = vunpack.i.l.bf16 %v8829_v15  ;;  %v3914_v9 = vpack.c.bf16 %v3860_v27, %v3859_v44  ;;  %v8894_v0 = vpop.permute.xlu0 %6127  ;;  %v10815_v46 = vunpack.i.h.bf16 %v7990_v22  ;;  %4205 = vmatpush2.bf16.msra.mxu0 %v3921_v25  ;;  %s4628_s24 = sshll.u32 %s473_s26, 7  ;;  %s10218_s17 = scalar_lea.sflag [#allocation4], %s473_s26 }
 0x6a1   : > { %v3249_v38 = vsel %vm10418_vm8, %v10811_v56, %v10810_v55  ;;  %5014 = vmatprep.subr.msk.bf16.mxu1 %vm8753_vm5, %v10812_v39  ;;  %v3701_v57 = vsel %vm3685_vm0, %v6000_v35, %v10813_v13  ;;  %v6108_v55 = vpop.permute.xlu1 %6107  ;;  %v10816_v61 = vunpack.i.h.bf16 %v7904_v43  ;;  %v10441_v15 = vunpack.i.h.bf16 %v8894_v0  ;;  %s10162_s29 = scalar_lea.vmem [#allocation5], %s4628_s24 }
 0x6a2   : > { %v3700_v60 = vsel %vm3685_vm0, %v5999_v4, %v10814_v32  ;;  %v6110_v39 = vunpack.i.h.bf16 %v6108_v55  ;;  %v6109_v13 = vunpack.i.l.bf16 %v6108_v55  ;;  %v10442_v52 = vunpack.i.l.bf16 %v8894_v0  ;;  %v10817_v32 = vld [vmem:[#allocation47_spill] sm:$0xff]  ;;  %4206 = vmatprep.subr.bf16.mxu0 %v3914_v9  ;;  %s4548_s13 = sshll.u32 %s10162_s29, 4  ;;  %s10212_s13 = int_to_ptr.vmem [resolvable:$true] %s4548_s13 }
 0x6a3   : > { %v3103_v56 = vsel %vm10417_vm7, %v10816_v61, %v10815_v46  ;;  %v5885_v33 = vunpack.i.h.bf16 %v10817_v32  ;;  %v5016_v5 = vpack.c.bf16 %v3250_v11, %v3249_v38  ;;  %v3913_v22 = vpack.c.bf16 %v8723_v17, %v8731_v31  ;;  %s6469_s22 = scalar_lea.vmem %s10212_s13, 2048  ;;  %p6476_p11 = scmp.lt.s32.totalorder %s10212_s13, %s6474_s1 }
 0x6a4   : > { %v10818_v27 = vunpack.i.h.bf16 %v7934_v40  ;;  %v10819_v25 = vunpack.i.h.bf16 %v7988_v24  ;;  %v10437_v46 = vunpack.i.h.bf16 %v8831_v37  ;;  %v10438_v38 = vunpack.i.l.bf16 %v8831_v37  ;;  %v4446_v40 = vld [vmem:[%s10269_s11] sm:$0xff]  ;;  %p6470_p6 = scmp.ne.s32.totalorder %s10212_s13, %s6469_s22  ;;  %p6477_p12 = scmp.lt.s32.totalorder %s6475_s18, %s6469_s22 }
 0x6a5   : > { %v3149_v12 = vpack.c.bf16 %v3103_v56, %v3102_v30  ;;  %v10820_v17 = vunpack.i.l.bf16 %v7988_v24  ;;  %v5110_v11 = vpack.c.bf16 %v3701_v57, %v3700_v60  ;;  %v10822_v51 = vunpack.i.l.bf16 %v7904_v43  ;;  %5017 = vmatpush1.bf16.msk.msra.mxu1 %vm5009_vm12, %v5016_v5  ;;  %v8945_v24 = vpop.permute.xlu1 %6122  ;;  %v4447_v57 = vld [vmem:[%s10269_s11 + $0x8] sm:$0xff]  ;;  %4207 = vmatpush2.bf16.msra.mxu0 %v3913_v22 }
 0x6a6   : > { %v3101_v44 = vsel %vm10417_vm7, %v5790_v8, %v10818_v27  ;;  %v3705_v55 = vsel %vm3685_vm0, %v10819_v25, %v6000_v35  ;;  %v10821_v35 = vmov %v10816_v61  ;;  %v5884_v43 = vunpack.i.l.bf16 %v10817_v32  ;;  %4450 = vperm.xlu1 %5455, %v4446_v40   ;;  %4455 = vperm.xlu0 %5454, %v4447_v57   ;;  %p6471_p9 = pnand %p6470_p6, %p6669_p5  ;;  %p6478_p13 = por %p6477_p12, %p6476_p11 }
 0x6a7   : > { %v3704_v31 = vsel %vm3685_vm0, %v10820_v17, %v5999_v4  ;;  %v3107_v9 = vsel %vm10417_vm7, %v10441_v15, %v10821_v35  ;;  %v3106_v30 = vsel %vm10417_vm7, %v10442_v52, %v10822_v51  ;;  %v8947_v4 = vpop.permute.xlu0 %6132  ;;  %v3698_v60 = vsel %vm3685_vm0, %v6109_v13, %v10438_v38  ;;  %4110 = vmatprep.subr.bf16.mxu1 %v3149_v12  ;;  %v4474_v51 = vld [vmem:[%s10270_s12] sm:$0xff] }
 0x6a8   : > { %v3699_v1 = vsel %vm3685_vm0, %v6110_v39, %v10437_v46  ;;  %v5019_v5 = vpack.c.bf16 %v3107_v9, %v3106_v30  ;;  %v10825_v56 = vunpack.i.h.bf16 %v8698_v54  ;;  %v10826_v27 = vunpack.i.l.bf16 %v7862_v58  ;;  %5111 = vmatprep.subr.msk.bf16.mxu0 %vm8090_vm15, %v5110_v11  ;;  %v10916_v38 = vld [vmem:[#allocation45_spill] sm:$0xff]  ;;  %p6472_p10 = pneg %p6471_p9 }
 0x6a9   : > { %v10827_v25 = vunpack.i.l.bf16 %v8698_v54  ;;  %v6105_v22 = vunpack.i.h.bf16 %v8700_v62  ;;  %v6104_v17 = vunpack.i.l.bf16 %v8700_v62  ;;  %v5779_v35 = vunpack.i.l.bf16 %v7846_v6 }
 0x6aa   : > { %v3105_v32 = vsel %vm10417_vm7, %v10825_v56, %v5790_v8  ;;  %v10828_v9 = vunpack.i.h.bf16 %v7971_v3  ;;  %vm10829_vm12 = vcmp.lt.s32.totalorder %v6764_v19, 33  ;;  %v5113_v8 = vpack.c.bf16 %v3705_v55, %v3704_v31  ;;  %5020 = vmatpush1.bf16.msk.msra.mxu1 %vm8964_vm10, %v5019_v5  ;;  %v4475_v31 = vld [vmem:[%s10270_s12 + $0x8] sm:$0xff]  ;;  %4478 = vperm.xlu1 %5455, %v4474_v51   ;;  %p6479_p0 = pnand %p6478_p13, %p6472_p10 }
 0x6ab   : > { %v3104_v12 = vsel %vm10417_vm7, %v10827_v25, %v10826_v27  ;;  %v3141_v54 = vpack.c.bf16 %v3101_v44, %v8743_v45  ;;  %v10830_v30 = vunpack.i.l.bf16 %v7971_v3  ;;  %vm10831_vm7 = vmmov %vm10829_vm12  ;;  %v3702_v11 = vsel %vm3685_vm0, %v6104_v17, %v6109_v13  ;;  %v9005_v44 = vpop.permute.xlu1 %6137  ;;  %v6143_v3 = vpop.permute.xlu0 %6142  ;;  %4483 = vperm.xlu0 %5454, %v4475_v31  }
 0x6ac   : > { %v2934_v58 = vsel %vm10829_vm12, %v5885_v33, %v10828_v9  ;;  %v3703_v55 = vsel %vm3685_vm0, %v6105_v22, %v6110_v39  ;;  %v5116_v45 = vpack.c.bf16 %v3699_v1, %v3698_v60  ;;  %v10832_v57 = vunpack.i.h.bf16 %v7918_v42  ;;  %vm10835_vm12 = vmmov %vm10831_vm7  ;;  %5114 = vmatpush2.bf16.msk.msra.mxu0 %vm8123_vm3, %v5113_v8 }
 0x6ad   : > { %v2933_v40 = vsel %vm10831_vm7, %v5884_v43, %v10830_v30  ;;  %v10833_v13 = vunpack.i.h.bf16 %v7846_v6  ;;  %v10834_v39 = vunpack.i.l.bf16 %v7918_v42  ;;  %v5022_v1 = vpack.c.bf16 %v3105_v32, %v3104_v12  ;;  %4112 = vmatprep.subr.bf16.mxu1 %v3141_v54  ;;  %vm10840_vm8 = vmmov %vm10835_vm12 }
 0x6ae   : > { %v6140_v5 = vunpack.i.h.bf16 %v9005_v44  ;;  %v6139_v27 = vunpack.i.l.bf16 %v9005_v44  ;;  %v6145_v25 = vunpack.i.h.bf16 %v6143_v3  ;;  %v6144_v9 = vunpack.i.l.bf16 %v6143_v3  ;;  %5117 = vmatprep.subr.msk.bf16.mxu0 %vm8090_vm15, %v5116_v45  ;;  %v10842_v45 = vld [vmem:[#allocation54_spill] sm:$0xff] }
 0x6af   : > { %v2932_v56 = vsel %vm10831_vm7, %v10833_v13, %v10832_v57  ;;  %v2931_v60 = vsel %vm10835_vm12, %v5779_v35, %v10834_v39  ;;  %vm9030_vm7 = vmand %vm2939_vm1, %vm8580_vm6  ;;  %v10838_v32 = vunpack.i.h.bf16 %v8510_v26  ;;  %v10839_v8 = vunpack.i.l.bf16 %v8510_v26  ;;  %5023 = vmatpush1.bf16.msk.msra.mxu1 %vm8964_vm10, %v5022_v1  ;;  %v9047_v13 = vpop.permute.xlu1 %6147  ;;  %v10843_v26 = vld [vmem:[#allocation49_spill] sm:$0xff] }
 0x6b0   : > { %v5119_v54 = vpack.c.bf16 %v3703_v55, %v3702_v11  ;;  %v5025_v51 = vpack.c.bf16 %v2934_v58, %v2933_v40  ;;  %v10436_v30 = vunpack.i.h.bf16 %v10841_v21  ;;  %v5985_v3 = vunpack.i.h.bf16 %v10842_v45  ;;  %vm10848_vm6 = vmmov %vm10835_vm12 }
 0x6b1   : > { %v2938_v12 = vsel %vm10835_vm12, %v10838_v32, %v5885_v33  ;;  %v2937_v59 = vsel %vm10840_vm8, %v10839_v8, %v5884_v43  ;;  %v5984_v57 = vunpack.i.l.bf16 %v10842_v45  ;;  %v9049_v33 = vpop.permute.xlu0 %6152  ;;  %v5870_v39 = vunpack.i.h.bf16 %v10843_v26  ;;  %vm5027_vm8 = vmpackc.low %vm9030_vm7, %vm9030_vm7  ;;  %v10855_v45 = vld [vmem:[#allocation50_spill] sm:$0xff] }
 0x6b2   : > { %5026 = vmatprep.subr.msk.bf16.mxu1 %vm8035_vm2, %v5025_v51  ;;  %5120 = vmatpush2.bf16.msk.msra.mxu0 %vm8123_vm3, %v5119_v54  ;;  %v10420_v43 = vunpack.i.h.bf16 %v9047_v13  ;;  %v10419_v58 = vunpack.i.l.bf16 %v9047_v13  ;;  %v5031_v61 = vpack.c.bf16 %v2932_v56, %v2931_v60  ;;  %v5869_v40 = vunpack.i.l.bf16 %v10843_v26  ;;  %vm10850_vm1 = vmmov %vm10848_vm6 }
 0x6b3   : > { %v5028_v11 = vpack.c.bf16 %v2938_v12, %v2937_v59  ;;  %vm10844_vm15 = vcmp.lt.s32.totalorder %v6764_v19, 127  ;;  %v10846_v31 = vunpack.i.h.bf16 %v7846_v6  ;;  %v10847_v1 = vunpack.i.h.bf16 %v8467_v49 }
 0x6b4   : > { %v3560_v55 = vsel %vm10844_vm15, %v6140_v5, %v6145_v25  ;;  %vm10845_vm3 = vmmov %vm10844_vm15  ;;  %v10849_v60 = vunpack.i.l.bf16 %v8467_v49  ;;  %v10423_v8 = vunpack.i.l.bf16 %v10841_v21  ;;  %v9094_v49 = vpop.permute.xlu1 %6157  ;;  %v10440_v26 = vunpack.i.h.bf16 %v10855_v45 }
 0x6b5   : > { %v3559_v50 = vsel %vm10845_vm3, %v6139_v27, %v6144_v9  ;;  %v2936_v56 = vsel %vm10848_vm6, %v10847_v1, %v10846_v31  ;;  %vm10851_vm10 = vmmov %vm10845_vm3  ;;  %5029 = vmatpush1.bf16.msk.msra.mxu1 %vm5027_vm8, %v5028_v11  ;;  %v10439_v31 = vunpack.i.l.bf16 %v10855_v45  ;;  %v3872_v11 = vsel %vm3846_vm14, %v10436_v30, %v5870_v39 }
 0x6b6   : > { %v2935_v32 = vsel %vm10850_vm1, %v10849_v60, %v5779_v35  ;;  %v3555_v12 = vsel %vm10851_vm10, %v6144_v9, %v10419_v58  ;;  %vm10852_vm12 = vmmov %vm10845_vm3  ;;  %v9096_v35 = vpop.permute.xlu0 %6162  ;;  %v10853_v9 = vunpack.i.l.bf16 %v7978_v47  ;;  %v5125_v1 = vpack.c.bf16 %v3560_v55, %v3559_v50  ;;  %5032 = vmatprep.subr.msk.bf16.mxu1 %vm8035_vm2, %v5031_v61 }
 0x6b7   : > { %v3556_v6 = vsel %vm10852_vm12, %v6145_v25, %v10420_v43  ;;  %v10854_v25 = vunpack.i.h.bf16 %v7978_v47  ;;  %v3871_v47 = vsel %vm3846_vm14, %v10423_v8, %v5869_v40  ;;  %v5034_v60 = vpack.c.bf16 %v2936_v56, %v2935_v32  ;;  %vm10861_vm7 = vmmov %vm10845_vm3 }
 0x6b8   : > { %v5122_v59 = vpack.c.bf16 %v3556_v6, %v3555_v12  ;;  %v3869_v54 = vsel %vm3846_vm14, %v5984_v57, %v10853_v9  ;;  %v10856_v12 = vunpack.i.l.bf16 %v7848_v63  ;;  %v3874_v61 = vsel %vm3846_vm14, %v10440_v26, %v5985_v3  ;;  %vm10863_vm15 = vmmov %vm10845_vm3 }
 0x6b9   : > { %v3870_v51 = vsel %vm3846_vm14, %v5985_v3, %v10854_v25  ;;  %v3873_v50 = vsel %vm3846_vm14, %v10439_v31, %v5984_v57  ;;  %v10857_v56 = vunpack.i.h.bf16 %v7848_v63  ;;  %v6165_v3 = vunpack.i.h.bf16 %v9096_v35  ;;  %5035 = vmatpush1.bf16.msk.msra.mxu1 %vm5027_vm8, %v5034_v60  ;;  %v6168_v57 = vpop.permute.xlu1 %6167  ;;  %vm10862_vm8 = vmmov %vm10845_vm3 }
 0x6ba   : > { %5123 = vmatprep.subr.msk.bf16.mxu0 %vm8201_vm9, %v5122_v59  ;;  %v3867_v55 = vsel %vm3846_vm14, %v5869_v40, %v10856_v12  ;;  %v3920_v6 = vpack.c.bf16 %v3870_v51, %v3869_v54  ;;  %v10858_v40 = vld [vmem:[#allocation51_spill] sm:$0xff]  ;;  %v6164_v25 = vunpack.i.l.bf16 %v9096_v35  ;;  %v9147_v54 = vpop.permute.xlu0 %6172  ;;  %v6170_v63 = vunpack.i.h.bf16 %v6168_v57  ;;  %vm10868_vm6 = vmmov %vm10845_vm3 }
 0x6bb   : > { %5126 = vmatpush2.bf16.msk.msra.mxu0 %vm8229_vm4, %v5125_v1  ;;  %v3868_v32 = vsel %vm3846_vm14, %v5870_v39, %v10857_v56  ;;  %v10422_v59 = vunpack.i.h.bf16 %v10858_v40  ;;  %v10421_v9 = vunpack.i.l.bf16 %v10858_v40  ;;  %v6169_v39 = vunpack.i.l.bf16 %v6168_v57  ;;  %vm10869_vm1 = vmmov %vm10845_vm3 }
 0x6bc   : > { %4118 = vmatprep.subr.bf16.mxu1 %v3920_v6  ;;  %v10424_v51 = vunpack.i.h.bf16 %v9147_v54  ;;  %v10425_v1 = vunpack.i.l.bf16 %v9147_v54  ;;  %v3919_v12 = vpack.c.bf16 %v3874_v61, %v3873_v50  ;;  %v10859_v56 = vunpack.i.h.bf16 %v8157_v36  ;;  %vm10878_vm12 = vmmov %vm10869_vm1 }
 0x6bd   : > { %v10860_v60 = vunpack.i.l.bf16 %v8157_v36  ;;  %v3912_v57 = vpack.c.bf16 %v3868_v32, %v3867_v55  ;;  %v3557_v61 = vsel %vm10861_vm7, %v6164_v25, %v6169_v39  ;;  %v3558_v50 = vsel %vm10862_vm8, %v6165_v3, %v6170_v63  ;;  %v9181_v43 = vpop.permute.xlu1 %6177  ;;  %vm10879_vm7 = vmmov %vm10869_vm1 }
 0x6be   : > { %v3713_v42 = vsel %vm3685_vm0, %v10422_v59, %v10859_v56  ;;  %v3554_v36 = vsel %vm10863_vm15, %v6170_v63, %v10424_v51  ;;  %v3553_v55 = vsel %vm10845_vm3, %v6169_v39, %v10425_v1  ;;  %v10431_v32 = vunpack.i.h.bf16 %v8945_v24  ;;  %4119 = vmatpush2.bf16.msra.mxu1 %v3919_v12  ;;  %v10864_v59 = vld [vmem:[#allocation52_spill] sm:$0xff]  ;;  %vm10884_vm8 = vmmov %vm10869_vm1 }
 0x6bf   : > { %v3712_v6 = vsel %vm3685_vm0, %v10421_v9, %v10860_v60  ;;  %v10426_v56 = vunpack.i.l.bf16 %v8945_v24  ;;  %v5131_v60 = vpack.c.bf16 %v3558_v50, %v3557_v61  ;;  %v5128_v58 = vpack.c.bf16 %v3554_v36, %v3553_v55  ;;  %v9183_v9 = vpop.permute.xlu0 %6182  ;;  %4120 = vmatprep.subr.bf16.mxu1 %v3912_v57  ;;  %v10870_v57 = vld [vmem:[#allocation56_spill] sm:$0xff]  ;;  %vm9303_vm15 = vmpackc.low %vm8597_vm13, %vm8597_vm13 }
 0x6c0   : > { %v5880_v8 = vunpack.i.h.bf16 %v10864_v59  ;;  %v5879_v63 = vunpack.i.l.bf16 %v10864_v59  ;;  %v3911_v51 = vpack.c.bf16 %v3872_v11, %v3871_v47  ;;  %v5040_v39 = vpack.c.bf16 %v3713_v42, %v3712_v6  ;;  %v10865_v59 = vld [vmem:[#allocation28_spill] sm:$0xff]  ;;  %vm10888_vm3 = vmmov %vm10869_vm1 }
 0x6c1   : > { %5129 = vmatprep.subr.msk.bf16.mxu0 %vm8201_vm9, %v5128_v58  ;;  %v6135_v12 = vunpack.i.h.bf16 %v8947_v4  ;;  %v6134_v50 = vunpack.i.l.bf16 %v8947_v4  ;;  %v9209_v4 = vpop.permute.xlu1 %6187  ;;  %v10866_v42 = vld [vmem:[#allocation24_spill] sm:$0xff]  ;;  %v10427_v6 = vunpack.i.h.bf16 %v9049_v33  ;;  %v10871_v36 = vpack.c.bf16 %v8194_v48, %v10870_v57 }
 0x6c2   : > { %v3707_v61 = vsel %vm3685_vm0, %v5880_v8, %v6105_v22  ;;  %5132 = vmatpush2.bf16.msk.msra.mxu0 %vm8229_vm4, %v5131_v60  ;;  %v3706_v11 = vsel %vm3685_vm0, %v5879_v63, %v6104_v17  ;;  %v3711_v58 = vsel %vm3685_vm0, %v10431_v32, %v5880_v8  ;;  %v3710_v22 = vsel %vm3685_vm0, %v10426_v56, %v5879_v63  ;;  %v10875_v1 = vld [vmem:[#allocation20_spill] sm:$0xff] }
 0x6c3   : > { %4121 = vmatpush2.bf16.msra.mxu1 %v3911_v51  ;;  %v6193_v47 = vpop.permute.xlu0 %6192  ;;  %v10867_v62 = vpack.c.bf16 %v10865_v59, %v10866_v42  ;;  %v3563_v17 = vsel %vm10868_vm6, %v6134_v50, %v6139_v27  ;;  %v3564_v8 = vsel %vm10869_vm1, %v6135_v12, %v6140_v5  ;;  %v10430_v51 = vunpack.i.l.bf16 %v9049_v33  ;;  %v10872_v5 = vld [vmem:[#allocation26_spill] sm:$0xff] }
 0x6c4   : > { %5038 = vmatprep.subr.msk.bf16.mxu1 %vm8035_vm2, %v10871_v36  ;;  %v6190_v55 = vunpack.i.h.bf16 %v9209_v4  ;;  %v6189_v60 = vunpack.i.l.bf16 %v9209_v4  ;;  %v6195_v27 = vunpack.i.h.bf16 %v6193_v47  ;;  %v6194_v63 = vunpack.i.l.bf16 %v6193_v47  ;;  %v10873_v59 = vld [vmem:[#allocation22_spill] sm:$0xff]  ;;  %v10876_v47 = vld [vmem:[#allocation16_spill] sm:$0xff]  ;;  %v10896_v4 = vld [vmem:[#allocation19_spill] sm:$0xff] }
 0x6c5   : > { %4216 = vmatprep.subr.bf16.mxu0 %v10867_v62  ;;  %v5043_v44 = vpack.c.bf16 %v3707_v61, %v3706_v11  ;;  %vm10447_vm10 = vcmp.lt.s32.totalorder %v6764_v19, 95  ;;  %v10874_v42 = vpack.c.bf16 %v10872_v5, %v10873_v59  ;;  %v6160_v62 = vunpack.i.h.bf16 %v9094_v49  ;;  %v9239_v57 = vpop.permute.xlu1 %6197  ;;  %v10881_v59 = vld [vmem:[#allocation14_spill] sm:$0xff] }
 0x6c6   : > { %v6159_v48 = vunpack.i.l.bf16 %v9094_v49  ;;  %v10877_v61 = vpack.c.bf16 %v10875_v1, %v10876_v47  ;;  %v5046_v11 = vpack.c.bf16 %v3711_v58, %v3710_v22  ;;  %v5049_v56 = vpack.c.bf16 %v3564_v8, %v3563_v17  ;;  %v9269_v22 = vld [vmem:[%s10268_s10] ss:$12 sps:$4 sm:$0xff]  }
 0x6c7   : > { %4217 = vmatpush2.bf16.msra.mxu0 %v10874_v42  ;;  %5041 = vmatpush2.bf16.msk.msra.mxu1 %vm8683_vm11, %v5040_v39  ;;  %v9241_v36 = vpop.permute.xlu0 %6202  ;;  %v6200_v5 = vunpack.i.h.bf16 %v9239_v57  ;;  %v6199_v49 = vunpack.i.l.bf16 %v9239_v57  ;;  %v3567_v39 = vsel %vm10878_vm12, %v10430_v51, %v6134_v50  ;;  %v3568_v1 = vsel %vm10879_vm7, %v10427_v6, %v6135_v12 }
 0x6c8   : > { %4218 = vmatprep.subr.bf16.mxu0 %v10877_v61  ;;  %5044 = vmatprep.subr.msk.bf16.mxu1 %vm8035_vm2, %v5043_v44  ;;  %v4011_v18 = vsel %vm10447_vm10, %v6190_v55, %v6195_v27  ;;  %v4010_v58 = vsel %vm10447_vm10, %v6189_v60, %v6194_v63  ;;  %v10429_v50 = vunpack.i.h.bf16 %v9181_v43  ;;  %v10428_v17 = vunpack.i.l.bf16 %v9181_v43  ;;  %v10880_v44 = vld [vmem:[#allocation18_spill] sm:$0xff]  ;;  %vm10883_vm2 = vmmov %vm10869_vm1 }
 0x6c9   : > { %v4006_v12 = vsel %vm10447_vm10, %v6194_v63, %v6199_v49  ;;  %v4007_v8 = vsel %vm10447_vm10, %v6195_v27, %v6200_v5  ;;  %v10882_v42 = vpack.c.bf16 %v10880_v44, %v10881_v59  ;;  %v3562_v47 = vsel %vm10883_vm2, %v6160_v62, %v6165_v3  ;;  %v9294_v6 = vpop.permute.xlu1 %6207 }
 0x6ca   : > { %v3561_v61 = vsel %vm10884_vm8, %v6159_v48, %v6164_v25  ;;  %v5134_v63 = vpack.c.bf16 %v4007_v8, %v4006_v12  ;;  %v5137_v44 = vpack.c.bf16 %v4011_v18, %v4010_v58  ;;  %v5052_v3 = vpack.c.bf16 %v3568_v1, %v3567_v39 }
 0x6cb   : > { %4219 = vmatpush2.bf16.msra.mxu0 %v10882_v42  ;;  %5047 = vmatpush2.bf16.msk.msra.mxu1 %vm8683_vm11, %v5046_v11  ;;  %v9296_v27 = vpop.permute.xlu0 %6212  ;;  %v5055_v14 = vpack.c.bf16 %v3562_v47, %v3561_v61  ;;  %vm10887_vm11 = vmmov %vm10869_vm1  ;;  %v3566_v29 = vsel %vm10888_vm3, %v10429_v50, %v6160_v62  ;;  %v10897_v50 = vld [vmem:[#allocation15_spill] sm:$0xff]  ;;  %vm10913_vm12 = vcmp.lt.s32.totalorder %v6764_v19, 1  ;;  %v10917_v31 = vunpack.i.h.bf16 %v10916_v38 }
 0x6cc   : > { %5050 = vmatprep.subr.msk.bf16.mxu1 %vm8753_vm5, %v5049_v56  ;;  %5135 = vmatprep.subr.msk.bf16.mxu0 %vm8201_vm9, %v5134_v63  ;;  %v3565_v25 = vsel %vm10887_vm11, %v10428_v17, %v6159_v48  ;;  %v10889_v56 = vmov 0   ;;  %v6215_v11 = vunpack.i.h.bf16 %v9296_v27  ;;  %v6214_v39 = vunpack.i.l.bf16 %v9296_v27  ;;  %vm10915_vm7 = vmmov %vm10913_vm12 }
 0x6cd   : > { %v6218_v1 = vpop.permute.xlu1 %6217  ;;  %v5058_v8 = vpack.c.bf16 %v3566_v29, %v3565_v25  ;;  %v10891_v25 = vld [vmem:[#allocation23_spill] sm:$0xff]  ;;  %v6185_v17 = vunpack.i.h.bf16 %v9183_v9  ;;  %v10898_v51 = vpack.c.bf16 %v10896_v4, %v10897_v50  ;;  %vm10918_vm2 = vmmov %vm10915_vm7 }
 0x6ce   : > { %4221 = vmatmul.mubr.bf16.vlgmr.msra.gmra.mxu0 %v9269_v22  ;;  %v6220_v48 = vunpack.i.h.bf16 %v6218_v1  ;;  %v6219_v62 = vunpack.i.l.bf16 %v6218_v1  ;;  %v2831_v1 = vadd.s32 640, %v6764_v19  ;;  %vm10920_vm8 = vmmov %vm10918_vm2 }
 0x6cf   : > { %5138 = vmatpush1.bf16.msk.msra.mxu0 %vm8229_vm4, %v5137_v44  ;;  %4263 = vmatprep.mubr.bf16.mxu0 %v10889_v56  ;;  %v9325_v18 = vpop.permute.xlu0 %6222  ;;  %v4015_v28 = vsel %vm10447_vm10, %v6185_v17, %v6190_v55  ;;  %vm10925_vm11 = vmmov %vm10918_vm2 }
 0x6d0   : > { %5053 = vmatpush2.bf16.msk.msra.mxu1 %vm9303_vm15, %v5052_v3  ;;  %v6225_v58 = vunpack.i.h.bf16 %v9325_v18  ;;  %v6224_v12 = vunpack.i.l.bf16 %v9325_v18  ;;  %v4008_v59 = vsel %vm10447_vm10, %v6214_v39, %v6219_v62  ;;  %v4009_v42 = vsel %vm10447_vm10, %v6215_v11, %v6220_v48  ;;  %vm10926_vm3 = vmmov %vm10918_vm2 }
 0x6d1   : > { %5056 = vmatprep.subr.msk.bf16.mxu1 %vm8753_vm5, %v5055_v14  ;;  %v5143_v63 = vpack.c.bf16 %v4009_v42, %v4008_v59  ;;  %v9345_v44 = vpop.permute.xlu1 %6227  ;;  %v10890_v14 = vld [vmem:[#allocation27_spill] sm:$0xff]  ;;  %v10432_v59 = vunpack.i.h.bf16 %v9241_v36  ;;  %v10433_v42 = vunpack.i.l.bf16 %v9241_v36  ;;  %v2839_v55 = vand.u32 31, %v2831_v1 }
 0x6d2   : > { %v4005_v47 = vsel %vm10447_vm10, %v6220_v48, %v6225_v58  ;;  %v4004_v61 = vsel %vm10447_vm10, %v6219_v62, %v6224_v12  ;;  %v10892_v29 = vpack.c.bf16 %v10890_v14, %v10891_v25  ;;  %v2830_v48 = vadd.s32 512, %v6764_v19  ;;  %v10894_v14 = vld [vmem:[#allocation21_spill] sm:$0xff] }
 0x6d3   : > { %v5140_v27 = vpack.c.bf16 %v4005_v47, %v4004_v61  ;;  %v9347_v3 = vpop.permute.xlu0 %6232  ;;  %v6184_v62 = vunpack.i.l.bf16 %v9183_v9  ;;  %v6210_v47 = vunpack.i.h.bf16 %v9294_v6  ;;  %v6209_v61 = vunpack.i.l.bf16 %v9294_v6 }
 0x6d4   : > { %5059 = vmatpush2.bf16.msk.msra.mxu1 %vm9303_vm15, %v5058_v8  ;;  %v9361_v8 = vld [vmem:[%s10268_s10 + $0x8] ss:$12 sps:$4 sm:$0xff]   ;;  %v2838_v32 = vand.u32 31, %v2830_v48  ;;  %v9392_v6 = vadd.s32 896, %v6764_v19  ;;  %v4019_v50 = vsel %vm10447_vm10, %v10432_v59, %v6185_v17  ;;  %vm9436_vm6 = vcmp.ge.s32.totalorder %v2839_v55, 1 }
 0x6d5   : > { %4130 = vmatprep.subr.bf16.mxu1 %v10892_v29  ;;  %5141 = vmatprep.subr.msk.bf16.mxu0 %vm8201_vm9, %v5140_v27  ;;  %v4014_v9 = vsel %vm10447_vm10, %v6184_v62, %v6189_v60  ;;  %v10893_v27 = vld [vmem:[#allocation25_spill] sm:$0xff]  ;;  %v9380_v23 = vpop.permute.xlu1 %6237  ;;  %v10435_v29 = vunpack.i.h.bf16 %v9345_v44  ;;  %v10434_v60 = vunpack.i.l.bf16 %v9345_v44  ;;  %vm10899_vm9 = vcmask 261120  }
 0x6d6   : > { %5144 = vmatpush1.bf16.msk.msra.mxu0 %vm8229_vm4, %v5143_v63  ;;  %v10895_v25 = vpack.c.bf16 %v10893_v27, %v10894_v14  ;;  %v5061_v27 = vpack.c.bf16 %v4015_v28, %v4014_v9  ;;  %v4018_v14 = vsel %vm10447_vm10, %v10433_v42, %v6184_v62  ;;  %v4013_v1 = vsel %vm10447_vm10, %v6210_v47, %v6215_v11  ;;  %v10900_v28 = vld [vmem:[#allocation17_spill] sm:$0xff] }
 0x6d7   : > { %v9382_v63 = vpop.permute.xlu0 %6242  ;;  %v4012_v48 = vsel %vm10447_vm10, %v6209_v61, %v6214_v39  ;;  %v6235_v9 = vunpack.i.h.bf16 %v9347_v3  ;;  %v6234_v62 = vunpack.i.l.bf16 %v9347_v3  ;;  %v4016_v42 = vsel %vm10447_vm10, %v10434_v60, %v6209_v61 }
 0x6d8   : > { %4131 = vmatpush2.bf16.msra.mxu1 %v10895_v25  ;;  %v10901_v25 = vld [vmem:[#allocation13_spill] sm:$0xff]  ;;  %v4017_v11 = vsel %vm10447_vm10, %v10435_v29, %v6210_v47  ;;  %vm9427_vm4 = vcmp.le.s32.totalorder %v2839_v55, 30  ;;  %vm9431_vm13 = vcmp.le.s32.totalorder %v2838_v32, 30  ;;  %vm9440_vm1 = vcmp.ge.s32.totalorder %v2838_v32, 1 }
 0x6d9   : > { %4132 = vmatprep.subr.bf16.mxu1 %v10898_v51  ;;  %5145 = vmatmul.mubr.msk.bf16.vlgmr.msra.gmra.mxu0 %vm10899_vm9, %v9361_v8  ;;  %v9404_v51 = vadd.s32 768, %v6764_v19  ;;  %v10902_v4 = vpack.c.bf16 %v10900_v28, %v10901_v25  ;;  %v9415_v17 = vpop.permute.xlu1 %6247  ;;  %v5064_v28 = vpack.c.bf16 %v4019_v50, %v4018_v14  ;;  %v6245_v25 = vunpack.i.h.bf16 %v9382_v63  ;;  %v10911_v50 = vld [vmem:[#allocation53_spill] sm:$0xff] }
 0x6da   : > { %4349 = vmatprep.mubr.bf16.mxu0 %v10889_v56  ;;  %v5070_v14 = vpack.c.bf16 %v4017_v11, %v4016_v42  ;;  %v10912_v30 = vunpack.i.h.bf16 %v10911_v50  ;;  %v10914_v32 = vunpack.i.l.bf16 %v10911_v50  ;;  %v10446_v46 = vunpack.i.l.bf16 %v9380_v23 }
 0x6db   : > { %v6253_v59 = vpop.permute.xlu0 %6252  ;;  %v11077_v29 = vunpack.i.h.bf16 %v9181_v43 }
 0x6dc   : > { %4133 = vmatpush2.bf16.msra.mxu1 %v10902_v4  ;;  %v6244_v4 = vunpack.i.l.bf16 %v9382_v63  ;;  %v9452_v55 = vsel %vm10913_vm12, %v10912_v30, %v6235_v9  ;;  %v10445_v63 = vunpack.i.h.bf16 %v9380_v23  ;;  %v6255_v42 = vunpack.i.h.bf16 %v6253_v59  ;;  %vm10930_vm12 = vmmov %vm10918_vm2 }
 0x6dd   : > { %5062 = vmatprep.subr.msk.bf16.mxu1 %vm8753_vm5, %v5061_v27  ;;  %v5067_v27 = vpack.c.bf16 %v4013_v1, %v4012_v48  ;;  %v9458_v1 = vsel %vm10915_vm7, %v10914_v32, %v6234_v62  ;;  %v9463_v48 = vpop.permute.xlu1 %6257  ;;  %v6254_v11 = vunpack.i.l.bf16 %v6253_v59  ;;  %v10919_v59 = vunpack.i.l.bf16 %v10916_v38 }
 0x6de   : > { %v10444_v30 = vunpack.i.h.bf16 %v9463_v48  ;;  %v10443_v50 = vunpack.i.l.bf16 %v9463_v48 }
 0x6df   : > { %4135 = vmatmul.mubr.bf16.vlgmr.msra.gmra.mxu1 %v9269_v22  ;;  %v6268_v32 = vpop.permute.xlu0 %6267  ;;  %v9481_v20 = vsel %vm10920_vm8, %v10919_v59, %v6244_v4  ;;  %v4000_v39 = vsel %vm10447_vm10, %v6224_v12, %v6254_v11 }
 0x6e0   : > { %5065 = vmatpush1.bf16.msk.msra.mxu1 %vm9303_vm15, %v5064_v28  ;;  %4177 = vmatprep.mubr.bf16.mxu1 %v10889_v56  ;;  %v9475_v28 = vsel %vm10918_vm2, %v10917_v31, %v6245_v25  ;;  %v6270_v26 = vunpack.i.h.bf16 %v6268_v32  ;;  %v6269_v15 = vunpack.i.l.bf16 %v6268_v32  ;;  %v3996_v52 = vsel %vm10447_vm10, %v6254_v11, %v10443_v50 }
 0x6e1   : > { %5068 = vmatprep.subr.msk.bf16.mxu1 %vm8753_vm5, %v5067_v27  ;;  %v6250_v27 = vunpack.i.h.bf16 %v9415_v17  ;;  %v3997_v31 = vsel %vm10447_vm10, %v6255_v42, %v10444_v30  ;;  %v6249_v32 = vunpack.i.l.bf16 %v9415_v17  ;;  %v6263_v30 = vpop.permute.xlu1 %6262  ;;  %vm9510_vm5 = vmpackc.low %vm9427_vm4, %vm9427_vm4  ;;  %v10972_v17 = vunpack.i.h.bf16 %v8762_v53 }
 0x6e2   : > { %v3999_v38 = vsel %vm10447_vm10, %v6270_v26, %v10445_v63  ;;  %v4003_v59 = vsel %vm10447_vm10, %v6200_v5, %v6270_v26  ;;  %v3998_v50 = vsel %vm10447_vm10, %v6269_v15, %v10446_v46  ;;  %v4002_v26 = vsel %vm10447_vm10, %v6199_v49, %v6269_v15  ;;  %vm9544_vm4 = vmpackc.low %vm9436_vm6, %vm9436_vm6 }
 0x6e3   : > { %v5207_v5 = vpack.c.bf16 %v3999_v38, %v3998_v50  ;;  %v6265_v63 = vunpack.i.h.bf16 %v6263_v30  ;;  %v6264_v60 = vunpack.i.l.bf16 %v6263_v30  ;;  %v6273_v46 = vpop.permute.xlu0 %6272  ;;  %v4001_v15 = vsel %vm10447_vm10, %v6225_v58, %v6255_v42  ;;  %vm9561_vm6 = vmpackc.low %vm9440_vm1, %vm9440_vm1 }
 0x6e4   : > { %5071 = vmatpush1.bf16.msk.msra.mxu1 %vm9303_vm15, %v5070_v14  ;;  %vm9521_vm15 = vmpackc.low %vm9431_vm13, %vm9431_vm13  ;;  %v5213_v57 = vpack.c.bf16 %v3997_v31, %v3996_v52  ;;  %v5210_v49 = vpack.c.bf16 %v4003_v59, %v4002_v26  ;;  %v6275_v30 = vunpack.i.h.bf16 %v6273_v46  ;;  %v6274_v50 = vunpack.i.l.bf16 %v6273_v46  ;;  %v10939_v26 = vld [vmem:[#allocation55_spill] sm:$0xff] }
 0x6e5   : > { %v3391_v3 = vsel %vm10925_vm11, %v6234_v62, %v6264_v60  ;;  %v3392_v14 = vsel %vm10926_vm3, %v6235_v9, %v6265_v63  ;;  %5208 = vmatprep.subr.msk.bf16.mxu0 %vm9510_vm5, %v5207_v5  ;;  %vm10929_vm13 = vmmov %vm10918_vm2  ;;  %v3390_v46 = vsel %vm10930_vm12, %v6245_v25, %v6250_v27  ;;  %v6283_v12 = vpop.permute.xlu1 %6282  ;;  %v6442_v62 = vld [vmem:[%s10268_s10 + $0x4] ss:$12 sps:$4 sm:$0xff]   ;;  %v5150_v25 = vpack.c.bf16 %v9452_v55, %v9458_v1 }
 0x6e6   : > { %v3389_v18 = vsel %vm10929_vm13, %v6244_v4, %v6249_v32  ;;  %v5147_v58 = vpack.c.bf16 %v3392_v14, %v3391_v3  ;;  %5211 = vmatpush1.bf16.msk.msra.mxu0 %vm9521_vm15, %v5210_v49  ;;  %v10933_v4 = vand.u32 31, %v9392_v6  ;;  %v5216_v42 = vpack.c.bf16 %v4001_v15, %v4000_v39  ;;  %vm10944_vm11 = vmmov %vm10926_vm3 }
 0x6e7   : > { %5072 = vmatmul.mubr.msk.bf16.vlgmr.msra.gmra.mxu1 %vm10899_vm9, %v9361_v8  ;;  %v6278_v61 = vpop.permute.xlu0 %6277  ;;  %5214 = vmatprep.subr.msk.bf16.mxu0 %vm9510_vm5, %v5213_v57  ;;  %v10936_v38 = vand.u32 31, %v9404_v51  ;;  %v5156_v1 = vpack.c.bf16 %v9475_v28, %v9481_v20  ;;  %v5153_v59 = vpack.c.bf16 %v3390_v46, %v3389_v18  ;;  %v10940_v5 = vunpack.i.h.bf16 %v10939_v26  ;;  %vm10947_vm9 = vmmov %vm10926_vm3 }
 0x6e8   : > { %4306 = vmatprep.mubr.bf16.mxu1 %v6442_v62  ;;  %vm9574_vm7 = vcmp.ge.s32.totalorder %v10933_v4, 1  ;;  %v6280_v11 = vunpack.i.h.bf16 %v6278_v61  ;;  %v6279_v31 = vunpack.i.l.bf16 %v6278_v61  ;;  %5148 = vmatprep.subr.msk.bf16.mxu1 %vm9544_vm4, %v5147_v58  ;;  %vm10941_vm2 = vcmp.lt.s32.totalorder %v6764_v19, 31  ;;  %vm10950_vm12 = vmmov %vm10926_vm3 }
 0x6e9   : > { %vm9582_vm1 = vcmp.ge.s32.totalorder %v10936_v38, 1  ;;  %v3236_v39 = vsel %vm10941_vm2, %v10940_v5, %v6275_v30  ;;  %v10942_v15 = vunpack.i.l.bf16 %v10939_v26  ;;  %vm10943_vm8 = vmmov %vm10941_vm2  ;;  %5151 = vmatpush1.bf16.msk.msra.mxu1 %vm9561_vm6, %v5150_v25  ;;  %v6285_v49 = vunpack.i.h.bf16 %v6283_v12  ;;  %v6293_v46 = vpop.permute.xlu1 %6292 }
 0x6ea   : > { %v3388_v3 = vsel %vm10944_vm11, %v6265_v63, %v6280_v11  ;;  %v10945_v28 = vunpack.i.l.bf16 %v8637_v7  ;;  %v10946_v14 = vunpack.i.h.bf16 %v8637_v7  ;;  %5217 = vmatpush1.bf16.msk.msra.mxu0 %vm9521_vm15, %v5216_v42  ;;  %vm9613_vm13 = vmpackc.low %vm9574_vm7, %vm9574_vm7  ;;  %v3387_v63 = vsel %vm10950_vm12, %v6264_v60, %v6279_v31  ;;  %5154 = vmatprep.subr.msk.bf16.mxu1 %vm9544_vm4, %v5153_v59 }
 0x6eb   : > { %v3235_v57 = vsel %vm10943_vm8, %v10942_v15, %v6274_v50  ;;  %v6295_v61 = vunpack.i.h.bf16 %v6293_v46  ;;  %v6294_v7 = vunpack.i.l.bf16 %v6293_v46  ;;  %v9619_v4 = vpop.permute.xlu0 %6287  ;;  %v6284_v42 = vunpack.i.l.bf16 %v6283_v12  ;;  %vm9628_vm2 = vmpackc.low %vm9582_vm1, %vm9582_vm1 }
 0x6ec   : > { %v3383_v20 = vsel %vm10926_vm3, %v6279_v31, %v10945_v28  ;;  %v3384_v18 = vsel %vm10947_vm9, %v6280_v11, %v10946_v14  ;;  %v5223_v11 = vpack.c.bf16 %v3388_v3, %v3387_v63  ;;  %v6290_v38 = vunpack.i.h.bf16 %v9619_v4  ;;  %vm10953_vm11 = vmmov %vm10943_vm8  ;;  %v10960_v28 = vld [vmem:[#allocation46_spill] sm:$0xff] }
 0x6ed   : > { %v5220_v25 = vpack.c.bf16 %v3384_v18, %v3383_v20  ;;  %v6289_v26 = vunpack.i.l.bf16 %v9619_v4  ;;  %v3231_v60 = vsel %vm10943_vm8, %v6274_v50, %v6294_v7  ;;  %v3232_v31 = vsel %vm10953_vm11, %v6275_v30, %v6295_v61  ;;  %5157 = vmatpush1.bf16.msk.msra.mxu1 %vm9561_vm6, %v5156_v1  ;;  %vm10954_vm3 = vmmov %vm10943_vm8  ;;  %v6298_v50 = vpop.permute.xlu1 %6297  ;;  %v11098_v30 = vld [vmem:[#allocation38_spill] sm:$0xff] }
 0x6ee   : > { %v5159_v12 = vpack.c.bf16 %v3232_v31, %v3231_v60  ;;  %v3230_v55 = vsel %vm10954_vm3, %v6285_v49, %v6290_v38  ;;  %vm10955_vm1 = vmmov %vm10954_vm3  ;;  %vm10956_vm9 = vcmask 261120   ;;  %v10957_v15 = vand.u32 31, %v9392_v6 }
 0x6ef   : > { %5221 = vmatprep.subr.msk.bf16.mxu0 %vm9613_vm13, %v5220_v25  ;;  %v3229_v59 = vsel %vm10955_vm1, %v6284_v42, %v6289_v26  ;;  %5218 = vmatmul.mubr.msk.bf16.vlgmr.msra.gmra.mxu0 %vm10956_vm9, %v9361_v8  ;;  %v5162_v3 = vpack.c.bf16 %v3236_v39, %v3235_v57  ;;  %v10961_v1 = vunpack.i.h.bf16 %v10960_v28  ;;  %vm10962_vm8 = vmmov %vm10955_vm1  ;;  %v6300_v14 = vunpack.i.h.bf16 %v6298_v50  ;;  %v6303_v46 = vpop.permute.xlu0 %6302 }
 0x6f0   : > { %vm9648_vm12 = vcmp.le.s32.totalorder %v10957_v15, 30  ;;  %5224 = vmatpush1.bf16.msk.msra.mxu0 %vm9628_vm2, %v5223_v11  ;;  %v6299_v18 = vunpack.i.l.bf16 %v6298_v50  ;;  %4392 = vmatprep.mubr.bf16.mxu0 %v6442_v62  ;;  %v10963_v63 = vunpack.i.l.bf16 %v10960_v28  ;;  %vm10964_vm11 = vmmov %vm10955_vm1  ;;  %v5165_v4 = vpack.c.bf16 %v3230_v55, %v3229_v59 }
 0x6f1   : > { %v3234_v20 = vsel %vm10962_vm8, %v10961_v1, %v6285_v49  ;;  %v6305_v60 = vunpack.i.h.bf16 %v6303_v46  ;;  %v6304_v39 = vunpack.i.l.bf16 %v6303_v46  ;;  %5160 = vmatprep.subr.msk.bf16.mxu1 %vm9510_vm5, %v5159_v12  ;;  %v10965_v57 = vunpack.i.h.bf16 %v8571_v2  ;;  %v6308_v50 = vpop.permute.xlu1 %6307 }
 0x6f2   : > { %v3233_v25 = vsel %vm10964_vm11, %v10963_v63, %v6284_v42  ;;  %vm10966_vm3 = vcmp.lt.s32.totalorder %v6764_v19, 1  ;;  %v10968_v11 = vunpack.i.l.bf16 %v8571_v2  ;;  %5163 = vmatpush1.bf16.msk.msra.mxu1 %vm9521_vm15, %v5162_v3  ;;  %v10971_v59 = vunpack.i.l.bf16 %v8762_v53 }
 0x6f3   : > { %v3382_v49 = vsel %vm10966_vm3, %v6300_v14, %v10965_v57  ;;  %vm10967_vm1 = vmmov %vm10966_vm3  ;;  %5166 = vmatprep.subr.msk.bf16.mxu1 %vm9510_vm5, %v5165_v4  ;;  %v5168_v2 = vpack.c.bf16 %v3234_v20, %v3233_v25  ;;  %v6310_v15 = vunpack.i.h.bf16 %v6308_v50  ;;  %v6309_v28 = vunpack.i.l.bf16 %v6308_v50  ;;  %v6313_v3 = vpop.permute.xlu0 %6312 }
 0x6f4   : > { %v3386_v62 = vsel %vm10967_vm1, %v6250_v27, %v6300_v14  ;;  %vm10969_vm9 = vmmov %vm10967_vm1  ;;  %v3223_v27 = vsel %vm10964_vm11, %v6304_v39, %v10971_v59  ;;  %v10976_v20 = vand.u32 31, %v9404_v51  ;;  %v10979_v46 = vunpack.i.h.bf16 %v8635_v34 }
 0x6f5   : > { %v3381_v42 = vsel %vm10969_vm9, %v6299_v18, %v10968_v11  ;;  %vm10970_vm8 = vmmov %vm10967_vm1  ;;  %v10980_v25 = vunpack.i.l.bf16 %v8635_v34  ;;  %v6315_v4 = vunpack.i.h.bf16 %v6313_v3  ;;  %v6314_v57 = vunpack.i.l.bf16 %v6313_v3 }
 0x6f6   : > { %v3385_v31 = vsel %vm10970_vm8, %v6249_v32, %v6299_v18  ;;  %v5226_v12 = vpack.c.bf16 %v3382_v49, %v3381_v42  ;;  %vm10973_vm3 = vmmov %vm10964_vm11  ;;  %vm3259_vm9 = vcmp.le.s32.totalorder %v10976_v20, 30  ;;  %5169 = vmatpush1.bf16.msk.msra.mxu1 %vm9521_vm15, %v5168_v2  ;;  %v10987_v42 = vld [vmem:[#allocation67_spill] sm:$0xff] }
 0x6f7   : > { %v5229_v55 = vpack.c.bf16 %v3386_v62, %v3385_v31  ;;  %v3224_v32 = vsel %vm10973_vm3, %v6305_v60, %v10972_v17  ;;  %vm9697_vm1 = vmpackc.low %vm9648_vm12, %vm9648_vm12  ;;  %v3222_v63 = vsel %vm10973_vm3, %v6310_v15, %v10979_v46  ;;  %v10988_v31 = vld [vmem:[#allocation68_spill] sm:$0xff] }
 0x6f8   : > { %5227 = vmatprep.subr.msk.bf16.mxu0 %vm9613_vm13, %v5226_v12  ;;  %vm10977_vm8 = vmmov %vm10973_vm3  ;;  %v5232_v18 = vpack.c.bf16 %v3224_v32, %v3223_v27  ;;  %v10989_v12 = vpack.c.bf16 %v10987_v42, %v10988_v31  ;;  %v10993_v27 = vunpack.i.l.bf16 %v8894_v0  ;;  %v10997_v32 = vld [vmem:[#allocation81_spill] sm:$0xff]  ;;  %v11008_v42 = vunpack.i.h.bf16 %v8264_v10 }
 0x6f9   : > { %v3228_v53 = vsel %vm10977_vm8, %v6295_v61, %v6305_v60  ;;  %vm10978_vm11 = vmmov %vm10973_vm3  ;;  %5230 = vmatpush1.bf16.msk.msra.mxu0 %vm9628_vm2, %v5229_v55  ;;  %v6323_v61 = vpop.permute.xlu1 %6322  ;;  %v10982_v60 = vpack.c.bf16 %v8653_v16, %v8645_v41  ;;  %v10990_v16 = vld [vmem:[#allocation78_spill] sm:$0xff]  ;;  %v10991_v55 = vld [vmem:[#allocation77_spill] sm:$0xff]  ;;  %v11000_v3 = vunpack.i.h.bf16 %v10997_v32 }
 0x6fa   : > { %v3227_v14 = vsel %vm10978_vm11, %v6294_v7, %v6304_v39  ;;  %vm10981_vm10 = vmmov %vm10973_vm3  ;;  %v9719_v7 = vpop.permute.xlu0 %6317  ;;  %5233 = vmatprep.subr.msk.bf16.mxu0 %vm9697_vm1, %v5232_v18  ;;  %v10992_v59 = vpack.c.bf16 %v10990_v16, %v10991_v55  ;;  %v11003_v18 = vld [vmem:[#allocation60_spill] sm:$0xff]  ;;  %v11010_v55 = vld [vmem:[#allocation61_spill] sm:$0xff] }
 0x6fb   : > { %v3221_v51 = vsel %vm10981_vm10, %v6309_v28, %v10980_v25  ;;  %4282 = vmatprep.subr.bf16.mxu1 %v10982_v60  ;;  %vm9726_vm8 = vmpackc.low %vm3259_vm9, %vm3259_vm9  ;;  %v5235_v39 = vpack.c.bf16 %v3228_v53, %v3227_v14  ;;  %vm10994_vm9 = vcmp.lt.s32.totalorder %v6764_v19, 32  ;;  %v6324_v53 = vunpack.i.l.bf16 %v6323_v61  ;;  %v11002_v14 = vld [vmem:[#allocation59_spill] sm:$0xff]  ;;  %v11006_v60 = vld [vmem:[#allocation74_spill] sm:$0xff] }
 0x6fc   : > { %vm10985_vm10 = vmmov %vm10973_vm3  ;;  %v5238_v11 = vpack.c.bf16 %v3222_v63, %v3221_v51  ;;  %4283 = vmatpush1.bf16.msra.mxu1 %v10989_v12  ;;  %v11004_v46 = vpack.c.bf16 %v11002_v14, %v11003_v18  ;;  %v11005_v51 = vld [vmem:[#allocation72_spill] sm:$0xff]  ;;  %v11009_v12 = vunpack.i.l.bf16 %v8264_v10 }
 0x6fd   : > { %v3225_v49 = vsel %vm10985_vm10, %v6289_v26, %v6309_v28  ;;  %vm10986_vm11 = vmmov %vm10973_vm3  ;;  %5236 = vmatpush1.bf16.msk.msra.mxu0 %vm9726_vm8, %v5235_v39  ;;  %v9739_v41 = vpop.permute.xlu1 %6342  ;;  %4284 = vmatprep.subr.bf16.mxu1 %v10992_v59  ;;  %v3078_v26 = vsel %vm10994_vm9, %v6314_v57, %v10993_v27  ;;  %v11007_v39 = vpack.c.bf16 %v11005_v51, %v11006_v60  ;;  %v11011_v59 = vld [vmem:[#allocation62_spill] sm:$0xff] }
 0x6fe   : > { %v3226_v62 = vsel %vm10986_vm11, %v6290_v38, %v6310_v15  ;;  %v10995_v38 = vunpack.i.h.bf16 %v8894_v0  ;;  %vm10996_vm3 = vmmov %vm10994_vm9  ;;  %v9752_v2 = vpop.permute.xlu0 %6327  ;;  %5239 = vmatprep.subr.msk.bf16.mxu0 %vm9697_vm1, %v5238_v11  ;;  %v10998_v15 = vunpack.i.l.bf16 %v10997_v32  ;;  %v6325_v0 = vunpack.i.h.bf16 %v6323_v61 }
 0x6ff   : > { %v5241_v17 = vpack.c.bf16 %v3226_v62, %v3225_v49  ;;  %vm10999_vm10 = vmmov %vm10996_vm3  ;;  %v6320_v62 = vunpack.i.h.bf16 %v9719_v7  ;;  %v6319_v11 = vunpack.i.l.bf16 %v9719_v7  ;;  %v9788_v16 = vsel %vm3846_vm14, %v11009_v12, %v6324_v53 }
 0x700   : > { %v3079_v50 = vsel %vm10996_vm3, %v6315_v4, %v10995_v38  ;;  %v3082_v28 = vsel %vm10999_vm10, %v10998_v15, %v6314_v57  ;;  %vm11001_vm11 = vmmov %vm10996_vm3  ;;  %4285 = vmatpush1.bf16.msra.mxu1 %v11004_v46  ;;  %v9782_v31 = vsel %vm3846_vm14, %v11008_v42, %v6325_v0  ;;  %v11012_v27 = vpack.c.bf16 %v11010_v55, %v11011_v59  ;;  %v11023_v42 = vld [vmem:[#allocation58_spill] sm:$0xff] }
 0x701   : > { %v3083_v20 = vsel %vm11001_vm11, %v11000_v3, %v6315_v4  ;;  %v3155_v63 = vpack.c.bf16 %v3079_v50, %v3078_v26  ;;  %5242 = vmatpush1.bf16.msk.msra.mxu0 %vm9726_vm8, %v5241_v17  ;;  %v6363_v25 = vpop.permute.xlu1 %6362  ;;  %5172 = vmatprep.subr.msk.bf16.mxu1 %vm9544_vm4, %v11007_v39  ;;  %v6330_v7 = vunpack.i.h.bf16 %v9752_v2  ;;  %v6329_v26 = vunpack.i.l.bf16 %v9752_v2  ;;  %v11013_v50 = vld [vmem:[#allocation64_spill] sm:$0xff]  ;;  %v11014_v17 = vld [vmem:[#allocation66_spill] sm:$0xff] }
 0x702   : > { %v6365_v57 = vunpack.i.h.bf16 %v6363_v25  ;;  %v6364_v49 = vunpack.i.l.bf16 %v6363_v25  ;;  %v9774_v4 = vpop.permute.xlu0 %6332  ;;  %v3154_v61 = vpack.c.bf16 %v3083_v20, %v3082_v28  ;;  %v11015_v32 = vpack.c.bf16 %v11013_v50, %v11014_v17  ;;  %v11016_v3 = vld [vmem:[#allocation84_spill] sm:$0xff]  ;;  %v11017_v20 = vld [vmem:[#allocation83_spill] sm:$0xff]  ;;  %v11019_v2 = vld [vmem:[#allocation82_spill] sm:$0xff] }
 0x703   : > { %4368 = vmatprep.subr.bf16.mxu0 %v3155_v63  ;;  %v11018_v14 = vpack.c.bf16 %v11016_v3, %v11017_v20  ;;  %v11020_v18 = vunpack.i.h.bf16 %v11019_v2  ;;  %v11021_v63 = vunpack.i.l.bf16 %v11019_v2  ;;  %v3915_v39 = vpack.c.bf16 %v9782_v31, %v9788_v16  ;;  %v11028_v20 = vld [vmem:[#allocation79_spill] sm:$0xff] }
 0x704   : > { %5175 = vmatpush1.bf16.msk.msra.mxu1 %vm9561_vm6, %v11012_v27  ;;  %v3853_v10 = vsel %vm3846_vm14, %v6364_v49, %v6319_v11  ;;  %v3854_v15 = vsel %vm3846_vm14, %v6365_v57, %v6320_v62  ;;  %vm3725_vm9 = vcmp.lt.s32.totalorder %v9392_v6, 992  ;;  %v6334_v59 = vunpack.i.l.bf16 %v9774_v4  ;;  %v11025_v27 = vld [vmem:[#allocation75_spill] sm:$0xff] }
 0x705   : > { %4369 = vmatpush1.bf16.msra.mxu0 %v3154_v61  ;;  %v6368_v38 = vpop.permute.xlu1 %6367  ;;  %5178 = vmatprep.subr.msk.bf16.mxu1 %vm9544_vm4, %v11015_v32  ;;  %v3858_v46 = vsel %vm3846_vm14, %v11020_v18, %v6365_v57  ;;  %v3857_v25 = vsel %vm3846_vm14, %v11021_v63, %v6364_v49  ;;  %v11022_v61 = vld [vmem:[#allocation57_spill] sm:$0xff]  ;;  %v3924_v55 = vpack.c.bf16 %v3854_v15, %v3853_v10  ;;  %v6335_v57 = vunpack.i.h.bf16 %v9774_v4  ;;  %v11026_v49 = vld [vmem:[#allocation76_spill] sm:$0xff]  ;;  %vm9904_vm3 = vmpackc.low %vm3725_vm9, %vm3725_vm9 }
 0x706   : > { %v6338_v28 = vpop.permute.xlu0 %6337  ;;  %4370 = vmatprep.subr.bf16.mxu0 %v11018_v14  ;;  %v6370_v51 = vunpack.i.h.bf16 %v6368_v38  ;;  %v6369_v60 = vunpack.i.l.bf16 %v6368_v38  ;;  %v11024_v12 = vpack.c.bf16 %v11022_v61, %v11023_v42  ;;  %v11027_v50 = vpack.c.bf16 %v11025_v27, %v11026_v49  ;;  %v11029_v14 = vld [vmem:[#allocation80_spill] sm:$0xff]  ;;  %v11031_v42 = vld [vmem:[#allocation85_spill] sm:$0xff]  ;;  %v11100_v6 = vld [vmem:[#allocation35_spill] sm:$0xff] }
 0x707   : > { %v3851_v31 = vsel %vm3846_vm14, %v6324_v53, %v6329_v26  ;;  %v3852_v16 = vsel %vm3846_vm14, %v6325_v0, %v6330_v7  ;;  %v3923_v17 = vpack.c.bf16 %v3858_v46, %v3857_v25  ;;  %v6340_v32 = vunpack.i.h.bf16 %v6338_v28 }
 0x708   : > { %5181 = vmatpush1.bf16.msk.msra.mxu1 %vm9561_vm6, %v11024_v12  ;;  %v6339_v10 = vunpack.i.l.bf16 %v6338_v28  ;;  %v11030_v2 = vpack.c.bf16 %v11028_v20, %v11029_v14  ;;  %v3692_v53 = vsel %vm3685_vm0, %v6369_v60, %v6334_v59  ;;  %v3693_v0 = vsel %vm3685_vm0, %v6370_v51, %v6335_v57 }
 0x709   : > { %4371 = vmatpush1.bf16.msra.mxu0 %v11027_v50  ;;  %v6373_v38 = vpop.permute.xlu1 %6372  ;;  %4290 = vmatprep.subr.bf16.mxu1 %v3924_v55  ;;  %v6345_v46 = vunpack.i.h.bf16 %v9739_v41  ;;  %v6344_v63 = vunpack.i.l.bf16 %v9739_v41  ;;  %v3916_v61 = vpack.c.bf16 %v3852_v16, %v3851_v31  ;;  %v11032_v12 = vunpack.i.h.bf16 %v11031_v42  ;;  %v11036_v16 = vld [vmem:[#allocation71_spill] sm:$0xff] }
 0x70a   : > { %v6375_v15 = vunpack.i.h.bf16 %v6373_v38  ;;  %v6348_v3 = vpop.permute.xlu0 %6347  ;;  %5245 = vmatprep.subr.msk.bf16.mxu0 %vm9613_vm13, %v11030_v2  ;;  %v6374_v28 = vunpack.i.l.bf16 %v6373_v38  ;;  %v11033_v27 = vunpack.i.l.bf16 %v11031_v42  ;;  %v11034_v50 = vunpack.i.h.bf16 %v10855_v45 }
 0x70b   : > { %v6350_v18 = vunpack.i.h.bf16 %v6348_v3  ;;  %v6349_v25 = vunpack.i.l.bf16 %v6348_v3  ;;  %v3697_v55 = vsel %vm3685_vm0, %v11032_v12, %v6370_v51  ;;  %v11035_v20 = vunpack.i.l.bf16 %v10855_v45 }
 0x70c   : > { %4291 = vmatpush2.bf16.msra.mxu1 %v3923_v17  ;;  %v3696_v49 = vsel %vm3685_vm0, %v11033_v27, %v6369_v60  ;;  %v3878_v38 = vsel %vm3846_vm14, %v6375_v15, %v11034_v50  ;;  %v11037_v17 = vld [vmem:[#allocation73_spill] sm:$0xff]  ;;  %v5183_v14 = vpack.c.bf16 %v3693_v0, %v3692_v53  ;;  %v3691_v60 = vsel %vm3685_vm0, %v6340_v32, %v6345_v46 }
 0x70d   : > { %v3877_v31 = vsel %vm3846_vm14, %v6374_v28, %v11035_v20  ;;  %v11038_v3 = vpack.c.bf16 %v11036_v16, %v11037_v17  ;;  %v6378_v51 = vpop.permute.xlu1 %6377  ;;  %v3690_v45 = vsel %vm3685_vm0, %v6339_v10, %v6344_v63  ;;  %v11039_v2 = vunpack.i.l.bf16 %v8831_v37  ;;  %4292 = vmatprep.subr.bf16.mxu1 %v3916_v61  ;;  %v11043_v17 = vld [vmem:[#allocation70_spill] sm:$0xff] }
 0x70e   : > { %v9882_v12 = vpop.permute.xlu0 %6352  ;;  %v11040_v53 = vunpack.i.h.bf16 %v8831_v37  ;;  %v3849_v27 = vsel %vm3846_vm14, %v6319_v11, %v6374_v28  ;;  %v3850_v50 = vsel %vm3846_vm14, %v6320_v62, %v6375_v15  ;;  %v11041_v20 = vunpack.i.h.bf16 %v10841_v21 }
 0x70f   : > { %5248 = vmatpush1.bf16.msk.msra.mxu0 %vm9628_vm2, %v11038_v3  ;;  %v3694_v42 = vsel %vm3685_vm0, %v11039_v2, %v6339_v10  ;;  %v11042_v10 = vld [vmem:[#allocation69_spill] sm:$0xff]  ;;  %v5256_v11 = vpack.c.bf16 %v3878_v38, %v3877_v31  ;;  %v3847_v62 = vsel %vm3846_vm14, %v6329_v26, %v6349_v25  ;;  %v11047_v15 = vunpack.i.l.bf16 %v10841_v21 }
 0x710   : > { %v3695_v0 = vsel %vm3685_vm0, %v11040_v53, %v6340_v32  ;;  %v3876_v16 = vsel %vm3846_vm14, %v6350_v18, %v11041_v20  ;;  %v11044_v3 = vpack.c.bf16 %v11042_v10, %v11043_v17  ;;  %v3848_v32 = vsel %vm3846_vm14, %v6330_v7, %v6350_v18  ;;  %4293 = vmatpush2.bf16.msra.mxu1 %v3915_v39  ;;  %v11048_v20 = vld [vmem:[#allocation63_spill] sm:$0xff]  ;;  %v11049_v38 = vld [vmem:[#allocation65_spill] sm:$0xff] }
 0x711   : > { %v3875_v58 = vsel %vm3846_vm14, %v6349_v25, %v11047_v15  ;;  %v6380_v28 = vunpack.i.h.bf16 %v6378_v51  ;;  %v6379_v61 = vunpack.i.l.bf16 %v6378_v51  ;;  %v6355_v2 = vunpack.i.h.bf16 %v9882_v12  ;;  %v6383_v26 = vpop.permute.xlu1 %6382  ;;  %5184 = vmatprep.subr.msk.bf16.mxu1 %vm9544_vm4, %v5183_v14  ;;  %vm9933_vm14 = vmand %vm3725_vm9, %vm9574_vm7 }
 0x712   : > { %5251 = vmatprep.subr.msk.bf16.mxu0 %vm9613_vm13, %v11044_v3  ;;  %v6354_v53 = vunpack.i.l.bf16 %v9882_v12  ;;  %v11050_v31 = vpack.c.bf16 %v11048_v20, %v11049_v38  ;;  %v5186_v21 = vpack.c.bf16 %v3697_v55, %v3696_v49  ;;  %v6385_v7 = vunpack.i.h.bf16 %v6383_v26  ;;  %v6358_v18 = vpop.permute.xlu0 %6357 }
 0x713   : > { %v3925_v39 = vpack.c.bf16 %v3850_v50, %v3849_v27  ;;  %v6384_v25 = vunpack.i.l.bf16 %v6383_v26  ;;  %v5189_v51 = vpack.c.bf16 %v3691_v60, %v3690_v45  ;;  %v5192_v10 = vpack.c.bf16 %v3695_v0, %v3694_v42 }
 0x714   : > { %5254 = vmatpush1.bf16.msk.msra.mxu0 %vm9628_vm2, %v11050_v31  ;;  %v3917_v17 = vpack.c.bf16 %v3848_v32, %v3847_v62  ;;  %v5259_v3 = vpack.c.bf16 %v3876_v16, %v3875_v58  ;;  %5187 = vmatpush2.bf16.msk.msra.mxu1 %vm9561_vm6, %v5186_v21  ;;  %vm11053_vm13 = vcmp.lt.s32.totalorder %v6764_v19, 127  ;;  %v11055_v60 = vunpack.i.h.bf16 %v10858_v40 }
 0x715   : > { %5257 = vmatprep.subr.msk.bf16.mxu0 %vm9904_vm3, %v5256_v11  ;;  %v3548_v49 = vsel %vm11053_vm13, %v6380_v28, %v6355_v2  ;;  %vm11054_vm10 = vmmov %vm11053_vm13  ;;  %v11056_v45 = vunpack.i.l.bf16 %v10858_v40  ;;  %v9953_v0 = vpop.permute.xlu1 %6387  ;;  %v11057_v27 = vunpack.i.h.bf16 %v9047_v13  ;;  %v11059_v16 = vunpack.i.l.bf16 %v9047_v13  ;;  %5190 = vmatprep.subr.msk.bf16.mxu1 %vm9544_vm4, %v5189_v51 }
 0x716   : > { %v3547_v14 = vsel %vm11054_vm10, %v6379_v61, %v6354_v53  ;;  %v3717_v47 = vsel %vm3685_vm0, %v6385_v7, %v11055_v60  ;;  %vm11058_vm7 = vmmov %vm11054_vm10  ;;  %v6360_v62 = vunpack.i.h.bf16 %v6358_v18  ;;  %v6390_v32 = vunpack.i.h.bf16 %v9953_v0  ;;  %v6393_v40 = vpop.permute.xlu0 %6392 }
 0x717   : > { %v3716_v42 = vsel %vm3685_vm0, %v6384_v25, %v11056_v45  ;;  %v3552_v50 = vsel %vm11058_vm7, %v11057_v27, %v6380_v28  ;;  %vm11060_vm11 = vmmov %vm11058_vm7  ;;  %v6359_v15 = vunpack.i.l.bf16 %v6358_v18  ;;  %v6389_v58 = vunpack.i.l.bf16 %v9953_v0 }
 0x718   : > { %4377 = vmatpush2.bf16.msra.mxu0 %v3925_v39  ;;  %v3551_v11 = vsel %vm11060_vm11, %v11059_v16, %v6379_v61  ;;  %v6395_v20 = vunpack.i.h.bf16 %v6393_v40  ;;  %v6394_v28 = vunpack.i.l.bf16 %v6393_v40  ;;  %vm5261_vm13 = vmpackc.low %vm9933_vm14, %vm9933_vm14  ;;  %v5195_v13 = vpack.c.bf16 %v3548_v49, %v3547_v14  ;;  %5193 = vmatpush2.bf16.msk.msra.mxu1 %vm9561_vm6, %v5192_v10  ;;  %v11073_v16 = vld [vmem:[#allocation39_spill] sm:$0xff] }
 0x719   : > { %5260 = vmatprep.subr.msk.bf16.mxu0 %vm9904_vm3, %v5259_v3  ;;  %v3688_v61 = vsel %vm3685_vm0, %v6334_v59, %v6384_v25  ;;  %v3689_v52 = vsel %vm3685_vm0, %v6335_v57, %v6385_v7  ;;  %v5262_v37 = vpack.c.bf16 %v3717_v47, %v3716_v42  ;;  %vm11061_vm4 = vmmov %vm11058_vm7  ;;  %v6398_v26 = vpop.permute.xlu1 %6397  ;;  %v5198_v59 = vpack.c.bf16 %v3552_v50, %v3551_v11  ;;  %v11074_v11 = vld [vmem:[#allocation43_spill] sm:$0xff] }
 0x71a   : > { %v3545_v38 = vsel %vm11061_vm4, %v6359_v15, %v6389_v58  ;;  %vm11062_vm3 = vmmov %vm11061_vm4  ;;  %v11063_v4 = vunpack.i.h.bf16 %v8945_v24  ;;  %v11064_v21 = vunpack.i.l.bf16 %v8945_v24  ;;  %v6400_v7 = vunpack.i.h.bf16 %v6398_v26  ;;  %v6403_v18 = vpop.permute.xlu0 %6402  ;;  %5196 = vmatprep.subr.msk.bf16.mxu1 %vm9510_vm5, %v5195_v13 }
 0x71b   : > { %v3546_v31 = vsel %vm11062_vm3, %v6360_v62, %v6390_v32  ;;  %v5265_v39 = vpack.c.bf16 %v3689_v52, %v3688_v61  ;;  %v11065_v25 = vunpack.i.l.bf16 %v9147_v54  ;;  %vm11066_vm6 = vmmov %vm11062_vm3  ;;  %v11067_v51 = vunpack.i.h.bf16 %v9147_v54 }
 0x71c   : > { %4379 = vmatpush2.bf16.msra.mxu0 %v3917_v17  ;;  %v3715_v57 = vsel %vm3685_vm0, %v6395_v20, %v11063_v4  ;;  %v3714_v9 = vsel %vm3685_vm0, %v6394_v28, %v11064_v21  ;;  %vm11068_vm10 = vmmov %vm11062_vm3  ;;  %v6399_v17 = vunpack.i.l.bf16 %v6398_v26  ;;  %v5201_v3 = vpack.c.bf16 %v3546_v31, %v3545_v38  ;;  %5199 = vmatpush2.bf16.msk.msra.mxu1 %vm9521_vm15, %v5198_v59 }
 0x71d   : > { %5263 = vmatprep.subr.msk.bf16.mxu0 %vm5261_vm13, %v5262_v37  ;;  %v3549_v24 = vsel %vm11066_vm6, %v11065_v25, %v6359_v15  ;;  %v3550_v10 = vsel %vm11068_vm10, %v11067_v51, %v6360_v62  ;;  %v3687_v49 = vsel %vm3685_vm0, %v6345_v46, %v6395_v20  ;;  %v3686_v14 = vsel %vm3685_vm0, %v6344_v63, %v6394_v28  ;;  %v6408_v45 = vpop.permute.xlu1 %6407  ;;  %vm11070_vm7 = vmmov %vm11062_vm3  ;;  %v11101_v25 = vld [vmem:[#allocation31_spill] sm:$0xff] }
 0x71e   : > { %v6405_v60 = vunpack.i.h.bf16 %v6403_v18  ;;  %v5268_v54 = vpack.c.bf16 %v3715_v57, %v3714_v9  ;;  %v6404_v47 = vunpack.i.l.bf16 %v6403_v18  ;;  %v5204_v42 = vpack.c.bf16 %v3550_v10, %v3549_v24  ;;  %vm11072_vm0 = vmmov %vm11062_vm3  ;;  %v6413_v50 = vpop.permute.xlu0 %6412  ;;  %5202 = vmatprep.subr.msk.bf16.mxu1 %vm9510_vm5, %v5201_v3  ;;  %v11097_v18 = vld [vmem:[#allocation41_spill] sm:$0xff] }
 0x71f   : > { %v11069_v27 = vunpack.i.l.bf16 %v9049_v33  ;;  %v11071_v41 = vunpack.i.h.bf16 %v9049_v33  ;;  %v3474_v62 = vpack.c.bf16 %v11074_v11, %v11073_v16  ;;  %v5271_v40 = vpack.c.bf16 %v3687_v49, %v3686_v14  ;;  %vm11075_vm11 = vmmov %vm11072_vm0  ;;  %v11107_v14 = vld [vmem:[#allocation34_spill] sm:$0xff]  ;;  %v11119_v16 = vld [vmem:[#allocation29_spill] sm:$0xff] }
 0x720   : > { %5266 = vmatpush2.bf16.msk.msra.mxu0 %vm9628_vm2, %v5265_v39  ;;  %v3544_v15 = vsel %vm11075_vm11, %v6355_v2, %v6400_v7  ;;  %v6410_v20 = vunpack.i.h.bf16 %v6408_v45  ;;  %v6409_v28 = vunpack.i.l.bf16 %v6408_v45  ;;  %vm11076_vm5 = vmmov %vm11072_vm0  ;;  %v6415_v61 = vunpack.i.h.bf16 %v6413_v50  ;;  %5205 = vmatpush2.bf16.msk.msra.mxu1 %vm9521_vm15, %v5204_v42 }
 0x721   : > { %v3571_v46 = vsel %vm11070_vm7, %v6399_v17, %v11069_v27  ;;  %v3572_v63 = vsel %vm11072_vm0, %v6400_v7, %v11071_v41  ;;  %5269 = vmatprep.subr.msk.bf16.mxu0 %vm5261_vm13, %v5268_v54  ;;  %v3543_v33 = vsel %vm11076_vm5, %v6354_v53, %v6399_v17  ;;  %vm11078_vm4 = vmmov %vm11072_vm0  ;;  %v6414_v2 = vunpack.i.l.bf16 %v6413_v50  ;;  %4302 = vmatprep.subr.bf16.mxu1 %v3474_v62  ;;  %v11110_v54 = vld [vmem:[#allocation40_spill] sm:$0xff]  ;;  %v11118_v50 = vld [vmem:[#allocation33_spill] sm:$0xff] }
 0x722   : > { %v3570_v13 = vsel %vm11078_vm4, %v6405_v60, %v11077_v29  ;;  %v5274_v52 = vpack.c.bf16 %v3572_v63, %v3571_v46  ;;  %v11079_v55 = vunpack.i.l.bf16 %v9181_v43  ;;  %vm11080_vm14 = vmmov %vm11072_vm0  ;;  %v11081_v12 = vunpack.i.h.bf16 %v9380_v23  ;;  %v11115_v46 = vld [vmem:[#allocation36_spill] sm:$0xff]  ;;  %v10149_v34 = vpop.permute.xlu0 %4455 }
 0x723   : > { %vm11082_vm13 = vcmp.lt.s32.totalorder %v6764_v19, 95  ;;  %v11083_v38 = vunpack.i.l.bf16 %v9380_v23  ;;  %v11085_v26 = vunpack.i.h.bf16 %v9463_v48  ;;  %v5277_v59 = vpack.c.bf16 %v3544_v15, %v3543_v33  ;;  %vm11087_vm6 = vmmov %vm11072_vm0  ;;  %v11112_v19 = vld [vmem:[#allocation42_spill] sm:$0xff]  ;;  %v11116_v41 = vld [vmem:[#allocation32_spill] sm:$0xff] }
 0x724   : > { %v3569_v37 = vsel %vm11080_vm14, %v6404_v47, %v11079_v55  ;;  %v3995_v53 = vsel %vm11082_vm13, %v11081_v12, %v6410_v20  ;;  %vm11084_vm3 = vmmov %vm11082_vm13  ;;  %5272 = vmatpush2.bf16.msk.msra.mxu0 %vm9628_vm2, %v5271_v40  ;;  %v3542_v4 = vsel %vm11087_vm6, %v6390_v32, %v6405_v60  ;;  %v11089_v57 = vunpack.i.l.bf16 %v9463_v48  ;;  %v11108_v60 = vld [vmem:[#allocation30_spill] sm:$0xff] }
 0x725   : > { %v3994_v31 = vsel %vm11084_vm3, %v11083_v38, %v6409_v28  ;;  %vm11086_vm15 = vmmov %vm11084_vm3  ;;  %5275 = vmatprep.subr.msk.bf16.mxu0 %vm9697_vm1, %v5274_v52  ;;  %v5280_v32 = vpack.c.bf16 %v3570_v13, %v3569_v37  ;;  %v11093_v21 = vunpack.i.l.bf16 %v9241_v36  ;;  %v11099_v39 = vpack.c.bf16 %v11097_v18, %v11098_v30 }
 0x726   : > { %v5289_v35 = vpack.c.bf16 %v3995_v53, %v3994_v31  ;;  %v3993_v43 = vsel %vm11086_vm15, %v11085_v26, %v6415_v61  ;;  %vm11088_vm10 = vmmov %vm11072_vm0  ;;  %v11102_v24 = vpack.c.bf16 %v11100_v6, %v11101_v25  ;;  %v11103_v10 = vunpack.i.h.bf16 %v9345_v44 }
 0x727   : > { %v3541_v23 = vsel %vm11088_vm10, %v6389_v58, %v6404_v47  ;;  %vm11090_vm2 = vmmov %vm11084_vm3  ;;  %v11095_v58 = vunpack.i.h.bf16 %v9241_v36  ;;  %4303 = vmatpush2.bf16.msra.mxu1 %v11099_v39  ;;  %v11105_v3 = vunpack.i.l.bf16 %v9345_v44  ;;  %v11109_v1 = vpack.c.bf16 %v11107_v14, %v11108_v60  ;;  %v11111_v47 = vld [vmem:[#allocation44_spill] sm:$0xff]  ;;  %v11113_v44 = vld [vmem:[#allocation37_spill] sm:$0xff] }
 0x728   : > { %v3992_v5 = vsel %vm11090_vm2, %v11089_v57, %v6414_v2  ;;  %vm10088_vm7 = vmand %vm3725_vm9, %vm9648_vm12  ;;  %5278 = vmatpush2.bf16.msk.msra.mxu0 %vm9726_vm8, %v5277_v59  ;;  %4304 = vmatprep.subr.bf16.mxu1 %v11102_v24  ;;  %v5283_v36 = vpack.c.bf16 %v3542_v4, %v3541_v23  ;;  %v3476_v45 = vpack.c.bf16 %v11111_v47, %v11110_v54 }
 0x729   : > { %vm11094_vm0 = vmmov %vm11090_vm2  ;;  %v5295_v7 = vpack.c.bf16 %v3993_v43, %v3992_v5  ;;  %5281 = vmatprep.subr.msk.bf16.mxu0 %vm9697_vm1, %v5280_v32  ;;  %v11114_v27 = vpack.c.bf16 %v11112_v19, %v11113_v44  ;;  %v11117_v63 = vpack.c.bf16 %v11115_v46, %v11116_v41  ;;  %v11120_v11 = vpack.c.bf16 %v11118_v50, %v11119_v16  ;;  %v10160_v43 = vpop.permute.xlu0 %4483 }
 0x72a   : > { %v4022_v48 = vsel %vm11094_vm0, %v6409_v28, %v11093_v21  ;;  %vm11096_vm11 = vmmov %vm11094_vm0  ;;  %vm11121_vm1 = vcmask 261120  }
 0x72b   : > { %v4023_v9 = vsel %vm11096_vm11, %v6410_v20, %v11095_v58  ;;  %vm5285_vm12 = vmpackc.low %vm10088_vm7, %vm10088_vm7  ;;  %4305 = vmatpush2.bf16.msra.mxu1 %v11109_v1  ;;  %v10146_v20 = vpop.permute.xlu1 %4450 }
 0x72c   : > { %v5286_v51 = vpack.c.bf16 %v4023_v9, %v4022_v48  ;;  %vm11104_vm9 = vmmov %vm11094_vm0  ;;  %5284 = vmatpush2.bf16.msk.msra.mxu0 %vm9726_vm8, %v5283_v36 }
 0x72d   : > { %v4021_v17 = vsel %vm11104_vm9, %v6415_v61, %v11103_v10  ;;  %vm11106_vm5 = vmmov %vm11094_vm0  ;;  %4388 = vmatprep.subr.bf16.mxu0 %v3476_v45 }
 0x72e   : > { %v4020_v49 = vsel %vm11106_vm5, %v6414_v2, %v11105_v3  ;;  %5287 = vmatprep.subr.msk.bf16.mxu1 %vm5285_vm12, %v5286_v51  ;;  %4307 = vmatmul.mubr.bf16.vlgmr.msra.gmra.mxu1 %v9269_v22 }
 0x72f   : > { %v5292_v42 = vpack.c.bf16 %v4021_v17, %v4020_v49  ;;  %5290 = vmatpush1.bf16.msk.msra.mxu1 %vm9726_vm8, %v5289_v35  ;;  %4435 = vmatprep.mubr.bf16.mxu1 %v10889_v56 }
 0x730   : > { %4389 = vmatpush2.bf16.msra.mxu0 %v11114_v27 }
 0x731   : > { %5293 = vmatprep.subr.msk.bf16.mxu1 %vm5285_vm12, %v5292_v42  ;;  %4390 = vmatprep.subr.bf16.mxu0 %v11117_v63 }
 0x733   : > { %5296 = vmatpush1.bf16.msk.msra.mxu1 %vm9726_vm8, %v5295_v7 }
 0x734   : > { %4391 = vmatpush2.bf16.msra.mxu0 %v11120_v11 }
 0x736   : > { %5297 = vmatmul.mubr.msk.bf16.vlgmr.msra.gmra.mxu1 %vm11121_vm1, %v9361_v8  ;;  %v10154_v8 = vpop.permute.xlu1 %4478 }
 0x737   : > { %4393 = vmatmul.mubr.bf16.vlgmr.msra.gmra.mxu0 %v9269_v22 }
 0x78e   : > { %v4222_v56 = vpop.f32.mrf.mxu0 }
 0x790   : > { %v4224_v62 = vpop.f32.mrf.mxu0 }
 0x792   : > { %v4226_v40 = vpop.f32.mrf.mxu0 }
 0x794   : > { %v4228_v15 = vpop.f32.mrf.mxu0 }
 0x799   : > { %v4265_v28 = vpop.f32.mrf.mxu0 }
 0x79a   : > { %v4266_v33 = vadd.f32 %v4265_v28, %v4222_v56 }
 0x79b   : > { %v4267_v29 = vpop.f32.mrf.mxu0 }
 0x79c   : > { %v4460_v13 = vmul.f32 %v10146_v20, %v4266_v33  ;;  %v4268_v61 = vadd.f32 %v4267_v29, %v4224_v62 }
 0x79d   : > { %v4269_v22 = vpop.f32.mrf.mxu0 }
 0x79e   : > { %v4488_v2 = vadd.f32 %v10154_v8, %v4460_v13  ;;  %v4461_v52 = vmul.f32 %v10146_v20, %v4268_v61  ;;  %v4270_v37 = vadd.f32 %v4269_v22, %v4226_v40 }
 0x79f   : > { %v4136_v55 = vpop.f32.mrf.mxu1  ;;  %v4271_v12 = vpop.f32.mrf.mxu0 }
 0x7a0   : > { %v4504_v53 = vmax.f32 %v4488_v2, 0.0  ;;  %v4489_v38 = vadd.f32 %v10154_v8, %v4461_v52  ;;  %v4468_v31 = vmul.f32 %v10149_v34, %v4270_v37  ;;  %v4272_v26 = vadd.f32 %v4271_v12, %v4228_v15 }
 0x7a1   : > { %v4138_v35 = vpop.f32.mrf.mxu1 }
 0x7a2   : > { %4520 = vst [vmem:[%s10162_s29 + $0x10] sm:$0xff] %v4504_v53  ;;  %v4505_v59 = vmax.f32 %v4489_v38, 0.0  ;;  %v4496_v4 = vadd.f32 %v10160_v43, %v4468_v31  ;;  %v4469_v23 = vmul.f32 %v10149_v34, %v4272_v26 }
 0x7a3   : > { %v4140_v57 = vpop.f32.mrf.mxu1 }
 0x7a4   : > { %4521 = vst [vmem:[%s10162_s29 + $0x18] sm:$0xff] %v4505_v59  ;;  %v4512_v5 = vmax.f32 %v4496_v4, 0.0  ;;  %v4497_v0 = vadd.f32 %v10160_v43, %v4469_v23 }
 0x7a5   : > { %v4142_v32 = vpop.f32.mrf.mxu1 }
 0x7a6   : > { %4528 = vst [vmem:[%s10162_s29 + $0x50] sm:$0xff] %v4512_v5  ;;  %v4513_v21 = vmax.f32 %v4497_v0, 0.0 }
 0x7a7   : > { %v4179_v48 = vpop.f32.mrf.mxu1 }
 0x7a8   : > { %v4180_v58 = vadd.f32 %v4179_v48, %v4136_v55  ;;  %4529 = vst [vmem:[%s10162_s29 + $0x58] sm:$0xff] %v4513_v21 }
 0x7a9   : > { %v4181_v9 = vpop.f32.mrf.mxu1 }
 0x7aa   : > { %v4458_v7 = vmul.f32 %v10146_v20, %v4180_v58  ;;  %v4182_v18 = vadd.f32 %v4181_v9, %v4138_v35 }
 0x7ab   : > { %v4183_v30 = vpop.f32.mrf.mxu1 }
 0x7ac   : > { %v4486_v39 = vadd.f32 %v10154_v8, %v4458_v7  ;;  %v4459_v6 = vmul.f32 %v10146_v20, %v4182_v18  ;;  %v4184_v25 = vadd.f32 %v4183_v30, %v4140_v57 }
 0x7ad   : > { %v4185_v24 = vpop.f32.mrf.mxu1 }
 0x7ae   : > { %v4502_v36 = vmax.f32 %v4486_v39, 0.0  ;;  %v4487_v51 = vadd.f32 %v10154_v8, %v4459_v6  ;;  %v4466_v10 = vmul.f32 %v10149_v34, %v4184_v25  ;;  %v4186_v17 = vadd.f32 %v4185_v24, %v4142_v32 }
 0x7af   : > { %v4351_v47 = vpop.f32.mrf.mxu0 }
 0x7b0   : > { %4518 = vst [vmem:[%s10162_s29] sm:$0xff] %v4502_v36  ;;  %v4503_v3 = vmax.f32 %v4487_v51, 0.0  ;;  %v4494_v49 = vadd.f32 %v10160_v43, %v4466_v10  ;;  %v4467_v14 = vmul.f32 %v10149_v34, %v4186_v17 }
 0x7b1   : > { %v4353_v45 = vpop.f32.mrf.mxu0 }
 0x7b2   : > { %4519 = vst [vmem:[%s10162_s29 + $0x8] sm:$0xff] %v4503_v3  ;;  %v4510_v60 = vmax.f32 %v4494_v49, 0.0  ;;  %v4495_v1 = vadd.f32 %v10160_v43, %v4467_v14 }
 0x7b3   : > { %v4355_v44 = vpop.f32.mrf.mxu0 }
 0x7b4   : > { %4526 = vst [vmem:[%s10162_s29 + $0x40] sm:$0xff] %v4510_v60  ;;  %v4511_v54 = vmax.f32 %v4495_v1, 0.0 }
 0x7b5   : > { %v4357_v56 = vpop.f32.mrf.mxu0 }
 0x7b6   : > { %4527 = vst [vmem:[%s10162_s29 + $0x48] sm:$0xff] %v4511_v54 }
 0x7ee   : > { %v4308_v42 = vpop.f32.mrf.mxu1 }
 0x7ef   : > { %v4352_v19 = vadd.f32 %v4351_v47, %v4308_v42 }
 0x7f0   : > { %v4310_v27 = vpop.f32.mrf.mxu1 }
 0x7f1   : > { %v4462_v46 = vmul.f32 %v10146_v20, %v4352_v19  ;;  %v4354_v41 = vadd.f32 %v4353_v45, %v4310_v27 }
 0x7f2   : > { %v4312_v63 = vpop.f32.mrf.mxu1 }
 0x7f3   : > { %v4490_v50 = vadd.f32 %v10154_v8, %v4462_v46  ;;  %v4463_v16 = vmul.f32 %v10146_v20, %v4354_v41  ;;  %v4356_v11 = vadd.f32 %v4355_v44, %v4312_v63 }
 0x7f4   : > { %v4314_v62 = vpop.f32.mrf.mxu1 }
 0x7f5   : > { %v4506_v40 = vmax.f32 %v4490_v50, 0.0  ;;  %v4491_v15 = vadd.f32 %v10154_v8, %v4463_v16  ;;  %v4470_v28 = vmul.f32 %v10149_v34, %v4356_v11  ;;  %v4358_v33 = vadd.f32 %v4357_v56, %v4314_v62 }
 0x7f6   : > { %v4437_v29 = vpop.f32.mrf.mxu1 }
 0x7f7   : > { %4522 = vst [vmem:[%s10162_s29 + $0x20] sm:$0xff] %v4506_v40  ;;  %v4507_v13 = vmax.f32 %v4491_v15, 0.0  ;;  %v4498_v61 = vadd.f32 %v10160_v43, %v4470_v28  ;;  %v4471_v22 = vmul.f32 %v10149_v34, %v4358_v33  ;;  %v4394_v2 = vpop.f32.mrf.mxu0 }
 0x7f8   : > { %v4438_v52 = vadd.f32 %v4437_v29, %v4394_v2  ;;  %v4439_v55 = vpop.f32.mrf.mxu1 }
 0x7f9   : > { %4523 = vst [vmem:[%s10162_s29 + $0x28] sm:$0xff] %v4507_v13  ;;  %v4514_v37 = vmax.f32 %v4498_v61, 0.0  ;;  %v4499_v12 = vadd.f32 %v10160_v43, %v4471_v22  ;;  %v4396_v53 = vpop.f32.mrf.mxu0 }
 0x7fa   : > { %v4464_v38 = vmul.f32 %v10146_v20, %v4438_v52  ;;  %v4440_v31 = vadd.f32 %v4439_v55, %v4396_v53  ;;  %v4441_v35 = vpop.f32.mrf.mxu1 }
 0x7fb   : > { %4530 = vst [vmem:[%s10162_s29 + $0x60] sm:$0xff] %v4514_v37  ;;  %v4515_v26 = vmax.f32 %v4499_v12, 0.0  ;;  %v4398_v59 = vpop.f32.mrf.mxu0 }
 0x7fc   : > { %v4492_v4 = vadd.f32 %v10154_v8, %v4464_v38  ;;  %v4465_v23 = vmul.f32 %v10146_v20, %v4440_v31  ;;  %v4442_v57 = vadd.f32 %v4441_v35, %v4398_v59  ;;  %v4443_v5 = vpop.f32.mrf.mxu1 }
 0x7fd   : > { %4531 = vst [vmem:[%s10162_s29 + $0x68] sm:$0xff] %v4515_v26  ;;  %v4400_v0 = vpop.f32.mrf.mxu0 }
 0x7fe   : > { %v4508_v32 = vmax.f32 %v4492_v4, 0.0  ;;  %v4493_v21 = vadd.f32 %v10154_v8, %v4465_v23  ;;  %v4472_v48 = vmul.f32 %v10149_v34, %v4442_v57  ;;  %v4444_v58 = vadd.f32 %v4443_v5, %v4400_v0 }
 0x800   : > { %4524 = vst [vmem:[%s10162_s29 + $0x30] sm:$0xff] %v4508_v32  ;;  %v4509_v9 = vmax.f32 %v4493_v21, 0.0  ;;  %v4500_v7 = vadd.f32 %v10160_v43, %v4472_v48  ;;  %v4473_v20 = vmul.f32 %v10149_v34, %v4444_v58 }
 0x802   : > { %4525 = vst [vmem:[%s10162_s29 + $0x38] sm:$0xff] %v4509_v9  ;;  %v4516_v18 = vmax.f32 %v4500_v7, 0.0  ;;  %v4501_v30 = vadd.f32 %v10160_v43, %v4473_v20 }
 0x804   : > { %4532 = vst [vmem:[%s10162_s29 + $0x70] sm:$0xff] %v4516_v18  ;;  %v4517_v8 = vmax.f32 %v4501_v30, 0.0 }
 0x806   : > { %4533 = vst [vmem:[%s10162_s29 + $0x78] sm:$0xff] %v4517_v8 }
 0x807   : > { %6482 = shalt.err (!%p6479_p0)
}
 0x808   : > { %s6483_s2 = scalar_lea.hbm %s10210_s19, 2048  ;;  %s6487_s28 = scalar_lea.hbm %s10272_s14, 4096 }
 0x809   : > { %p6484_p1 = scmp.ne.s32.totalorder %s10210_s19, %s6483_s2  ;;  %p6488_p4 = scmp.lt.s32.totalorder %s10210_s19, %s10272_s14 }
 0x80a   : > { %p6489_p7 = scmp.lt.s32.totalorder %s6487_s28, %s6483_s2 }
 0x80b   : > { %p6485_p2 = pnand %p6484_p1, %p6669_p5 }
 0x80c   : > { %p6490_p8 = por %p6489_p7, %p6488_p4 }
 0x80d   : > { %p6486_p3 = pneg %p6485_p2 }
 0x80f   : > { %p6491_p6 = pnand %p6490_p8, %p6486_p3 }
 0x811   : > { %6494 = shalt.err (!%p6491_p6)
}
 0x812   : > { %s6554_s24 = smov 1024   ;;  %s6555_s29 = smov 64  }
 0x813   : > { %5309 = dma.vmem_to_hbm [thread:$0]  (%p6669_p5), %s10212_s13, 2048, %s10210_s19, %s10218_s17, %s6554_s24, %s6554_s24, %s6555_s29  }
 0x814 PF: > { %s11122_s27 = sld [smem:[#allocation8_spill]]  ;;  %p5321_p9 = scmp.ge.s32.totalorder %s6533_s16, 2 }
 0x815   : > { %s11123_s20 = sld [smem:[#allocation12_spill]] }
 0x81a   : > { %s4563_s15 = sand.u32 1, %s11122_s27  }
 0x81b   : > { %p11124_p10 = scmp.ne.s32.totalorder %s11123_s20, 0  ;;  %s4564_s22 = scalar_lea.sflag [#allocation4], %s4563_s15 }
 0x81d   : > { %p5316_p11 = pnand %p5321_p9, %p11124_p10 }
 0x81f   : > { %p5317_p12 = pneg %p5316_p11 }
 0x821   : > { %6516 = dma.done.wait (%p5317_p12), %s4564_s22, 2048  }
 0x822   : > { %6518 = vsyncadd (%p5317_p12), %s4564_s22, 4294965248  ;;  %s11125_s16 = sld [smem:[#allocation10_spill]]  ;;  %s11128_s29 = smov %s6525_s30 }
 0x823   : > { %s11126_s0 = sld [smem:[#allocation9_spill]] }
 0x824   : > { %s11127_s15 = sld [smem:[#allocation11_spill]] }
 0x828   : > { %p25_p13 = scmp.ge.s32.totalorder %s11125_s16, 4  }
 0x829   : > { %s11129_s30 = smov %s11126_s0 }
 0x82a   :  { %27 = sbr.rel (!%p25_p13) target bundleno = 10 (0xa), region = 116 }
 0x82f   :  { %4569 = vsyncpa [#allocation3], 1 }
 0x830   :  { %4571 = vsyncpa [#allocation3 + $0x1], 1 }
 0x831   :  { %4572 = vsyncpa [#allocation4], 1 }
 0x832   :  { %4574 = vsyncpa [#allocation4 + $0x1], 1 }

</bundles_post_ra>
